<compile_context>
chip_gen: v7x
topology: tpu7x:2x2x1
jax: 0.10.0
libtpu: 0.0.40
codegen_flags: <defaults>
</compile_context>

<pallas_src>
import functools

import jax
import jax.numpy as jnp
from jax.experimental import pallas as pl
from jax.experimental.pallas import tpu as pltpu


# ----------------------------------------------------------------------------
# Hardware-derived budgets
# ----------------------------------------------------------------------------
def _round_up(x, m):
    return ((x + m - 1) // m) * m


def _vmem_limit_bytes():
    """3/4 of the chip's VMEM (v5e/v6e: 128 MiB -> 96 MiB, v7x: 64 -> 48 MiB);
    conservative 48 MiB fallback if the query is unavailable."""
    try:
        info = pltpu.get_tpu_info()
        cap = int(getattr(info, "vmem_capacity_bytes", 128 * 1024 * 1024))
        return min(96 * 1024 * 1024, (cap * 3) // 4)
    except Exception:
        return 48 * 1024 * 1024


_VMEM_LIMIT = _vmem_limit_bytes()
_W_TILE_BYTES = 8 * 1024 * 1024        # per-buffer bf16 weight-tile budget


# ----------------------------------------------------------------------------
# Pallas kernel: 4 accumulated MXU dots over shifted s2d windows + epilogue
# ----------------------------------------------------------------------------
def _conv_s2d_kernel(xs_ref, w_ref, shift_ref, o_ref, *, lo, wp1,
                     negative_slope):
    # xs_ref   : [1, Ls, 4*Cin] bf16  -- flattened 2x2 space-to-depth input
    # w_ref    : [4, 4*Cin, TN] bf16  -- one slab per (ddy, ddx) window
    # shift_ref: [1, TN]        f32   -- bias + BN shift (BN scale is in w)
    # o_ref    : [1, lo, TN]    bf16  -- lo = Ho*(Wo+1); column Wo is garbage
    acc = jnp.dot(xs_ref[0, pl.ds(0, lo), :], w_ref[0],
                  preferred_element_type=jnp.float32)
    acc += jnp.dot(xs_ref[0, pl.ds(1, lo), :], w_ref[1],
                   preferred_element_type=jnp.float32)
    acc += jnp.dot(xs_ref[0, pl.ds(wp1, lo), :], w_ref[2],
                   preferred_element_type=jnp.float32)
    acc += jnp.dot(xs_ref[0, pl.ds(wp1 + 1, lo), :], w_ref[3],
                   preferred_element_type=jnp.float32)
    y = acc + shift_ref[...]
    if negative_slope is not None:          # LeakyReLU(0.2), kept in f32
        y = jnp.where(y >= 0.0, y, jnp.float32(negative_slope) * y)
    o_ref[0] = y.astype(o_ref.dtype)


# ----------------------------------------------------------------------------
# Parameter folding (bias + inference-mode BatchNorm)
# ----------------------------------------------------------------------------
def _fold_scale_shift(w, b, bn, eps):
    """Fold BN into per-Cout scale/shift; scale goes into the weights,
    shift stays as the kernel's epilogue bias (all f32)."""
    if bn is not None:
        scale = bn["gamma"] * jax.lax.rsqrt(bn["var"] + eps)
        shift = (b - bn["mean"]) * scale + bn["beta"]
    else:
        scale = jnp.ones_like(b)
        shift = b
    return w * scale, shift                 # w: [4,4,Cin,Cout] * [Cout]


# ----------------------------------------------------------------------------
# 4x4 stride-2 pad-1 conv (+ fused bias / BN-inference / LeakyReLU)
# ----------------------------------------------------------------------------
def conv4x4_s2_pallas(x, w, b, bn=None, act=True, eps=1e-5):
    """x: [N,H,W,Cin] float, w: [4,4,Cin,Cout] f32, b: [Cout] f32.
    Returns [N, H//2, W//2, Cout] in bf16."""
    n, h, wd, cin = x.shape
    cout = w.shape[-1]
    ho, wo = h // 2, wd // 2
    wp1 = wo + 1
    lo = ho * wp1                     # output rows incl. one garbage column
    k4 = 4 * cin
    ls = (ho + 2) * wp1               # >= lo + wp1 + 1: covers all 4 windows

    # Activations: pad + 2x2 space-to-depth + flatten (one fused XLA copy,
    # ~same bytes as x; replaces the previous 4x im2col + pad copy).
    # TODO(synk): for very large spatial maps (per-batch s2d block > VMEM),
    # add a row-block grid axis with a 1-row halo via memory_space=pl.ANY +
    # manual make_async_copy; not needed at these sizes.
    xs = jnp.pad(x.astype(jnp.bfloat16),
                 ((0, 0),
                  (1, 2 * (ho + 2) - h - 1),
                  (1, 2 * wp1 - wd - 1),
                  (0, 0)))
    xs = xs.reshape(n, ho + 2, 2, wp1, 2, cin)
    xs = xs.transpose(0, 1, 3, 2, 4, 5).reshape(n, ls, k4)

    # Weights: fold BN scale, regroup taps as [ddy*2+ddx, (ry,rx,cin), cout],
    # zero-pad Cout to a lane-dense multiple of 128, cast to bf16.
    wf, shift = _fold_scale_shift(w, b, bn, eps)
    cout_p = _round_up(max(cout, 128), 128)
    wf = wf.reshape(2, 2, 2, 2, cin, cout).transpose(0, 2, 1, 3, 4, 5)
    wf = wf.reshape(4, k4, cout)
    wf = jnp.pad(wf, ((0, 0), (0, 0), (0, cout_p - cout))).astype(jnp.bfloat16)
    shift = jnp.pad(shift, (0, cout_p - cout)).reshape(1, cout_p)
    shift = shift.astype(jnp.float32)

    # Cout tiling: largest multiple of 128 dividing cout_p whose bf16 weight
    # tile stays under the budget (keeps double-buffered w small on v7x).
    tn = 128
    t = 128
    while t <= cout_p:
        if cout_p % t == 0 and 4 * k4 * t * 2 <= _W_TILE_BYTES:
            tn = t
        t += 128
    jt = cout_p // tn

    # Grid-axis order: the bigger stream (weights vs activations) is the one
    # whose block index stays constant over the inner axis -> fetched once.
    xs_bytes = xs.size * 2
    w_bytes = wf.size * 2
    out_bytes = n * lo * cout_p * 2
    w_outer = w_bytes > xs_bytes
    if w_outer:
        grid = (jt, n)
        xs_map = lambda j, bi: (bi, 0, 0)
        w_map = lambda j, bi: (0, 0, j)
        s_map = lambda j, bi: (0, j)
        o_map = lambda j, bi: (bi, 0, j)
        bytes_accessed = jt * xs_bytes + w_bytes + out_bytes + jt * shift.size * 4
    else:
        grid = (n, jt)
        xs_map = lambda bi, j: (bi, 0, 0)
        w_map = lambda bi, j: (0, 0, j)
        s_map = lambda bi, j: (0, j)
        o_map = lambda bi, j: (bi, 0, j)
        bytes_accessed = xs_bytes + n * w_bytes + out_bytes + n * jt * shift.size * 4

    out = pl.pallas_call(
        functools.partial(_conv_s2d_kernel, lo=lo, wp1=wp1,
                          negative_slope=0.2 if act else None),
        out_shape=jax.ShapeDtypeStruct((n, lo, cout_p), jnp.bfloat16),
        grid_spec=pltpu.PrefetchScalarGridSpec(
            num_scalar_prefetch=0,
            grid=grid,
            in_specs=[
                pl.BlockSpec((1, ls, k4), xs_map),
                pl.BlockSpec((4, k4, tn), w_map),
                pl.BlockSpec((1, tn), s_map),
            ],
            out_specs=pl.BlockSpec((1, lo, tn), o_map),
        ),
        compiler_params=pltpu.CompilerParams(
            dimension_semantics=("parallel", "parallel"),
            vmem_limit_bytes=_VMEM_LIMIT,
        ),
        cost_estimate=pl.CostEstimate(
            flops=2 * n * lo * (4 * k4) * cout_p,
            transcendentals=0,
            bytes_accessed=int(bytes_accessed),
        ),
    )(xs, wf, shift)

    # Drop the garbage column and the Cout padding (XLA fuses this slice into
    # the next layer's pad / space-to-depth copy).
    return out.reshape(n, ho, wp1, cout_p)[:, :, :wo, :cout]


# ----------------------------------------------------------------------------
# Pure-JAX/XLA reference with the same bf16-weight/activation, f32-accum recipe
# ----------------------------------------------------------------------------
def conv4x4_s2_ref(x, w, b, bn=None, act=True, eps=1e-5):
    wf, shift = _fold_scale_shift(w, b, bn, eps)
    y = jax.lax.conv_general_dilated(
        x.astype(jnp.bfloat16), wf.astype(jnp.bfloat16),
        window_strides=(2, 2), padding=((1, 1), (1, 1)),
        dimension_numbers=("NHWC", "HWIO", "NHWC"),
        preferred_element_type=jnp.float32)
    y = y + shift
    if act:
        y = jnp.where(y >= 0.0, y, 0.2 * y)
    return y.astype(jnp.bfloat16)


# ----------------------------------------------------------------------------
# P2DiscriminatorV1 forward
# ----------------------------------------------------------------------------
def p2disc_forward(params, x_nchw, conv=conv4x4_s2_pallas):
    x = jnp.transpose(x_nchw, (0, 2, 3, 1))            # NCHW -> NHWC
    layers = params["layers"]
    last = len(layers) - 1
    for i, p in enumerate(layers):
        # every layer has LeakyReLU(0.2) except the final 1-channel conv;
        # BN presence mirrors the PyTorch Sequential construction.
        x = conv(x, p["w"], p["b"], bn=p.get("bn", None), act=(i < last))
    return jnp.transpose(x, (0, 3, 1, 2)).astype(jnp.float32)   # NHWC -> NCHW


# ----------------------------------------------------------------------------
# Parameter construction (same layer structure as the PyTorch module)
# ----------------------------------------------------------------------------
def layer_config(input_nc, ndf, n_layers):
    cfg = [(input_nc, ndf, False)]                      # conv + LeakyReLU
    nf_mult = 1
    for n in range(1, n_layers):
        pre = nf_mult
        nf_mult = min(2 ** n, 8)
        cfg.append((ndf * pre, ndf * nf_mult, True))    # conv + BN + LeakyReLU
    pre = nf_mult
    nf_mult = min(2 ** n_layers, 8)
    cfg.append((ndf * pre, ndf * nf_mult, True))        # conv + BN + LeakyReLU
    cfg.append((ndf * nf_mult, 1, False))               # final conv (no act)
    return cfg


def init_params(key, input_nc, ndf, n_layers):
    # TODO(synk): BatchNorm is implemented in inference mode (running stats
    # folded into the conv epilogue); training-mode batch statistics would
    # need an extra cross-tile mean/var reduction pass.
    layers = []
    for cin, cout, has_bn in layer_config(input_nc, ndf, n_layers):
        key, k1, k2, k3, k4, k5, k6 = jax.random.split(key, 7)
        s = float((4 * 4 * cin) ** -0.5)                # PyTorch default init
        layer = {
            "w": jax.random.uniform(k1, (4, 4, cin, cout), jnp.float32, -s, s),
            "b": jax.random.uniform(k2, (cout,), jnp.float32, -s, s),
        }
        if has_bn:
            layer["bn"] = {
                "gamma": 1.0 + 0.1 * jax.random.normal(k3, (cout,), jnp.float32),
                "beta": 0.1 * jax.random.normal(k4, (cout,), jnp.float32),
                "mean": 0.1 * jax.random.normal(k5, (cout,), jnp.float32),
                "var": jax.random.uniform(k6, (cout,), jnp.float32, 0.5, 1.5),
            }
        layers.append(layer)
    return {"layers": layers}


if __name__ == "__main__":
    key = jax.random.PRNGKey(0)
    kp, kx = jax.random.split(key)

    input_nc, ndf, n_layers = 4, 8, 3
    batch, height, width = 2, 32, 32

    params = init_params(kp, input_nc, ndf, n_layers)
    x = jax.random.normal(kx, (batch, input_nc, height, width), jnp.float32)

    fwd = jax.jit(p2disc_forward)                       # Pallas path
    out = jax.block_until_ready(fwd(params, x))
    expect = height // (2 ** (n_layers + 2))
    assert out.shape == (batch, 1, expect, expect), out.shape

    # Cross-check against an XLA conv reference using the same bf16 recipe.
    ref_fwd = jax.jit(functools.partial(p2disc_forward, conv=conv4x4_s2_ref))
    ref = jax.block_until_ready(ref_fwd(params, x))
    max_err = float(jnp.max(jnp.abs(out - ref)))
    assert jnp.allclose(out, ref, rtol=2e-2, atol=2e-2), f"max abs err {max_err}"

    print("KERNEL_OK")
</pallas_src>

<mosaic_0001>
module attributes {stable_mosaic.version = 11 : i64} {
  func.func @_conv_s2d_kernel(%arg0: i32, %arg1: i32, %arg2: memref<1x306x16xbf16, #tpu.memory_space<vmem>>, %arg3: memref<4x16x128xbf16, #tpu.memory_space<vmem>>, %arg4: memref<1x128xf32, #tpu.memory_space<vmem>>, %arg5: memref<1x272x128xbf16, #tpu.memory_space<vmem>>) attributes {dimension_semantics = [#tpu.dimension_semantics<parallel>, #tpu.dimension_semantics<parallel>], iteration_bounds = array<i64: 2, 1>, scalar_prefetch = 0 : i64, scratch_operands = 0 : i64, tpu.core_type = #tpu.core_type<tc>, window_params = [{transform_indices = @transform_0, window_bounds = array<i64: 1, 306, 16>}, {transform_indices = @transform_1, window_bounds = array<i64: 4, 16, 128>}, {transform_indices = @transform_2, window_bounds = array<i64: 1, 128>}, {transform_indices = @transform_3, window_bounds = array<i64: 1, 272, 128>}]} {
    %c0 = arith.constant 0 : index
    %c0_0 = arith.constant 0 : index
    %c0_1 = arith.constant 0 : index
    %0 = vector.load %arg2[%c0, %c0_0, %c0_1] : memref<1x306x16xbf16, #tpu.memory_space<vmem>>, vector<1x272x16xbf16>
    %1 = vector.shape_cast %0 : vector<1x272x16xbf16> to vector<272x16xbf16>
    %c0_2 = arith.constant 0 : index
    %c0_3 = arith.constant 0 : index
    %c0_4 = arith.constant 0 : index
    %2 = vector.load %arg3[%c0_2, %c0_3, %c0_4] : memref<4x16x128xbf16, #tpu.memory_space<vmem>>, vector<1x16x128xbf16>
    %3 = vector.shape_cast %2 : vector<1x16x128xbf16> to vector<16x128xbf16>
    %cst = arith.constant dense<0.000000e+00> : vector<272x128xf32>
    %4 = tpu.matmul %1, %3, %cst {dimension_numbers = #tpu.dot_dimension_numbers<[1], [0], [0], [1], [0, 0, 1, 1], [], []>} : vector<272x16xbf16>, vector<16x128xbf16>, vector<272x128xf32> -> vector<272x128xf32>
    %c0_5 = arith.constant 0 : index
    %c1 = arith.constant 1 : index
    %c0_6 = arith.constant 0 : index
    %5 = vector.load %arg2[%c0_5, %c1, %c0_6] : memref<1x306x16xbf16, #tpu.memory_space<vmem>>, vector<1x272x16xbf16>
    %6 = vector.shape_cast %5 : vector<1x272x16xbf16> to vector<272x16xbf16>
    %c1_7 = arith.constant 1 : index
    %c0_8 = arith.constant 0 : index
    %c0_9 = arith.constant 0 : index
    %7 = vector.load %arg3[%c1_7, %c0_8, %c0_9] : memref<4x16x128xbf16, #tpu.memory_space<vmem>>, vector<1x16x128xbf16>
    %8 = vector.shape_cast %7 : vector<1x16x128xbf16> to vector<16x128xbf16>
    %cst_10 = arith.constant dense<0.000000e+00> : vector<272x128xf32>
    %9 = tpu.matmul %6, %8, %cst_10 {dimension_numbers = #tpu.dot_dimension_numbers<[1], [0], [0], [1], [0, 0, 1, 1], [], []>} : vector<272x16xbf16>, vector<16x128xbf16>, vector<272x128xf32> -> vector<272x128xf32>
    %10 = arith.addf %4, %9 : vector<272x128xf32>
    %c0_11 = arith.constant 0 : index
    %c17 = arith.constant 17 : index
    %c0_12 = arith.constant 0 : index
    %11 = vector.load %arg2[%c0_11, %c17, %c0_12] : memref<1x306x16xbf16, #tpu.memory_space<vmem>>, vector<1x272x16xbf16>
    %12 = vector.shape_cast %11 : vector<1x272x16xbf16> to vector<272x16xbf16>
    %c2 = arith.constant 2 : index
    %c0_13 = arith.constant 0 : index
    %c0_14 = arith.constant 0 : index
    %13 = vector.load %arg3[%c2, %c0_13, %c0_14] : memref<4x16x128xbf16, #tpu.memory_space<vmem>>, vector<1x16x128xbf16>
    %14 = vector.shape_cast %13 : vector<1x16x128xbf16> to vector<16x128xbf16>
    %cst_15 = arith.constant dense<0.000000e+00> : vector<272x128xf32>
    %15 = tpu.matmul %12, %14, %cst_15 {dimension_numbers = #tpu.dot_dimension_numbers<[1], [0], [0], [1], [0, 0, 1, 1], [], []>} : vector<272x16xbf16>, vector<16x128xbf16>, vector<272x128xf32> -> vector<272x128xf32>
    %16 = arith.addf %10, %15 : vector<272x128xf32>
    %c0_16 = arith.constant 0 : index
    %c18 = arith.constant 18 : index
    %c0_17 = arith.constant 0 : index
    %17 = vector.load %arg2[%c0_16, %c18, %c0_17] : memref<1x306x16xbf16, #tpu.memory_space<vmem>>, vector<1x272x16xbf16>
    %18 = vector.shape_cast %17 : vector<1x272x16xbf16> to vector<272x16xbf16>
    %c3 = arith.constant 3 : index
    %c0_18 = arith.constant 0 : index
    %c0_19 = arith.constant 0 : index
    %19 = vector.load %arg3[%c3, %c0_18, %c0_19] : memref<4x16x128xbf16, #tpu.memory_space<vmem>>, vector<1x16x128xbf16>
    %20 = vector.shape_cast %19 : vector<1x16x128xbf16> to vector<16x128xbf16>
    %cst_20 = arith.constant dense<0.000000e+00> : vector<272x128xf32>
    %21 = tpu.matmul %18, %20, %cst_20 {dimension_numbers = #tpu.dot_dimension_numbers<[1], [0], [0], [1], [0, 0, 1, 1], [], []>} : vector<272x16xbf16>, vector<16x128xbf16>, vector<272x128xf32> -> vector<272x128xf32>
    %22 = arith.addf %16, %21 : vector<272x128xf32>
    %c0_21 = arith.constant 0 : index
    %c0_22 = arith.constant 0 : index
    %23 = vector.load %arg4[%c0_21, %c0_22] : memref<1x128xf32, #tpu.memory_space<vmem>>, vector<1x128xf32>
    %24 = vector.broadcast %23 : vector<1x128xf32> to vector<272x128xf32>
    %25 = arith.addf %22, %24 : vector<272x128xf32>
    %cst_23 = arith.constant 0.000000e+00 : f32
    %26 = vector.broadcast %cst_23 : f32 to vector<272x128xf32>
    %27 = arith.cmpf oge, %25, %26 : vector<272x128xf32>
    %cst_24 = arith.constant 2.000000e-01 : f32
    %28 = vector.broadcast %cst_24 : f32 to vector<272x128xf32>
    %29 = arith.mulf %28, %25 : vector<272x128xf32>
    %30 = arith.select %27, %25, %29 : vector<272x128xi1>, vector<272x128xf32>
    %31 = arith.truncf %30 : vector<272x128xf32> to vector<272x128xbf16>
    %c0_25 = arith.constant 0 : index
    %c0_26 = arith.constant 0 : index
    %c0_27 = arith.constant 0 : index
    %32 = vector.load %arg5[%c0_25, %c0_26, %c0_27] : memref<1x272x128xbf16, #tpu.memory_space<vmem>>, vector<1x272x128xbf16>
    %33 = vector.shape_cast %32 : vector<1x272x128xbf16> to vector<272x128xbf16>
    %34 = vector.shape_cast %31 : vector<272x128xbf16> to vector<1x272x128xbf16>
    tpu.vector_store %arg5[%c0_25, %c0_26, %c0_27], %34 {strides = array<i32>} : memref<1x272x128xbf16, #tpu.memory_space<vmem>>, vector<1x272x128xbf16>,
    return
  }
  func.func @transform_0(%arg0: i32, %arg1: i32) -> (i32, i32, i32) {
    %c0_i32 = arith.constant 0 : i32
    %c0_i32_0 = arith.constant 0 : i32
    %c0_i32_1 = arith.constant 0 : i32
    return %arg0, %c0_i32, %c0_i32_0 : i32, i32, i32
  }
  func.func @transform_1(%arg0: i32, %arg1: i32) -> (i32, i32, i32) {
    %c0_i32 = arith.constant 0 : i32
    %c0_i32_0 = arith.constant 0 : i32
    %c0_i32_1 = arith.constant 0 : i32
    return %c0_i32, %c0_i32_0, %arg1 : i32, i32, i32
  }
  func.func @transform_2(%arg0: i32, %arg1: i32) -> (i32, i32) {
    %c0_i32 = arith.constant 0 : i32
    %c0_i32_0 = arith.constant 0 : i32
    return %c0_i32, %arg1 : i32, i32
  }
  func.func @transform_3(%arg0: i32, %arg1: i32) -> (i32, i32, i32) {
    %c0_i32 = arith.constant 0 : i32
    %c0_i32_0 = arith.constant 0 : i32
    return %arg0, %c0_i32, %arg1 : i32, i32, i32
  }
}

module attributes {stable_mosaic.version = 11 : i64} {
  func.func @_conv_s2d_kernel(%arg0: i32, %arg1: i32, %arg2: memref<1x90x32xbf16, #tpu.memory_space<vmem>>, %arg3: memref<4x32x128xbf16, #tpu.memory_space<vmem>>, %arg4: memref<1x128xf32, #tpu.memory_space<vmem>>, %arg5: memref<1x72x128xbf16, #tpu.memory_space<vmem>>) attributes {dimension_semantics = [#tpu.dimension_semantics<parallel>, #tpu.dimension_semantics<parallel>], iteration_bounds = array<i64: 1, 2>, scalar_prefetch = 0 : i64, scratch_operands = 0 : i64, tpu.core_type = #tpu.core_type<tc>, window_params = [{transform_indices = @transform_0, window_bounds = array<i64: 1, 90, 32>}, {transform_indices = @transform_1, window_bounds = array<i64: 4, 32, 128>}, {transform_indices = @transform_2, window_bounds = array<i64: 1, 128>}, {transform_indices = @transform_3, window_bounds = array<i64: 1, 72, 128>}]} {
    %c0 = arith.constant 0 : index
    %c0_0 = arith.constant 0 : index
    %c0_1 = arith.constant 0 : index
    %0 = vector.load %arg2[%c0, %c0_0, %c0_1] : memref<1x90x32xbf16, #tpu.memory_space<vmem>>, vector<1x72x32xbf16>
    %1 = vector.shape_cast %0 : vector<1x72x32xbf16> to vector<72x32xbf16>
    %c0_2 = arith.constant 0 : index
    %c0_3 = arith.constant 0 : index
    %c0_4 = arith.constant 0 : index
    %2 = vector.load %arg3[%c0_2, %c0_3, %c0_4] : memref<4x32x128xbf16, #tpu.memory_space<vmem>>, vector<1x32x128xbf16>
    %3 = vector.shape_cast %2 : vector<1x32x128xbf16> to vector<32x128xbf16>
    %cst = arith.constant dense<0.000000e+00> : vector<72x128xf32>
    %4 = tpu.matmul %1, %3, %cst {dimension_numbers = #tpu.dot_dimension_numbers<[1], [0], [0], [1], [0, 0, 1, 1], [], []>} : vector<72x32xbf16>, vector<32x128xbf16>, vector<72x128xf32> -> vector<72x128xf32>
    %c0_5 = arith.constant 0 : index
    %c1 = arith.constant 1 : index
    %c0_6 = arith.constant 0 : index
    %5 = vector.load %arg2[%c0_5, %c1, %c0_6] : memref<1x90x32xbf16, #tpu.memory_space<vmem>>, vector<1x72x32xbf16>
    %6 = vector.shape_cast %5 : vector<1x72x32xbf16> to vector<72x32xbf16>
    %c1_7 = arith.constant 1 : index
    %c0_8 = arith.constant 0 : index
    %c0_9 = arith.constant 0 : index
    %7 = vector.load %arg3[%c1_7, %c0_8, %c0_9] : memref<4x32x128xbf16, #tpu.memory_space<vmem>>, vector<1x32x128xbf16>
    %8 = vector.shape_cast %7 : vector<1x32x128xbf16> to vector<32x128xbf16>
    %cst_10 = arith.constant dense<0.000000e+00> : vector<72x128xf32>
    %9 = tpu.matmul %6, %8, %cst_10 {dimension_numbers = #tpu.dot_dimension_numbers<[1], [0], [0], [1], [0, 0, 1, 1], [], []>} : vector<72x32xbf16>, vector<32x128xbf16>, vector<72x128xf32> -> vector<72x128xf32>
    %10 = arith.addf %4, %9 : vector<72x128xf32>
    %c0_11 = arith.constant 0 : index
    %c9 = arith.constant 9 : index
    %c0_12 = arith.constant 0 : index
    %11 = vector.load %arg2[%c0_11, %c9, %c0_12] : memref<1x90x32xbf16, #tpu.memory_space<vmem>>, vector<1x72x32xbf16>
    %12 = vector.shape_cast %11 : vector<1x72x32xbf16> to vector<72x32xbf16>
    %c2 = arith.constant 2 : index
    %c0_13 = arith.constant 0 : index
    %c0_14 = arith.constant 0 : index
    %13 = vector.load %arg3[%c2, %c0_13, %c0_14] : memref<4x32x128xbf16, #tpu.memory_space<vmem>>, vector<1x32x128xbf16>
    %14 = vector.shape_cast %13 : vector<1x32x128xbf16> to vector<32x128xbf16>
    %cst_15 = arith.constant dense<0.000000e+00> : vector<72x128xf32>
    %15 = tpu.matmul %12, %14, %cst_15 {dimension_numbers = #tpu.dot_dimension_numbers<[1], [0], [0], [1], [0, 0, 1, 1], [], []>} : vector<72x32xbf16>, vector<32x128xbf16>, vector<72x128xf32> -> vector<72x128xf32>
    %16 = arith.addf %10, %15 : vector<72x128xf32>
    %c0_16 = arith.constant 0 : index
    %c10 = arith.constant 10 : index
    %c0_17 = arith.constant 0 : index
    %17 = vector.load %arg2[%c0_16, %c10, %c0_17] : memref<1x90x32xbf16, #tpu.memory_space<vmem>>, vector<1x72x32xbf16>
    %18 = vector.shape_cast %17 : vector<1x72x32xbf16> to vector<72x32xbf16>
    %c3 = arith.constant 3 : index
    %c0_18 = arith.constant 0 : index
    %c0_19 = arith.constant 0 : index
    %19 = vector.load %arg3[%c3, %c0_18, %c0_19] : memref<4x32x128xbf16, #tpu.memory_space<vmem>>, vector<1x32x128xbf16>
    %20 = vector.shape_cast %19 : vector<1x32x128xbf16> to vector<32x128xbf16>
    %cst_20 = arith.constant dense<0.000000e+00> : vector<72x128xf32>
    %21 = tpu.matmul %18, %20, %cst_20 {dimension_numbers = #tpu.dot_dimension_numbers<[1], [0], [0], [1], [0, 0, 1, 1], [], []>} : vector<72x32xbf16>, vector<32x128xbf16>, vector<72x128xf32> -> vector<72x128xf32>
    %22 = arith.addf %16, %21 : vector<72x128xf32>
    %c0_21 = arith.constant 0 : index
    %c0_22 = arith.constant 0 : index
    %23 = vector.load %arg4[%c0_21, %c0_22] : memref<1x128xf32, #tpu.memory_space<vmem>>, vector<1x128xf32>
    %24 = vector.broadcast %23 : vector<1x128xf32> to vector<72x128xf32>
    %25 = arith.addf %22, %24 : vector<72x128xf32>
    %cst_23 = arith.constant 0.000000e+00 : f32
    %26 = vector.broadcast %cst_23 : f32 to vector<72x128xf32>
    %27 = arith.cmpf oge, %25, %26 : vector<72x128xf32>
    %cst_24 = arith.constant 2.000000e-01 : f32
    %28 = vector.broadcast %cst_24 : f32 to vector<72x128xf32>
    %29 = arith.mulf %28, %25 : vector<72x128xf32>
    %30 = arith.select %27, %25, %29 : vector<72x128xi1>, vector<72x128xf32>
    %31 = arith.truncf %30 : vector<72x128xf32> to vector<72x128xbf16>
    %c0_25 = arith.constant 0 : index
    %c0_26 = arith.constant 0 : index
    %c0_27 = arith.constant 0 : index
    %32 = vector.load %arg5[%c0_25, %c0_26, %c0_27] : memref<1x72x128xbf16, #tpu.memory_space<vmem>>, vector<1x72x128xbf16>
    %33 = vector.shape_cast %32 : vector<1x72x128xbf16> to vector<72x128xbf16>
    %34 = vector.shape_cast %31 : vector<72x128xbf16> to vector<1x72x128xbf16>
    tpu.vector_store %arg5[%c0_25, %c0_26, %c0_27], %34 {strides = array<i32>} : memref<1x72x128xbf16, #tpu.memory_space<vmem>>, vector<1x72x128xbf16>,
    return
  }
  func.func @transform_0(%arg0: i32, %arg1: i32) -> (i32, i32, i32) {
    %c0_i32 = arith.constant 0 : i32
    %c0_i32_0 = arith.constant 0 : i32
    %c0_i32_1 = arith.constant 0 : i32
    return %arg1, %c0_i32, %c0_i32_0 : i32, i32, i32
  }
  func.func @transform_1(%arg0: i32, %arg1: i32) -> (i32, i32, i32) {
    %c0_i32 = arith.constant 0 : i32
    %c0_i32_0 = arith.constant 0 : i32
    %c0_i32_1 = arith.constant 0 : i32
    return %c0_i32, %c0_i32_0, %arg0 : i32, i32, i32
  }
  func.func @transform_2(%arg0: i32, %arg1: i32) -> (i32, i32) {
    %c0_i32 = arith.constant 0 : i32
    %c0_i32_0 = arith.constant 0 : i32
    return %c0_i32, %arg0 : i32, i32
  }
  func.func @transform_3(%arg0: i32, %arg1: i32) -> (i32, i32, i32) {
    %c0_i32 = arith.constant 0 : i32
    %c0_i32_0 = arith.constant 0 : i32
    return %arg1, %c0_i32, %arg0 : i32, i32, i32
  }
}

module attributes {stable_mosaic.version = 11 : i64} {
  func.func @_conv_s2d_kernel(%arg0: i32, %arg1: i32, %arg2: memref<1x30x64xbf16, #tpu.memory_space<vmem>>, %arg3: memref<4x64x128xbf16, #tpu.memory_space<vmem>>, %arg4: memref<1x128xf32, #tpu.memory_space<vmem>>, %arg5: memref<1x20x128xbf16, #tpu.memory_space<vmem>>) attributes {dimension_semantics = [#tpu.dimension_semantics<parallel>, #tpu.dimension_semantics<parallel>], iteration_bounds = array<i64: 1, 2>, scalar_prefetch = 0 : i64, scratch_operands = 0 : i64, tpu.core_type = #tpu.core_type<tc>, window_params = [{transform_indices = @transform_0, window_bounds = array<i64: 1, 30, 64>}, {transform_indices = @transform_1, window_bounds = array<i64: 4, 64, 128>}, {transform_indices = @transform_2, window_bounds = array<i64: 1, 128>}, {transform_indices = @transform_3, window_bounds = array<i64: 1, 20, 128>}]} {
    %c0 = arith.constant 0 : index
    %c0_0 = arith.constant 0 : index
    %c0_1 = arith.constant 0 : index
    %0 = vector.load %arg2[%c0, %c0_0, %c0_1] : memref<1x30x64xbf16, #tpu.memory_space<vmem>>, vector<1x20x64xbf16>
    %1 = vector.shape_cast %0 : vector<1x20x64xbf16> to vector<20x64xbf16>
    %c0_2 = arith.constant 0 : index
    %c0_3 = arith.constant 0 : index
    %c0_4 = arith.constant 0 : index
    %2 = vector.load %arg3[%c0_2, %c0_3, %c0_4] : memref<4x64x128xbf16, #tpu.memory_space<vmem>>, vector<1x64x128xbf16>
    %3 = vector.shape_cast %2 : vector<1x64x128xbf16> to vector<64x128xbf16>
    %cst = arith.constant dense<0.000000e+00> : vector<20x128xf32>
    %4 = tpu.matmul %1, %3, %cst {dimension_numbers = #tpu.dot_dimension_numbers<[1], [0], [0], [1], [0, 0, 1, 1], [], []>} : vector<20x64xbf16>, vector<64x128xbf16>, vector<20x128xf32> -> vector<20x128xf32>
    %c0_5 = arith.constant 0 : index
    %c1 = arith.constant 1 : index
    %c0_6 = arith.constant 0 : index
    %5 = vector.load %arg2[%c0_5, %c1, %c0_6] : memref<1x30x64xbf16, #tpu.memory_space<vmem>>, vector<1x20x64xbf16>
    %6 = vector.shape_cast %5 : vector<1x20x64xbf16> to vector<20x64xbf16>
    %c1_7 = arith.constant 1 : index
    %c0_8 = arith.constant 0 : index
    %c0_9 = arith.constant 0 : index
    %7 = vector.load %arg3[%c1_7, %c0_8, %c0_9] : memref<4x64x128xbf16, #tpu.memory_space<vmem>>, vector<1x64x128xbf16>
    %8 = vector.shape_cast %7 : vector<1x64x128xbf16> to vector<64x128xbf16>
    %cst_10 = arith.constant dense<0.000000e+00> : vector<20x128xf32>
    %9 = tpu.matmul %6, %8, %cst_10 {dimension_numbers = #tpu.dot_dimension_numbers<[1], [0], [0], [1], [0, 0, 1, 1], [], []>} : vector<20x64xbf16>, vector<64x128xbf16>, vector<20x128xf32> -> vector<20x128xf32>
    %10 = arith.addf %4, %9 : vector<20x128xf32>
    %c0_11 = arith.constant 0 : index
    %c5 = arith.constant 5 : index
    %c0_12 = arith.constant 0 : index
    %11 = vector.load %arg2[%c0_11, %c5, %c0_12] : memref<1x30x64xbf16, #tpu.memory_space<vmem>>, vector<1x20x64xbf16>
    %12 = vector.shape_cast %11 : vector<1x20x64xbf16> to vector<20x64xbf16>
    %c2 = arith.constant 2 : index
    %c0_13 = arith.constant 0 : index
    %c0_14 = arith.constant 0 : index
    %13 = vector.load %arg3[%c2, %c0_13, %c0_14] : memref<4x64x128xbf16, #tpu.memory_space<vmem>>, vector<1x64x128xbf16>
    %14 = vector.shape_cast %13 : vector<1x64x128xbf16> to vector<64x128xbf16>
    %cst_15 = arith.constant dense<0.000000e+00> : vector<20x128xf32>
    %15 = tpu.matmul %12, %14, %cst_15 {dimension_numbers = #tpu.dot_dimension_numbers<[1], [0], [0], [1], [0, 0, 1, 1], [], []>} : vector<20x64xbf16>, vector<64x128xbf16>, vector<20x128xf32> -> vector<20x128xf32>
    %16 = arith.addf %10, %15 : vector<20x128xf32>
    %c0_16 = arith.constant 0 : index
    %c6 = arith.constant 6 : index
    %c0_17 = arith.constant 0 : index
    %17 = vector.load %arg2[%c0_16, %c6, %c0_17] : memref<1x30x64xbf16, #tpu.memory_space<vmem>>, vector<1x20x64xbf16>
    %18 = vector.shape_cast %17 : vector<1x20x64xbf16> to vector<20x64xbf16>
    %c3 = arith.constant 3 : index
    %c0_18 = arith.constant 0 : index
    %c0_19 = arith.constant 0 : index
    %19 = vector.load %arg3[%c3, %c0_18, %c0_19] : memref<4x64x128xbf16, #tpu.memory_space<vmem>>, vector<1x64x128xbf16>
    %20 = vector.shape_cast %19 : vector<1x64x128xbf16> to vector<64x128xbf16>
    %cst_20 = arith.constant dense<0.000000e+00> : vector<20x128xf32>
    %21 = tpu.matmul %18, %20, %cst_20 {dimension_numbers = #tpu.dot_dimension_numbers<[1], [0], [0], [1], [0, 0, 1, 1], [], []>} : vector<20x64xbf16>, vector<64x128xbf16>, vector<20x128xf32> -> vector<20x128xf32>
    %22 = arith.addf %16, %21 : vector<20x128xf32>
    %c0_21 = arith.constant 0 : index
    %c0_22 = arith.constant 0 : index
    %23 = vector.load %arg4[%c0_21, %c0_22] : memref<1x128xf32, #tpu.memory_space<vmem>>, vector<1x128xf32>
    %24 = vector.broadcast %23 : vector<1x128xf32> to vector<20x128xf32>
    %25 = arith.addf %22, %24 : vector<20x128xf32>
    %cst_23 = arith.constant 0.000000e+00 : f32
    %26 = vector.broadcast %cst_23 : f32 to vector<20x128xf32>
    %27 = arith.cmpf oge, %25, %26 : vector<20x128xf32>
    %cst_24 = arith.constant 2.000000e-01 : f32
    %28 = vector.broadcast %cst_24 : f32 to vector<20x128xf32>
    %29 = arith.mulf %28, %25 : vector<20x128xf32>
    %30 = arith.select %27, %25, %29 : vector<20x128xi1>, vector<20x128xf32>
    %31 = arith.truncf %30 : vector<20x128xf32> to vector<20x128xbf16>
    %c0_25 = arith.constant 0 : index
    %c0_26 = arith.constant 0 : index
    %c0_27 = arith.constant 0 : index
    %32 = vector.load %arg5[%c0_25, %c0_26, %c0_27] : memref<1x20x128xbf16, #tpu.memory_space<vmem>>, vector<1x20x128xbf16>
    %33 = vector.shape_cast %32 : vector<1x20x128xbf16> to vector<20x128xbf16>
    %34 = vector.shape_cast %31 : vector<20x128xbf16> to vector<1x20x128xbf16>
    tpu.vector_store %arg5[%c0_25, %c0_26, %c0_27], %34 {strides = array<i32>} : memref<1x20x128xbf16, #tpu.memory_space<vmem>>, vector<1x20x128xbf16>,
    return
  }
  func.func @transform_0(%arg0: i32, %arg1: i32) -> (i32, i32, i32) {
    %c0_i32 = arith.constant 0 : i32
    %c0_i32_0 = arith.constant 0 : i32
    %c0_i32_1 = arith.constant 0 : i32
    return %arg1, %c0_i32, %c0_i32_0 : i32, i32, i32
  }
  func.func @transform_1(%arg0: i32, %arg1: i32) -> (i32, i32, i32) {
    %c0_i32 = arith.constant 0 : i32
    %c0_i32_0 = arith.constant 0 : i32
    %c0_i32_1 = arith.constant 0 : i32
    return %c0_i32, %c0_i32_0, %arg0 : i32, i32, i32
  }
  func.func @transform_2(%arg0: i32, %arg1: i32) -> (i32, i32) {
    %c0_i32 = arith.constant 0 : i32
    %c0_i32_0 = arith.constant 0 : i32
    return %c0_i32, %arg0 : i32, i32
  }
  func.func @transform_3(%arg0: i32, %arg1: i32) -> (i32, i32, i32) {
    %c0_i32 = arith.constant 0 : i32
    %c0_i32_0 = arith.constant 0 : i32
    return %arg1, %c0_i32, %arg0 : i32, i32, i32
  }
}

module attributes {stable_mosaic.version = 11 : i64} {
  func.func @_conv_s2d_kernel(%arg0: i32, %arg1: i32, %arg2: memref<1x12x128xbf16, #tpu.memory_space<vmem>>, %arg3: memref<4x128x128xbf16, #tpu.memory_space<vmem>>, %arg4: memref<1x128xf32, #tpu.memory_space<vmem>>, %arg5: memref<1x6x128xbf16, #tpu.memory_space<vmem>>) attributes {dimension_semantics = [#tpu.dimension_semantics<parallel>, #tpu.dimension_semantics<parallel>], iteration_bounds = array<i64: 1, 2>, scalar_prefetch = 0 : i64, scratch_operands = 0 : i64, tpu.core_type = #tpu.core_type<tc>, window_params = [{transform_indices = @transform_0, window_bounds = array<i64: 1, 12, 128>}, {transform_indices = @transform_1, window_bounds = array<i64: 4, 128, 128>}, {transform_indices = @transform_2, window_bounds = array<i64: 1, 128>}, {transform_indices = @transform_3, window_bounds = array<i64: 1, 6, 128>}]} {
    %c0 = arith.constant 0 : index
    %c0_0 = arith.constant 0 : index
    %c0_1 = arith.constant 0 : index
    %0 = vector.load %arg2[%c0, %c0_0, %c0_1] : memref<1x12x128xbf16, #tpu.memory_space<vmem>>, vector<1x6x128xbf16>
    %1 = vector.shape_cast %0 : vector<1x6x128xbf16> to vector<6x128xbf16>
    %c0_2 = arith.constant 0 : index
    %c0_3 = arith.constant 0 : index
    %c0_4 = arith.constant 0 : index
    %2 = vector.load %arg3[%c0_2, %c0_3, %c0_4] : memref<4x128x128xbf16, #tpu.memory_space<vmem>>, vector<1x128x128xbf16>
    %3 = vector.shape_cast %2 : vector<1x128x128xbf16> to vector<128x128xbf16>
    %cst = arith.constant dense<0.000000e+00> : vector<6x128xf32>
    %4 = tpu.matmul %1, %3, %cst {dimension_numbers = #tpu.dot_dimension_numbers<[1], [0], [0], [1], [0, 0, 1, 1], [], []>} : vector<6x128xbf16>, vector<128x128xbf16>, vector<6x128xf32> -> vector<6x128xf32>
    %c0_5 = arith.constant 0 : index
    %c1 = arith.constant 1 : index
    %c0_6 = arith.constant 0 : index
    %5 = vector.load %arg2[%c0_5, %c1, %c0_6] : memref<1x12x128xbf16, #tpu.memory_space<vmem>>, vector<1x6x128xbf16>
    %6 = vector.shape_cast %5 : vector<1x6x128xbf16> to vector<6x128xbf16>
    %c1_7 = arith.constant 1 : index
    %c0_8 = arith.constant 0 : index
    %c0_9 = arith.constant 0 : index
    %7 = vector.load %arg3[%c1_7, %c0_8, %c0_9] : memref<4x128x128xbf16, #tpu.memory_space<vmem>>, vector<1x128x128xbf16>
    %8 = vector.shape_cast %7 : vector<1x128x128xbf16> to vector<128x128xbf16>
    %cst_10 = arith.constant dense<0.000000e+00> : vector<6x128xf32>
    %9 = tpu.matmul %6, %8, %cst_10 {dimension_numbers = #tpu.dot_dimension_numbers<[1], [0], [0], [1], [0, 0, 1, 1], [], []>} : vector<6x128xbf16>, vector<128x128xbf16>, vector<6x128xf32> -> vector<6x128xf32>
    %10 = arith.addf %4, %9 : vector<6x128xf32>
    %c0_11 = arith.constant 0 : index
    %c3 = arith.constant 3 : index
    %c0_12 = arith.constant 0 : index
    %11 = vector.load %arg2[%c0_11, %c3, %c0_12] : memref<1x12x128xbf16, #tpu.memory_space<vmem>>, vector<1x6x128xbf16>
    %12 = vector.shape_cast %11 : vector<1x6x128xbf16> to vector<6x128xbf16>
    %c2 = arith.constant 2 : index
    %c0_13 = arith.constant 0 : index
    %c0_14 = arith.constant 0 : index
    %13 = vector.load %arg3[%c2, %c0_13, %c0_14] : memref<4x128x128xbf16, #tpu.memory_space<vmem>>, vector<1x128x128xbf16>
    %14 = vector.shape_cast %13 : vector<1x128x128xbf16> to vector<128x128xbf16>
    %cst_15 = arith.constant dense<0.000000e+00> : vector<6x128xf32>
    %15 = tpu.matmul %12, %14, %cst_15 {dimension_numbers = #tpu.dot_dimension_numbers<[1], [0], [0], [1], [0, 0, 1, 1], [], []>} : vector<6x128xbf16>, vector<128x128xbf16>, vector<6x128xf32> -> vector<6x128xf32>
    %16 = arith.addf %10, %15 : vector<6x128xf32>
    %c0_16 = arith.constant 0 : index
    %c4 = arith.constant 4 : index
    %c0_17 = arith.constant 0 : index
    %17 = vector.load %arg2[%c0_16, %c4, %c0_17] : memref<1x12x128xbf16, #tpu.memory_space<vmem>>, vector<1x6x128xbf16>
    %18 = vector.shape_cast %17 : vector<1x6x128xbf16> to vector<6x128xbf16>
    %c3_18 = arith.constant 3 : index
    %c0_19 = arith.constant 0 : index
    %c0_20 = arith.constant 0 : index
    %19 = vector.load %arg3[%c3_18, %c0_19, %c0_20] : memref<4x128x128xbf16, #tpu.memory_space<vmem>>, vector<1x128x128xbf16>
    %20 = vector.shape_cast %19 : vector<1x128x128xbf16> to vector<128x128xbf16>
    %cst_21 = arith.constant dense<0.000000e+00> : vector<6x128xf32>
    %21 = tpu.matmul %18, %20, %cst_21 {dimension_numbers = #tpu.dot_dimension_numbers<[1], [0], [0], [1], [0, 0, 1, 1], [], []>} : vector<6x128xbf16>, vector<128x128xbf16>, vector<6x128xf32> -> vector<6x128xf32>
    %22 = arith.addf %16, %21 : vector<6x128xf32>
    %c0_22 = arith.constant 0 : index
    %c0_23 = arith.constant 0 : index
    %23 = vector.load %arg4[%c0_22, %c0_23] : memref<1x128xf32, #tpu.memory_space<vmem>>, vector<1x128xf32>
    %24 = vector.broadcast %23 : vector<1x128xf32> to vector<6x128xf32>
    %25 = arith.addf %22, %24 : vector<6x128xf32>
    %cst_24 = arith.constant 0.000000e+00 : f32
    %26 = vector.broadcast %cst_24 : f32 to vector<6x128xf32>
    %27 = arith.cmpf oge, %25, %26 : vector<6x128xf32>
    %cst_25 = arith.constant 2.000000e-01 : f32
    %28 = vector.broadcast %cst_25 : f32 to vector<6x128xf32>
    %29 = arith.mulf %28, %25 : vector<6x128xf32>
    %30 = arith.select %27, %25, %29 : vector<6x128xi1>, vector<6x128xf32>
    %31 = arith.truncf %30 : vector<6x128xf32> to vector<6x128xbf16>
    %c0_26 = arith.constant 0 : index
    %c0_27 = arith.constant 0 : index
    %c0_28 = arith.constant 0 : index
    %32 = vector.load %arg5[%c0_26, %c0_27, %c0_28] : memref<1x6x128xbf16, #tpu.memory_space<vmem>>, vector<1x6x128xbf16>
    %33 = vector.shape_cast %32 : vector<1x6x128xbf16> to vector<6x128xbf16>
    %34 = vector.shape_cast %31 : vector<6x128xbf16> to vector<1x6x128xbf16>
    tpu.vector_store %arg5[%c0_26, %c0_27, %c0_28], %34 {strides = array<i32>} : memref<1x6x128xbf16, #tpu.memory_space<vmem>>, vector<1x6x128xbf16>,
    return
  }
  func.func @transform_0(%arg0: i32, %arg1: i32) -> (i32, i32, i32) {
    %c0_i32 = arith.constant 0 : i32
    %c0_i32_0 = arith.constant 0 : i32
    %c0_i32_1 = arith.constant 0 : i32
    return %arg1, %c0_i32, %c0_i32_0 : i32, i32, i32
  }
  func.func @transform_1(%arg0: i32, %arg1: i32) -> (i32, i32, i32) {
    %c0_i32 = arith.constant 0 : i32
    %c0_i32_0 = arith.constant 0 : i32
    %c0_i32_1 = arith.constant 0 : i32
    return %c0_i32, %c0_i32_0, %arg0 : i32, i32, i32
  }
  func.func @transform_2(%arg0: i32, %arg1: i32) -> (i32, i32) {
    %c0_i32 = arith.constant 0 : i32
    %c0_i32_0 = arith.constant 0 : i32
    return %c0_i32, %arg0 : i32, i32
  }
  func.func @transform_3(%arg0: i32, %arg1: i32) -> (i32, i32, i32) {
    %c0_i32 = arith.constant 0 : i32
    %c0_i32_0 = arith.constant 0 : i32
    return %arg1, %c0_i32, %arg0 : i32, i32, i32
  }
}

module attributes {stable_mosaic.version = 11 : i64} {
  func.func @_conv_s2d_kernel(%arg0: i32, %arg1: i32, %arg2: memref<1x6x256xbf16, #tpu.memory_space<vmem>>, %arg3: memref<4x256x128xbf16, #tpu.memory_space<vmem>>, %arg4: memref<1x128xf32, #tpu.memory_space<vmem>>, %arg5: memref<1x2x128xbf16, #tpu.memory_space<vmem>>) attributes {dimension_semantics = [#tpu.dimension_semantics<parallel>, #tpu.dimension_semantics<parallel>], iteration_bounds = array<i64: 1, 2>, scalar_prefetch = 0 : i64, scratch_operands = 0 : i64, tpu.core_type = #tpu.core_type<tc>, window_params = [{transform_indices = @transform_0, window_bounds = array<i64: 1, 6, 256>}, {transform_indices = @transform_1, window_bounds = array<i64: 4, 256, 128>}, {transform_indices = @transform_2, window_bounds = array<i64: 1, 128>}, {transform_indices = @transform_3, window_bounds = array<i64: 1, 2, 128>}]} {
    %c0 = arith.constant 0 : index
    %c0_0 = arith.constant 0 : index
    %c0_1 = arith.constant 0 : index
    %0 = vector.load %arg2[%c0, %c0_0, %c0_1] : memref<1x6x256xbf16, #tpu.memory_space<vmem>>, vector<1x2x256xbf16>
    %1 = vector.shape_cast %0 : vector<1x2x256xbf16> to vector<2x256xbf16>
    %c0_2 = arith.constant 0 : index
    %c0_3 = arith.constant 0 : index
    %c0_4 = arith.constant 0 : index
    %2 = vector.load %arg3[%c0_2, %c0_3, %c0_4] : memref<4x256x128xbf16, #tpu.memory_space<vmem>>, vector<1x256x128xbf16>
    %3 = vector.shape_cast %2 : vector<1x256x128xbf16> to vector<256x128xbf16>
    %cst = arith.constant dense<0.000000e+00> : vector<2x128xf32>
    %4 = tpu.matmul %1, %3, %cst {dimension_numbers = #tpu.dot_dimension_numbers<[1], [0], [0], [1], [0, 0, 1, 1], [], []>} : vector<2x256xbf16>, vector<256x128xbf16>, vector<2x128xf32> -> vector<2x128xf32>
    %c0_5 = arith.constant 0 : index
    %c1 = arith.constant 1 : index
    %c0_6 = arith.constant 0 : index
    %5 = vector.load %arg2[%c0_5, %c1, %c0_6] : memref<1x6x256xbf16, #tpu.memory_space<vmem>>, vector<1x2x256xbf16>
    %6 = vector.shape_cast %5 : vector<1x2x256xbf16> to vector<2x256xbf16>
    %c1_7 = arith.constant 1 : index
    %c0_8 = arith.constant 0 : index
    %c0_9 = arith.constant 0 : index
    %7 = vector.load %arg3[%c1_7, %c0_8, %c0_9] : memref<4x256x128xbf16, #tpu.memory_space<vmem>>, vector<1x256x128xbf16>
    %8 = vector.shape_cast %7 : vector<1x256x128xbf16> to vector<256x128xbf16>
    %cst_10 = arith.constant dense<0.000000e+00> : vector<2x128xf32>
    %9 = tpu.matmul %6, %8, %cst_10 {dimension_numbers = #tpu.dot_dimension_numbers<[1], [0], [0], [1], [0, 0, 1, 1], [], []>} : vector<2x256xbf16>, vector<256x128xbf16>, vector<2x128xf32> -> vector<2x128xf32>
    %10 = arith.addf %4, %9 : vector<2x128xf32>
    %c0_11 = arith.constant 0 : index
    %c2 = arith.constant 2 : index
    %c0_12 = arith.constant 0 : index
    %11 = vector.load %arg2[%c0_11, %c2, %c0_12] : memref<1x6x256xbf16, #tpu.memory_space<vmem>>, vector<1x2x256xbf16>
    %12 = vector.shape_cast %11 : vector<1x2x256xbf16> to vector<2x256xbf16>
    %c2_13 = arith.constant 2 : index
    %c0_14 = arith.constant 0 : index
    %c0_15 = arith.constant 0 : index
    %13 = vector.load %arg3[%c2_13, %c0_14, %c0_15] : memref<4x256x128xbf16, #tpu.memory_space<vmem>>, vector<1x256x128xbf16>
    %14 = vector.shape_cast %13 : vector<1x256x128xbf16> to vector<256x128xbf16>
    %cst_16 = arith.constant dense<0.000000e+00> : vector<2x128xf32>
    %15 = tpu.matmul %12, %14, %cst_16 {dimension_numbers = #tpu.dot_dimension_numbers<[1], [0], [0], [1], [0, 0, 1, 1], [], []>} : vector<2x256xbf16>, vector<256x128xbf16>, vector<2x128xf32> -> vector<2x128xf32>
    %16 = arith.addf %10, %15 : vector<2x128xf32>
    %c0_17 = arith.constant 0 : index
    %c3 = arith.constant 3 : index
    %c0_18 = arith.constant 0 : index
    %17 = vector.load %arg2[%c0_17, %c3, %c0_18] : memref<1x6x256xbf16, #tpu.memory_space<vmem>>, vector<1x2x256xbf16>
    %18 = vector.shape_cast %17 : vector<1x2x256xbf16> to vector<2x256xbf16>
    %c3_19 = arith.constant 3 : index
    %c0_20 = arith.constant 0 : index
    %c0_21 = arith.constant 0 : index
    %19 = vector.load %arg3[%c3_19, %c0_20, %c0_21] : memref<4x256x128xbf16, #tpu.memory_space<vmem>>, vector<1x256x128xbf16>
    %20 = vector.shape_cast %19 : vector<1x256x128xbf16> to vector<256x128xbf16>
    %cst_22 = arith.constant dense<0.000000e+00> : vector<2x128xf32>
    %21 = tpu.matmul %18, %20, %cst_22 {dimension_numbers = #tpu.dot_dimension_numbers<[1], [0], [0], [1], [0, 0, 1, 1], [], []>} : vector<2x256xbf16>, vector<256x128xbf16>, vector<2x128xf32> -> vector<2x128xf32>
    %22 = arith.addf %16, %21 : vector<2x128xf32>
    %c0_23 = arith.constant 0 : index
    %c0_24 = arith.constant 0 : index
    %23 = vector.load %arg4[%c0_23, %c0_24] : memref<1x128xf32, #tpu.memory_space<vmem>>, vector<1x128xf32>
    %24 = vector.broadcast %23 : vector<1x128xf32> to vector<2x128xf32>
    %25 = arith.addf %22, %24 : vector<2x128xf32>
    %26 = arith.truncf %25 : vector<2x128xf32> to vector<2x128xbf16>
    %c0_25 = arith.constant 0 : index
    %c0_26 = arith.constant 0 : index
    %c0_27 = arith.constant 0 : index
    %27 = vector.load %arg5[%c0_25, %c0_26, %c0_27] : memref<1x2x128xbf16, #tpu.memory_space<vmem>>, vector<1x2x128xbf16>
    %28 = vector.shape_cast %27 : vector<1x2x128xbf16> to vector<2x128xbf16>
    %29 = vector.shape_cast %26 : vector<2x128xbf16> to vector<1x2x128xbf16>
    tpu.vector_store %arg5[%c0_25, %c0_26, %c0_27], %29 {strides = array<i32>} : memref<1x2x128xbf16, #tpu.memory_space<vmem>>, vector<1x2x128xbf16>,
    return
  }
  func.func @transform_0(%arg0: i32, %arg1: i32) -> (i32, i32, i32) {
    %c0_i32 = arith.constant 0 : i32
    %c0_i32_0 = arith.constant 0 : i32
    %c0_i32_1 = arith.constant 0 : i32
    return %arg1, %c0_i32, %c0_i32_0 : i32, i32, i32
  }
  func.func @transform_1(%arg0: i32, %arg1: i32) -> (i32, i32, i32) {
    %c0_i32 = arith.constant 0 : i32
    %c0_i32_0 = arith.constant 0 : i32
    %c0_i32_1 = arith.constant 0 : i32
    return %c0_i32, %c0_i32_0, %arg0 : i32, i32, i32
  }
  func.func @transform_2(%arg0: i32, %arg1: i32) -> (i32, i32) {
    %c0_i32 = arith.constant 0 : i32
    %c0_i32_0 = arith.constant 0 : i32
    return %c0_i32, %arg0 : i32, i32
  }
  func.func @transform_3(%arg0: i32, %arg1: i32) -> (i32, i32, i32) {
    %c0_i32 = arith.constant 0 : i32
    %c0_i32_0 = arith.constant 0 : i32
    return %arg1, %c0_i32, %arg0 : i32, i32, i32
  }
}

</mosaic_0001>

<bundles_post_ra>
// kernel: p2disc_forward.5
= control target key start
LH: loop header
LB: loop body
LE: loop exit
PB: predicated region body
PF: predicated region fallthrough
CT: control target
= control target key end

     0   :  { %s2938_s12 = smov 0   ;;  %s2940_s13 = smov 0   ;;  %s3446_s0 = inlined_call_operand.vmem [shape: bf16[2,306,16], index: 0, kind: input, shape index: {}]   ;;  %s3447_s1 = inlined_call_operand.vmem [shape: bf16[4,16,128], index: 1, kind: input, shape index: {}]   ;;  %s3448_s2 = inlined_call_operand.vmem [shape: f32[1,128], index: 2, kind: input, shape index: {}]   ;;  %s3449_s3 = inlined_call_operand.vmem [shape: bf16[2,272,128], index: 3, kind: output, shape index: {}]  }
   0x1   :  { %s2942_s14 = smov 0  }
   0x2 LB: > { %s25_s15 = sadd.s32 1, %s2910_s13  ;;  %p2181_p0 = scmp.ge.s32.totalorder %s2914_s14, 1  ;;  %s2914_s14 = sphi %s2942_s14, %s13_s14   ;;  %s2910_s13 = sphi %s2940_s13, %s3451_s13   ;;  %s2906_s12 = sphi %s2938_s12, %s3450_s12  }
   0x3   : > { %p27_p1 = scmp.ge.s32.totalorder %s25_s15, 2  ;;  %p168_p2 = scmp.lt.s32.totalorder %s2914_s14, 3 }
   0x5   : > { %s3453_s15 = smov (%p27_p1, %s25_s15), 0  ;;  %p169_p3 = pnand %p2181_p0, %p168_p2 }
   0x6   : > { %v2851_v0 = vld [vmem:[%s3447_s1 + $0x8] sm:$0xff] (!%p169_p3)   ;;  %v2916_v1 = vmov (!%p169_p3), 0.0   ;;  %v2852_v2 = vld [vmem:[%s3447_s1] sm:$0xff] (!%p169_p3)   ;;  %vm2917_vm0 = vmmov (!%p169_p3), 0   ;;  %p202_p4 = scmp.lt.s32.totalorder (!%p169_p3), %s2906_s12, 1  ;;  %vm498_vm1 = vcmask (!%p169_p3), 130048  }
   0x7   : > { %172 = sbr.rel (%p169_p3) target bundleno = 516 (0x204), region = 32  ;;  %2543 = vmatprep.subr.bf16.mxu0 (!%p169_p3), %v2916_v1  ;;  %2613 = vmatprep.subr.bf16.mxu1 (!%p169_p3), %v2916_v1  ;;  %v2856_v3 = vld [vmem:[%s3447_s1 + $0x18] sm:$0xff] (!%p169_p3)   ;;  %vm351_vm2 = vsmask.f32 (!%p169_p3), 7424  ;;  %v2855_v12 = vld [vmem:[%s3447_s1 + $0x10] sm:$0xff] (!%p169_p3)   ;;  %vm1461_vm3 = vcmask (!%p169_p3), 1046528  }
   0x8   : > { %2544 = vmatpush3.bf16.msra.mxu0 (!%p169_p3), %v2851_v0  ;;  %2615 = vmatprep.mubr.msk.bf16.mxu1 (!%p169_p3), %vm2917_vm0, %v2916_v1 }
   0x9   : > { %2614 = vmatpush3.bf16.msra.mxu1 (!%p169_p3), %v2852_v2  ;;  %2545 = vmatprep.mubr.msk.bf16.mxu0 (!%p169_p3), %vm2917_vm0, %v2916_v1 }
   0xa   : > { %2683 = vmatprep.subr.bf16.mxu0 (!%p169_p3), %v2916_v1  ;;  %2753 = vmatprep.subr.bf16.mxu1 (!%p169_p3), %v2916_v1 }
   0xe   : > { %s3455_s12 = smov (!%p202_p4, %s2906_s12), 1 }
   0xf   : > { %s2823_s20 = smul.u32 156, %s3455_s12 }
  0x10   : > { %s2824_s30 = smul.u32 136, %s3455_s12 }
  0x11   : > { %s2976_s23 = scalar_lea.vmem %s3446_s0, %s2823_s20 }
  0x12   : > { %v2853_v4 = vld [vmem:[%s2976_s23] sm:$0xff]   ;;  %v2854_v5 = vld [vmem:[%s2976_s23 + $0x8] sm:$0xff]   ;;  %v2857_v9 = vld [vmem:[%s2976_s23 + $0x10] sm:$0xff]   ;;  %s3355_s6 = scalar_lea.vmem %s3449_s3, %s2824_s30 }
  0x13   : > { %2616 = vmatmul.mubr.msk.bf16.vlgmr.msra.gmra.mrb[0].mxu1 %vm498_vm1, %v2853_v4  ;;  %v353_v6 = vshrl.u32 %v2853_v4, 16  ;;  %v355_v7 = vshll.u32 %v2853_v4, 16  ;;  %v360_v8 = vshll.u32 %v2854_v5, 16  ;;  %v364_v14 = vshrl.u32 %v2854_v5, 16  ;;  %v2858_v19 = vld [vmem:[%s2976_s23 + $0x18] sm:$0xff]   ;;  %v2859_v25 = vld [vmem:[%s2976_s23 + $0x20] sm:$0xff]  }
  0x14   : > { %2754 = vmatpush3.bf16.msra.mxu1 %v2856_v3  ;;  %2619 = vmatprep.mubr.msk.bf16.mxu1 %vm2917_vm0, %v2916_v1  ;;  %v368_v15 = vshll.u32 %v2857_v9, 16  ;;  %v372_v21 = vshrl.u32 %v2857_v9, 16  ;;  %v376_v22 = vshll.u32 %v2858_v19, 16  ;;  %v380_v27 = vshrl.u32 %v2858_v19, 16  ;;  %v2860_v31 = vld [vmem:[%s2976_s23 + $0x28] sm:$0xff]   ;;  %v2861_v37 = vld [vmem:[%s2976_s23 + $0x30] sm:$0xff]  }
  0x15   : > { %v357_v10 = vrot.slane %v355_v7, 1  ;;  %v362_v11 = vrot.slane %v360_v8, 1  ;;  %v384_v28 = vshll.u32 %v2859_v25, 16  ;;  %v388_v33 = vshrl.u32 %v2859_v25, 16  ;;  %v2862_v43 = vld [vmem:[%s2976_s23 + $0x38] sm:$0xff]   ;;  %v2863_v49 = vld [vmem:[%s2976_s23 + $0x40] sm:$0xff]  }
  0x16   : > { %v370_v18 = vrot.slane %v368_v15, 1  ;;  %v378_v24 = vrot.slane %v376_v22, 1  ;;  %v392_v34 = vshll.u32 %v2860_v31, 16  ;;  %v396_v39 = vshrl.u32 %v2860_v31, 16  ;;  %v2864_v55 = vld [vmem:[%s2976_s23 + $0x48] sm:$0xff]   ;;  %v2865_v61 = vld [vmem:[%s2976_s23 + $0x50] sm:$0xff]  }
  0x17   : > { %v358_v13 = vor.u32 %v357_v10, %v353_v6  ;;  %v366_v17 = vor.u32 %v364_v14, %v362_v11  ;;  %v386_v30 = vrot.slane %v384_v28, 1  ;;  %v400_v40 = vshll.u32 %v2861_v37, 16  ;;  %v2866_v4 = vld [vmem:[%s2976_s23 + $0x58] sm:$0xff]   ;;  %v2867_v10 = vld [vmem:[%s2976_s23 + $0x60] sm:$0xff]   ;;  %v2869_v22 = vld [vmem:[%s2976_s23 + $0x70] sm:$0xff]  }
  0x18   : > { %v374_v23 = vor.u32 %v372_v21, %v370_v18  ;;  %v382_v29 = vor.u32 %v380_v27, %v378_v24  ;;  %v394_v36 = vrot.slane %v392_v34, 1  ;;  %v404_v45 = vshrl.u32 %v2861_v37, 16  ;;  %v2870_v28 = vld [vmem:[%s2976_s23 + $0x78] sm:$0xff]   ;;  %v2871_v34 = vld [vmem:[%s2976_s23 + $0x80] sm:$0xff]  }
  0x19   : > { %v363_v16 = vsel %vm351_vm2, %v358_v13, %v362_v11  ;;  %v371_v20 = vsel %vm351_vm2, %v366_v17, %v370_v18  ;;  %v390_v35 = vor.u32 %v388_v33, %v386_v30  ;;  %v402_v42 = vrot.slane %v400_v40, 1  ;;  %v2872_v40 = vld [vmem:[%s2976_s23 + $0x88] ss:$0 sps:$4 sm:$0x11]  }
  0x1a   : > { %2546 = vmatmul.mubr.msk.bf16.vlgmr.msra.gmra.mrb[0].mxu0 %vm498_vm1, %v363_v16  ;;  %v379_v26 = vsel %vm351_vm2, %v374_v23, %v378_v24  ;;  %v387_v32 = vsel %vm351_vm2, %v382_v29, %v386_v30  ;;  %v398_v41 = vor.u32 %v396_v39, %v394_v36  ;;  %v408_v46 = vshll.u32 %v2862_v43, 16  ;;  %v2868_v16 = vld [vmem:[%s2976_s23 + $0x68] sm:$0xff]  }
  0x1b   : > { %2684 = vmatpush3.bf16.msra.mxu0 %v2855_v12  ;;  %2549 = vmatprep.mubr.msk.bf16.mxu0 %vm2917_vm0, %v2916_v1  ;;  %v395_v38 = vsel %vm351_vm2, %v390_v35, %v394_v36  ;;  %v406_v47 = vor.u32 %v404_v45, %v402_v42  ;;  %v412_v51 = vshrl.u32 %v2862_v43, 16  ;;  %v416_v52 = vshll.u32 %v2863_v49, 16 }
  0x1c   : > { %2620 = vmatmul.mubr.msk.bf16.gmra.mrb[4].mxu1 %vm498_vm1, %v2854_v5  ;;  %v403_v44 = vsel %vm351_vm2, %v398_v41, %v402_v42  ;;  %v410_v48 = vrot.slane %v408_v46, 1  ;;  %v420_v57 = vshrl.u32 %v2863_v49, 16  ;;  %v424_v58 = vshll.u32 %v2864_v55, 16  ;;  %v928_v41 = vld [vmem:[%s2976_s23 + $0x8] sm:$0xf] }
  0x1d   : > { %2623 = vmatprep.mubr.msk.bf16.mxu1 %vm2917_vm0, %v2916_v1  ;;  %v418_v54 = vrot.slane %v416_v52, 1  ;;  %v428_v63 = vshrl.u32 %v2864_v55, 16  ;;  %v432_v0 = vshll.u32 %v2865_v61, 16  ;;  %v436_v6 = vshrl.u32 %v2865_v61, 16  ;;  %v929_v42 = vld [vmem:[%s2976_s23 + $0xc] sm:$0xf] }
  0x1e   : > { %v411_v50 = vsel %vm351_vm2, %v406_v47, %v410_v48  ;;  %v414_v53 = vor.u32 %v412_v51, %v410_v48  ;;  %v426_v60 = vrot.slane %v424_v58, 1  ;;  %v440_v7 = vshll.u32 %v2866_v4, 16  ;;  %v2874_v48 = vld [vmem:[%s2976_s23 + $0x10] sm:$0xff]  }
  0x1f   : > { %v422_v59 = vor.u32 %v420_v57, %v418_v54  ;;  %v434_v3 = vrot.slane %v432_v0, 1  ;;  %v444_v12 = vshrl.u32 %v2866_v4, 16  ;;  %v448_v13 = vshll.u32 %v2867_v10, 16 }
  0x20   : > { %v419_v56 = vsel %vm351_vm2, %v414_v53, %v418_v54  ;;  %v430_v2 = vor.u32 %v428_v63, %v426_v60  ;;  %v452_v18 = vshrl.u32 %v2867_v10, 16  ;;  %v460_v24 = vshrl.u32 %v2868_v16, 16 }
  0x21   : > { %v427_v62 = vsel %vm351_vm2, %v422_v59, %v426_v60  ;;  %v438_v8 = vor.u32 %v436_v6, %v434_v3  ;;  %v450_v15 = vrot.slane %v448_v13, 1  ;;  %v468_v30 = vshrl.u32 %v2869_v22, 16  ;;  %v2876_v60 = vld [vmem:[%s2976_s23 + $0x18] sm:$0xff]   ;;  %v2878_v13 = vld [vmem:[%s2976_s23 + $0x28] sm:$0xff]  }
  0x22   : > { %2550 = vmatmul.mubr.msk.bf16.gmra.mrb[4].mxu0 %vm498_vm1, %v371_v20  ;;  %v435_v5 = vsel %vm351_vm2, %v430_v2, %v434_v3  ;;  %v476_v36 = vshrl.u32 %v2870_v28, 16  ;;  %v484_v45 = vshrl.u32 %v2871_v34, 16  ;;  %v488_v46 = vshll.u32 %v2872_v40, 16 }
  0x23   : > { %2553 = vmatprep.mubr.msk.bf16.mxu0 %vm2917_vm0, %v2916_v1  ;;  %v454_v20 = vor.u32 %v452_v18, %v450_v15  ;;  %v2242_v47 = vcombine.low %v928_v41, %v929_v42  ;;  %v1463_v54 = vrot.slane %v2874_v48, 1  ;;  %v1062_v58 = vshll.u32 %v2874_v48, 16 }
  0x24   : > { %2624 = vmatmul.mubr.msk.bf16.gmra.mrb[8].mxu1 %vm498_vm1, %v2857_v9  ;;  %v442_v9 = vrot.slane %v440_v7, 1  ;;  %v490_v51 = vrot.slane %v488_v46, 1  ;;  %v1465_v63 = vrot.slane %v2876_v60, 1  ;;  %v1066_v2 = vshrl.u32 %v2874_v48, 16 }
  0x25   : > { %2627 = vmatprep.mubr.msk.bf16.mxu1 %vm2917_vm0, %v2916_v1  ;;  %v1057_v52 = vshll.u32 %v2242_v47, 16  ;;  %v1070_v3 = vshll.u32 %v2876_v60, 16 }
  0x26   : > { %v443_v11 = vsel %vm351_vm2, %v438_v8, %v442_v9  ;;  %v446_v14 = vor.u32 %v444_v12, %v442_v9 }
  0x27   : > { %v1059_v57 = vrot.slane %v1057_v52, 1  ;;  %v1072_v7 = vrot.slane %v1070_v3, 1 }
  0x28   : > { %v451_v17 = vsel %vm351_vm2, %v446_v14, %v450_v15 }
  0x2a   : > { %2554 = vmatmul.mubr.msk.bf16.gmra.mrb[8].mxu0 %vm498_vm1, %v379_v26 }
  0x2b   : > { %2557 = vmatprep.mubr.msk.bf16.mxu0 %vm2917_vm0, %v2916_v1 }
  0x2c   : > { %2628 = vmatmul.mubr.msk.bf16.gmra.mrb[12].mxu1 %vm498_vm1, %v2858_v19  ;;  %v456_v19 = vshll.u32 %v2868_v16, 16 }
  0x2d   : > { %2631 = vmatprep.mubr.msk.bf16.mxu1 %vm2917_vm0, %v2916_v1 }
  0x2e   : > { %v458_v21 = vrot.slane %v456_v19, 1  ;;  %v1086_v19 = vshll.u32 %v2878_v13, 16 }
  0x30   : > { %v459_v23 = vsel %vm351_vm2, %v454_v20, %v458_v21  ;;  %v462_v26 = vor.u32 %v460_v24, %v458_v21  ;;  %v2879_v21 = vld [vmem:[%s2976_s23 + $0x30] sm:$0xff]  }
  0x31   : > { %v1471_v24 = vrot.slane %v2879_v21, 1 }
  0x32   : > { %2558 = vmatmul.mubr.msk.bf16.gmra.mrb[12].mxu0 %vm498_vm1, %v387_v32 }
  0x33   : > { %2561 = vmatprep.mubr.msk.bf16.mxu0 %vm2917_vm0, %v2916_v1 }
  0x34   : > { %2632 = vmatmul.mubr.msk.bf16.gmra.mrb[16].mxu1 %vm498_vm1, %v2859_v25  ;;  %v464_v25 = vshll.u32 %v2869_v22, 16 }
  0x35   : > { %2635 = vmatprep.mubr.msk.bf16.mxu1 %vm2917_vm0, %v2916_v1 }
  0x36   : > { %v466_v27 = vrot.slane %v464_v25, 1 }
  0x38   : > { %v467_v29 = vsel %vm351_vm2, %v462_v26, %v466_v27  ;;  %v470_v32 = vor.u32 %v468_v30, %v466_v27  ;;  %v1090_v26 = vshrl.u32 %v2878_v13, 16  ;;  %v1094_v27 = vshll.u32 %v2879_v21, 16 }
  0x3a   : > { %2562 = vmatmul.mubr.msk.bf16.gmra.mrb[16].mxu0 %vm498_vm1, %v395_v38 }
  0x3b   : > { %2565 = vmatprep.mubr.msk.bf16.mxu0 %vm2917_vm0, %v2916_v1 }
  0x3c   : > { %2636 = vmatmul.mubr.msk.bf16.gmra.mrb[20].mxu1 %vm498_vm1, %v2860_v31  ;;  %v472_v31 = vshll.u32 %v2870_v28, 16 }
  0x3d   : > { %2639 = vmatprep.mubr.msk.bf16.mxu1 %vm2917_vm0, %v2916_v1 }
  0x3e   : > { %v474_v33 = vrot.slane %v472_v31, 1  ;;  %v1096_v31 = vrot.slane %v1094_v27, 1 }
  0x40   : > { %v475_v35 = vsel %vm351_vm2, %v470_v32, %v474_v33  ;;  %v478_v38 = vor.u32 %v476_v36, %v474_v33 }
  0x42   : > { %2566 = vmatmul.mubr.msk.bf16.gmra.mrb[20].mxu0 %vm498_vm1, %v403_v44 }
  0x43   : > { %2569 = vmatprep.mubr.msk.bf16.mxu0 %vm2917_vm0, %v2916_v1 }
  0x44   : > { %2640 = vmatmul.mubr.msk.bf16.gmra.mrb[24].mxu1 %vm498_vm1, %v2861_v37  ;;  %v480_v37 = vshll.u32 %v2871_v34, 16 }
  0x45   : > { %2643 = vmatprep.mubr.msk.bf16.mxu1 %vm2917_vm0, %v2916_v1 }
  0x46   : > { %v482_v39 = vrot.slane %v480_v37, 1  ;;  %v2881_v37 = vld [vmem:[%s2976_s23 + $0x40] sm:$0xff]  }
  0x47   : > { %v1475_v40 = vrot.slane %v2881_v37, 1 }
  0x48   : > { %v483_v44 = vsel %vm351_vm2, %v478_v38, %v482_v39 }
  0x4a   : > { %2570 = vmatmul.mubr.msk.bf16.gmra.mrb[24].mxu0 %vm498_vm1, %v411_v50  ;;  %v486_v50 = vor.u32 %v484_v45, %v482_v39  ;;  %v2882_v45 = vld [vmem:[%s2976_s23 + $0x48] sm:$0xff]  }
  0x4b   : > { %2573 = vmatprep.mubr.msk.bf16.mxu0 %vm2917_vm0, %v2916_v1  ;;  %v1477_v48 = vrot.slane %v2882_v45, 1 }
  0x4c   : > { %2644 = vmatmul.mubr.msk.bf16.gmra.mrb[28].mxu1 %vm498_vm1, %v2862_v43  ;;  %v1454_v43 = vld [vmem:[%s2976_s23 + $0x8] sm:$0xe] }
  0x4d   : > { %2647 = vmatprep.mubr.msk.bf16.mxu1 %vm2917_vm0, %v2916_v1  ;;  %v1478_v52 = vsel %vm1461_vm3, %v1475_v40, %v1477_v48 }
  0x52   : > { %2574 = vmatmul.mubr.msk.bf16.gmra.mrb[28].mxu0 %vm498_vm1, %v419_v56  ;;  %v1055_v56 = vshrl.u32 %v2242_v47, 16 }
  0x53   : > { %2577 = vmatprep.mubr.msk.bf16.mxu0 %vm2917_vm0, %v2916_v1 }
  0x54   : > { %2648 = vmatmul.mubr.msk.bf16.gmra.mrb[32].mxu1 %vm498_vm1, %v2863_v49  ;;  %v2280_v49 = vcombine.low %v1454_v43, %v929_v42  ;;  %v1110_v43 = vshll.u32 %v2881_v37, 16 }
  0x55   : > { %2651 = vmatprep.mubr.msk.bf16.mxu1 %vm2917_vm0, %v2916_v1 }
  0x56   : > { %v1462_v53 = vrot.slane %v2280_v49, 1  ;;  %v1112_v47 = vrot.slane %v1110_v43, 1 }
  0x58   : > { %v1464_v59 = vsel %vm1461_vm3, %v1462_v53, %v1463_v54  ;;  %v2883_v53 = vld [vmem:[%s2976_s23 + $0x50] sm:$0xff]  }
  0x59   : > { %v1130_v3 = vshrl.u32 %v2883_v53, 16 }
  0x5a   : > { %2578 = vmatmul.mubr.msk.bf16.gmra.mrb[32].mxu0 %vm498_vm1, %v427_v62  ;;  %v1064_v62 = vrot.slane %v1062_v58, 1  ;;  %v1122_v58 = vshrl.u32 %v2882_v45, 16 }
  0x5b   : > { %2581 = vmatprep.mubr.msk.bf16.mxu0 %vm2917_vm0, %v2916_v1 }
  0x5c   : > { %2652 = vmatmul.mubr.msk.bf16.gmra.mrb[36].mxu1 %vm498_vm1, %v2864_v55  ;;  %v491_v55 = vsel %vm351_vm2, %v486_v50, %v490_v51  ;;  %v1068_v6 = vor.u32 %v1066_v2, %v1064_v62  ;;  %v1114_v50 = vshrl.u32 %v2881_v37, 16  ;;  %v1118_v51 = vshll.u32 %v2882_v45, 16 }
  0x5d   : > { %2655 = vmatprep.mubr.msk.bf16.mxu1 %vm2917_vm0, %v2916_v1 }
  0x5e   : > { %v1073_v9 = vsel %vm351_vm2, %v1068_v6, %v1072_v7  ;;  %v2885_v6 = vld [vmem:[%s2976_s23 + $0x60] sm:$0xff]  }
  0x62   : > { %2582 = vmatmul.mubr.msk.bf16.gmra.mrb[36].mxu0 %vm498_vm1, %v435_v5  ;;  %v2877_v5 = vld [vmem:[%s2976_s23 + $0x20] sm:$0xff]  }
  0x63   : > { %2585 = vmatprep.mubr.msk.bf16.mxu0 %vm2917_vm0, %v2916_v1  ;;  %v1467_v8 = vrot.slane %v2877_v5, 1  ;;  %v1082_v18 = vshrl.u32 %v2877_v5, 16 }
  0x64   : > { %2656 = vmatmul.mubr.msk.bf16.gmra.mrb[40].mxu1 %vm498_vm1, %v2865_v61  ;;  %v1060_v61 = vor.u32 %v1059_v57, %v1055_v56  ;;  %v1479_v56 = vrot.slane %v2883_v53, 1 }
  0x65   : > { %2659 = vmatprep.mubr.msk.bf16.mxu1 %vm2917_vm0, %v2916_v1  ;;  %v1468_v12 = vsel %vm1461_vm3, %v1465_v63, %v1467_v8 }
  0x66   : > { %v1065_v0 = vsel %vm351_vm2, %v1060_v61, %v1064_v62  ;;  %v2884_v61 = vld [vmem:[%s2976_s23 + $0x58] sm:$0xff]  }
  0x6a   : > { %2586 = vmatmul.mubr.msk.bf16.gmra.mrb[40].mxu0 %vm498_vm1, %v443_v11  ;;  %v1078_v11 = vshll.u32 %v2877_v5, 16 }
  0x6b   : > { %2589 = vmatprep.mubr.msk.bf16.mxu0 %vm2917_vm0, %v2916_v1 }
  0x6c   : > { %2660 = vmatmul.mubr.msk.bf16.gmra.mrb[44].mxu1 %vm498_vm1, %v2866_v4  ;;  %v1466_v4 = vsel %vm1461_vm3, %v1463_v54, %v1465_v63  ;;  %v1080_v15 = vrot.slane %v1078_v11, 1  ;;  %v1116_v54 = vor.u32 %v1114_v50, %v1112_v47 }
  0x6d   : > { %2663 = vmatprep.mubr.msk.bf16.mxu1 %vm2917_vm0, %v2916_v1 }
  0x72   : > { %2590 = vmatmul.mubr.msk.bf16.gmra.mrb[44].mxu0 %vm498_vm1, %v451_v17 }
  0x73   : > { %2593 = vmatprep.mubr.msk.bf16.mxu0 %vm2917_vm0, %v2916_v1 }
  0x74   : > { %2664 = vmatmul.mubr.msk.bf16.gmra.mrb[48].mxu1 %vm498_vm1, %v2867_v10  ;;  %v1074_v10 = vshrl.u32 %v2876_v60, 16  ;;  %v1480_v60 = vsel %vm1461_vm3, %v1477_v48, %v1479_v56 }
  0x75   : > { %2667 = vmatprep.mubr.msk.bf16.mxu1 %vm2917_vm0, %v2916_v1 }
  0x76   : > { %v1076_v14 = vor.u32 %v1074_v10, %v1072_v7 }
  0x78   : > { %v1081_v17 = vsel %vm351_vm2, %v1076_v14, %v1080_v15  ;;  %v1142_v14 = vshll.u32 %v2885_v6, 16 }
  0x7a   : > { %2594 = vmatmul.mubr.msk.bf16.gmra.mrb[48].mxu0 %vm498_vm1, %v459_v23  ;;  %v1088_v23 = vrot.slane %v1086_v19, 1 }
  0x7b   : > { %2597 = vmatprep.mubr.msk.bf16.mxu0 %vm2917_vm0, %v2916_v1 }
  0x7c   : > { %2668 = vmatmul.mubr.msk.bf16.gmra.mrb[52].mxu1 %vm498_vm1, %v2868_v16  ;;  %v1469_v16 = vrot.slane %v2878_v13, 1  ;;  %v1092_v30 = vor.u32 %v1090_v26, %v1088_v23  ;;  %v1138_v13 = vshrl.u32 %v2884_v61, 16 }
  0x7d   : > { %2671 = vmatprep.mubr.msk.bf16.mxu1 %vm2917_vm0, %v2916_v1 }
  0x7e   : > { %v1470_v20 = vsel %vm1461_vm3, %v1467_v8, %v1469_v16  ;;  %v1097_v33 = vsel %vm351_vm2, %v1092_v30, %v1096_v31 }
  0x82   : > { %2598 = vmatmul.mubr.msk.bf16.gmra.mrb[52].mxu0 %vm498_vm1, %v467_v29  ;;  %v2880_v29 = vld [vmem:[%s2976_s23 + $0x38] sm:$0xff]  }
  0x83   : > { %2601 = vmatprep.mubr.msk.bf16.mxu0 %vm2917_vm0, %v2916_v1  ;;  %v1473_v32 = vrot.slane %v2880_v29, 1  ;;  %v1106_v42 = vshrl.u32 %v2880_v29, 16 }
  0x84   : > { %2672 = vmatmul.mubr.msk.bf16.gmra.mrb[56].mxu1 %vm498_vm1, %v2869_v22  ;;  %v1084_v22 = vor.u32 %v1082_v18, %v1080_v15  ;;  %v2886_v18 = vld [vmem:[%s2976_s23 + $0x68] sm:$0xff]  }
  0x85   : > { %2675 = vmatprep.mubr.msk.bf16.mxu1 %vm2917_vm0, %v2916_v1  ;;  %v1474_v36 = vsel %vm1461_vm3, %v1471_v24, %v1473_v32 }
  0x86   : > { %v1089_v25 = vsel %vm351_vm2, %v1084_v22, %v1088_v23  ;;  %v1485_v22 = vrot.slane %v2886_v18, 1 }
  0x8a   : > { %2602 = vmatmul.mubr.msk.bf16.gmra.mrb[56].mxu0 %vm498_vm1, %v475_v35  ;;  %v1102_v35 = vshll.u32 %v2880_v29, 16  ;;  %v1150_v29 = vshll.u32 %v2886_v18, 16 }
  0x8b   : > { %2605 = vmatprep.mubr.msk.bf16.mxu0 %vm2917_vm0, %v2916_v1 }
  0x8c   : > { %2676 = vmatmul.mubr.msk.bf16.gmra.mrb[60].mxu1 %vm498_vm1, %v2870_v28  ;;  %v1472_v28 = vsel %vm1461_vm3, %v1469_v16, %v1471_v24  ;;  %v1104_v39 = vrot.slane %v1102_v35, 1  ;;  %v2887_v35 = vld [vmem:[%s2976_s23 + $0x70] sm:$0xff]  }
  0x8d   : > { %2679 = vmatprep.mubr.msk.bf16.mxu1 %vm2917_vm0, %v2916_v1 }
  0x8e   : > { %v1108_v46 = vor.u32 %v1106_v42, %v1104_v39 }
  0x90   : > { %v1113_v49 = vsel %vm351_vm2, %v1108_v46, %v1112_v47  ;;  %v1154_v46 = vshrl.u32 %v2886_v18, 16  ;;  %v1158_v47 = vshll.u32 %v2887_v35, 16 }
  0x92   : > { %2606 = vmatmul.mubr.msk.bf16.gmra.mrb[60].mxu0 %vm498_vm1, %v483_v44  ;;  %v1476_v44 = vsel %vm1461_vm3, %v1473_v32, %v1475_v40  ;;  %v1487_v40 = vrot.slane %v2887_v35, 1 }
  0x93   : > { %2609 = vmatprep.mubr.msk.bf16.mxu0 %vm2917_vm0, %v2916_v1 }
  0x94   : > { %2680 = vmatmul.mubr.msk.bf16.gmra.mrb[64].mxu1 %vm498_vm1, %v2871_v34  ;;  %v1098_v34 = vshrl.u32 %v2879_v21, 16 }
  0x95   : > { %2755 = vmatprep.mubr.msk.bf16.mxu1 %vm2917_vm0, %v2916_v1 }
  0x96   : > { %v1100_v38 = vor.u32 %v1098_v34, %v1096_v31 }
  0x98   : > { %v1105_v41 = vsel %vm351_vm2, %v1100_v38, %v1104_v39  ;;  %v1152_v38 = vrot.slane %v1150_v29, 1 }
  0x9a   : > { %2610 = vmatmul.mubr.msk.bf16.gmra.mrb[64].mxu0 %vm498_vm1, %v491_v55  ;;  %v1120_v55 = vrot.slane %v1118_v51, 1 }
  0x9b   : > { %2685 = vmatprep.mubr.msk.bf16.mxu0 %vm2917_vm0, %v2916_v1 }
  0x9c   : > { %2756 = vmatmul.mubr.msk.bf16.vlgmr.msra.gmra.mrb[68].mxu1 %vm498_vm1, %v1464_v59  ;;  %v1121_v57 = vsel %vm351_vm2, %v1116_v54, %v1120_v55  ;;  %v1126_v59 = vshll.u32 %v2883_v53, 16  ;;  %v1124_v62 = vor.u32 %v1122_v58, %v1120_v55  ;;  %v2888_v53 = vld [vmem:[%s2976_s23 + $0x78] sm:$0xff]   ;;  %v1156_v55 = vor.u32 %v1154_v46, %v1152_v38 }
  0x9d   : > { %2759 = vmatprep.mubr.msk.bf16.mxu1 %vm2917_vm0, %v2916_v1  ;;  %v1489_v58 = vrot.slane %v2888_v53, 1 }
  0x9e   : > { %v1128_v63 = vrot.slane %v1126_v59, 1 }
  0xa0   : > { %v1129_v2 = vsel %vm351_vm2, %v1124_v62, %v1128_v63  ;;  %v1132_v7 = vor.u32 %v1130_v3, %v1128_v63 }
  0xa2   : > { %2686 = vmatmul.mubr.msk.bf16.vlgmr.msra.gmra.mrb[68].mxu0 %vm498_vm1, %v1065_v0  ;;  %v1481_v0 = vrot.slane %v2884_v61, 1 }
  0xa3   : > { %2689 = vmatprep.mubr.msk.bf16.mxu0 %vm2917_vm0, %v2916_v1 }
  0xa4   : > { %2760 = vmatmul.mubr.msk.bf16.gmra.mrb[72].mxu1 %vm498_vm1, %v1466_v4  ;;  %v1134_v4 = vshll.u32 %v2884_v61, 16  ;;  %v1482_v5 = vsel %vm1461_vm3, %v1479_v56, %v1481_v0  ;;  %v1160_v56 = vrot.slane %v1158_v47, 1  ;;  %v2891_v47 = vld [vmem:[%s2976_s23 + $0x90] ss:$0 sps:$4 sm:$0x11]  }
  0xa5   : > { %2763 = vmatprep.mubr.msk.bf16.mxu1 %vm2917_vm0, %v2916_v1 }
  0xa6   : > { %v1136_v8 = vrot.slane %v1134_v4, 1  ;;  %v1161_v62 = vsel %vm351_vm2, %v1156_v55, %v1160_v56 }
  0xa8   : > { %v1137_v11 = vsel %vm351_vm2, %v1132_v7, %v1136_v8  ;;  %v1140_v19 = vor.u32 %v1138_v13, %v1136_v8  ;;  %v1490_v7 = vsel %vm1461_vm3, %v1487_v40, %v1489_v58  ;;  %v2889_v8 = vld [vmem:[%s2976_s23 + $0x80] sm:$0xff]  }
  0xa9   : > { %v1491_v13 = vrot.slane %v2889_v8, 1 }
  0xaa   : > { %2690 = vmatmul.mubr.msk.bf16.gmra.mrb[72].mxu0 %vm498_vm1, %v1073_v9  ;;  %v1483_v9 = vrot.slane %v2885_v6, 1 }
  0xab   : > { %2693 = vmatprep.mubr.msk.bf16.mxu0 %vm2917_vm0, %v2916_v1 }
  0xac   : > { %2764 = vmatmul.mubr.msk.bf16.gmra.mrb[76].mxu1 %vm498_vm1, %v1468_v12  ;;  %v1486_v34 = vsel %vm1461_vm3, %v1483_v9, %v1485_v22 }
  0xad   : > { %2767 = vmatprep.mubr.msk.bf16.mxu1 %vm2917_vm0, %v2916_v1 }
  0xb2   : > { %2694 = vmatmul.mubr.msk.bf16.gmra.mrb[76].mxu0 %vm498_vm1, %v1081_v17  ;;  %v1484_v17 = vsel %vm1461_vm3, %v1481_v0, %v1483_v9  ;;  %v1162_v0 = vshrl.u32 %v2887_v35, 16 }
  0xb3   : > { %2697 = vmatprep.mubr.msk.bf16.mxu0 %vm2917_vm0, %v2916_v1 }
  0xb4   : > { %2768 = vmatmul.mubr.msk.bf16.gmra.mrb[80].mxu1 %vm498_vm1, %v1470_v20  ;;  %v1144_v20 = vrot.slane %v1142_v14, 1 }
  0xb5   : > { %2771 = vmatprep.mubr.msk.bf16.mxu1 %vm2917_vm0, %v2916_v1 }
  0xb6   : > { %v1145_v26 = vsel %vm351_vm2, %v1140_v19, %v1144_v20  ;;  %v1170_v19 = vshrl.u32 %v2888_v53, 16 }
  0xba   : > { %2698 = vmatmul.mubr.msk.bf16.gmra.mrb[80].mxu0 %vm498_vm1, %v1089_v25 }
  0xbb   : > { %2701 = vmatprep.mubr.msk.bf16.mxu0 %vm2917_vm0, %v2916_v1 }
  0xbc   : > { %2772 = vmatmul.mubr.msk.bf16.gmra.mrb[84].mxu1 %vm498_vm1, %v1472_v28  ;;  %v1146_v28 = vshrl.u32 %v2885_v6, 16 }
  0xbd   : > { %2775 = vmatprep.mubr.msk.bf16.mxu1 %vm2917_vm0, %v2916_v1 }
  0xbe   : > { %v1148_v37 = vor.u32 %v1146_v28, %v1144_v20  ;;  %v1174_v20 = vshll.u32 %v2889_v8, 16 }
  0xc2   : > { %2702 = vmatmul.mubr.msk.bf16.gmra.mrb[84].mxu0 %vm498_vm1, %v1097_v33 }
  0xc3   : > { %2705 = vmatprep.mubr.msk.bf16.mxu0 %vm2917_vm0, %v2916_v1 }
  0xc4   : > { %2776 = vmatmul.mubr.msk.bf16.gmra.mrb[88].mxu1 %vm498_vm1, %v1474_v36 }
  0xc5   : > { %2779 = vmatprep.mubr.msk.bf16.mxu1 %vm2917_vm0, %v2916_v1 }
  0xca   : > { %2706 = vmatmul.mubr.msk.bf16.gmra.mrb[88].mxu0 %vm498_vm1, %v1105_v41 }
  0xcb   : > { %2709 = vmatprep.mubr.msk.bf16.mxu0 %vm2917_vm0, %v2916_v1 }
  0xcc   : > { %2780 = vmatmul.mubr.msk.bf16.gmra.mrb[92].mxu1 %vm498_vm1, %v1476_v44  ;;  %v1153_v44 = vsel %vm351_vm2, %v1148_v37, %v1152_v38 }
  0xcd   : > { %2783 = vmatprep.mubr.msk.bf16.mxu1 %vm2917_vm0, %v2916_v1 }
  0xd2   : > { %2710 = vmatmul.mubr.msk.bf16.gmra.mrb[92].mxu0 %vm498_vm1, %v1113_v49 }
  0xd3   : > { %2713 = vmatprep.mubr.msk.bf16.mxu0 %vm2917_vm0, %v2916_v1 }
  0xd4   : > { %2784 = vmatmul.mubr.msk.bf16.gmra.mrb[96].mxu1 %vm498_vm1, %v1478_v52  ;;  %v1488_v52 = vsel %vm1461_vm3, %v1485_v22, %v1487_v40 }
  0xd5   : > { %2787 = vmatprep.mubr.msk.bf16.mxu1 %vm2917_vm0, %v2916_v1 }
  0xda   : > { %2714 = vmatmul.mubr.msk.bf16.gmra.mrb[96].mxu0 %vm498_vm1, %v1121_v57 }
  0xdb   : > { %2717 = vmatprep.mubr.msk.bf16.mxu0 %vm2917_vm0, %v2916_v1 }
  0xdc   : > { %2788 = vmatmul.mubr.msk.bf16.gmra.mrb[100].mxu1 %vm498_vm1, %v1480_v60 }
  0xdd   : > { %2791 = vmatprep.mubr.msk.bf16.mxu1 %vm2917_vm0, %v2916_v1 }
  0xe2   : > { %2718 = vmatmul.mubr.msk.bf16.gmra.mrb[100].mxu0 %vm498_vm1, %v1129_v2  ;;  %v1166_v2 = vshll.u32 %v2888_v53, 16  ;;  %v1495_v53 = vrot.slane %v2891_v47, 1 }
  0xe3   : > { %2721 = vmatprep.mubr.msk.bf16.mxu0 %vm2917_vm0, %v2916_v1 }
  0xe4   : > { %2792 = vmatmul.mubr.msk.bf16.gmra.mrb[104].mxu1 %vm498_vm1, %v1482_v5 }
  0xe5   : > { %2795 = vmatprep.mubr.msk.bf16.mxu1 %vm2917_vm0, %v2916_v1 }
  0xe6   : > { %v793_v10 = vpop.f32.mrb[0].mxu1 }
  0xe7   : > { %v2617_v12 = vpop.f32.mrb[1].mxu1 }
  0xe8   : > { %v796_v15 = vpop.f32.mrb[2].mxu1 }
  0xe9   : > { %v2618_v16 = vpop.f32.mrb[3].mxu1 }
  0xea   : > { %2722 = vmatmul.mubr.msk.bf16.gmra.mrb[104].mxu0 %vm498_vm1, %v1137_v11  ;;  %v1168_v11 = vrot.slane %v1166_v2, 1 }
  0xeb   : > { %2725 = vmatprep.mubr.msk.bf16.mxu0 %vm2917_vm0, %v2916_v1 }
  0xec   : > { %2796 = vmatmul.mubr.msk.bf16.gmra.mrb[108].mxu1 %vm498_vm1, %v1484_v17  ;;  %v1172_v29 = vor.u32 %v1170_v19, %v1168_v11 }
  0xed   : > { %v584_v21 = vpop.f32.mrb[0].mxu0  ;;  %2799 = vmatprep.mubr.msk.bf16.mxu1 %vm2917_vm0, %v2916_v1 }
  0xee   : > { %v3220_v23 = vadd.f32 %v793_v10, %v584_v21  ;;  %v2547_v24 = vpop.f32.mrb[1].mxu0  ;;  %v1164_v10 = vor.u32 %v1162_v0, %v1160_v56 }
  0xef   : > { %v587_v25 = vpop.f32.mrb[2].mxu0  ;;  %v801_v27 = vpop.f32.mrb[4].mxu1 }
  0xf0   : > { %v3223_v30 = vadd.f32 %v796_v15, %v587_v25  ;;  %v2548_v31 = vpop.f32.mrb[3].mxu0  ;;  %v2621_v32 = vpop.f32.mrb[5].mxu1  ;;  %v1169_v17 = vsel %vm351_vm2, %v1164_v10, %v1168_v11 }
  0xf1   : > { %v804_v33 = vpop.f32.mrb[6].mxu1  ;;  %v1176_v31 = vrot.slane %v1174_v20, 1 }
  0xf2   : > { %2726 = vmatmul.mubr.msk.bf16.gmra.mrb[108].mxu0 %vm498_vm1, %v1145_v26  ;;  %v2622_v36 = vpop.f32.mrb[7].mxu1  ;;  %v1492_v26 = vsel %vm1461_vm3, %v1489_v58, %v1491_v13 }
  0xf3   : > { %2729 = vmatprep.mubr.msk.bf16.mxu0 %vm2917_vm0, %v2916_v1  ;;  %v1177_v37 = vsel %vm351_vm2, %v1172_v29, %v1176_v31 }
  0xf4   : > { %2800 = vmatmul.mubr.msk.bf16.gmra.mrb[112].mxu1 %vm498_vm1, %v1486_v34 }
  0xf5   : > { %v592_v39 = vpop.f32.mrb[4].mxu0  ;;  %2803 = vmatprep.mubr.msk.bf16.mxu1 %vm2917_vm0, %v2916_v1 }
  0xf6   : > { %v3233_v41 = vadd.f32 %v801_v27, %v592_v39  ;;  %v2551_v42 = vpop.f32.mrb[5].mxu0  ;;  %v2890_v27 = vld [vmem:[%s2976_s23 + $0x88] sm:$0xff]   ;;  %v1178_v39 = vshrl.u32 %v2889_v8, 16 }
  0xf7   : > { %v595_v43 = vpop.f32.mrb[6].mxu0  ;;  %v809_v45 = vpop.f32.mrb[8].mxu1  ;;  %v1182_v40 = vshll.u32 %v2890_v27, 16 }
  0xf8   : > { %v3236_v48 = vadd.f32 %v804_v33, %v595_v43  ;;  %v2552_v49 = vpop.f32.mrb[7].mxu0  ;;  %v2625_v50 = vpop.f32.mrb[9].mxu1  ;;  %v1493_v33 = vrot.slane %v2890_v27, 1 }
  0xf9   : > { %v812_v51 = vpop.f32.mrb[10].mxu1  ;;  %v1180_v50 = vor.u32 %v1178_v39, %v1176_v31 }
  0xfa   : > { %2730 = vmatmul.mubr.msk.bf16.gmra.mrb[112].mxu0 %vm498_vm1, %v1153_v44  ;;  %v2626_v54 = vpop.f32.mrb[11].mxu1  ;;  %v1494_v46 = vsel %vm1461_vm3, %v1491_v13, %v1493_v33 }
  0xfb   : > { %2733 = vmatprep.mubr.msk.bf16.mxu0 %vm2917_vm0, %v2916_v1 }
  0xfc   : > { %2804 = vmatmul.mubr.msk.bf16.gmra.mrb[116].mxu1 %vm498_vm1, %v1488_v52 }
  0xfd   : > { %v600_v57 = vpop.f32.mrb[8].mxu0  ;;  %2807 = vmatprep.mubr.msk.bf16.mxu1 %vm2917_vm0, %v2916_v1 }
  0xfe   : > { %v3246_v59 = vadd.f32 %v809_v45, %v600_v57  ;;  %v2555_v60 = vpop.f32.mrb[9].mxu0 }
  0xff   : > { %v603_v61 = vpop.f32.mrb[10].mxu0  ;;  %v817_v63 = vpop.f32.mrb[12].mxu1  ;;  %v1186_v60 = vshrl.u32 %v2890_v27, 16 }
 0x100   : > { %v3249_v3 = vadd.f32 %v812_v51, %v603_v61  ;;  %v2556_v4 = vpop.f32.mrb[11].mxu0  ;;  %v2629_v5 = vpop.f32.mrb[13].mxu1  ;;  %v1184_v51 = vrot.slane %v1182_v40, 1  ;;  %v1190_v61 = vshll.u32 %v2891_v47, 16 }
 0x101   : > { %v820_v6 = vpop.f32.mrb[14].mxu1  ;;  %v1496_v4 = vsel %vm1461_vm3, %v1493_v33, %v1495_v53 }
 0x102   : > { %2734 = vmatmul.mubr.msk.bf16.gmra.mrb[116].mxu0 %vm498_vm1, %v1161_v62  ;;  %v2630_v9 = vpop.f32.mrb[15].mxu1  ;;  %v1185_v57 = vsel %vm351_vm2, %v1180_v50, %v1184_v51 }
 0x103   : > { %2737 = vmatprep.mubr.msk.bf16.mxu0 %vm2917_vm0, %v2916_v1 }
 0x104   : > { %2808 = vmatmul.mubr.msk.bf16.gmra.mrb[120].mxu1 %vm498_vm1, %v1490_v7  ;;  %v1192_v7 = vrot.slane %v1190_v61, 1 }
 0x105   : > { %v608_v12 = vpop.f32.mrb[12].mxu0  ;;  %2811 = vmatprep.mubr.msk.bf16.mxu1 %vm2917_vm0, %v2916_v1 }
 0x106   : > { %v3259_v14 = vadd.f32 %v817_v63, %v608_v12  ;;  %v2559_v15 = vpop.f32.mrb[13].mxu0 }
 0x107   : > { %v611_v16 = vpop.f32.mrb[14].mxu0  ;;  %v825_v18 = vpop.f32.mrb[16].mxu1 }
 0x108   : > { %v3262_v21 = vadd.f32 %v820_v6, %v611_v16  ;;  %v2560_v22 = vpop.f32.mrb[15].mxu0  ;;  %v2633_v24 = vpop.f32.mrb[17].mxu1  ;;  %v1188_v6 = vor.u32 %v1186_v60, %v1184_v51 }
 0x109   : > { %v828_v25 = vpop.f32.mrb[18].mxu1 }
 0x10a   : > { %2738 = vmatmul.mubr.msk.bf16.gmra.mrb[120].mxu0 %vm498_vm1, %v1169_v17  ;;  %v2634_v28 = vpop.f32.mrb[19].mxu1  ;;  %v1193_v12 = vsel %vm351_vm2, %v1188_v6, %v1192_v7 }
 0x10b   : > { %2741 = vmatprep.mubr.msk.bf16.mxu0 %vm2917_vm0, %v2916_v1 }
 0x10c   : > { %2812 = vmatmul.mubr.msk.bf16.gmra.mrb[124].mxu1 %vm498_vm1, %v1492_v26 }
 0x10d   : > { %v616_v32 = vpop.f32.mrb[16].mxu0  ;;  %2815 = vmatprep.mubr.msk.bf16.mxu1 %vm2917_vm0, %v2916_v1 }
 0x10e   : > { %v3272_v34 = vadd.f32 %v825_v18, %v616_v32  ;;  %v2563_v35 = vpop.f32.mrb[17].mxu0 }
 0x10f   : > { %v619_v36 = vpop.f32.mrb[18].mxu0  ;;  %v833_v38 = vpop.f32.mrb[20].mxu1 }
 0x110   : > { %v3275_v42 = vadd.f32 %v828_v25, %v619_v36  ;;  %v2564_v43 = vpop.f32.mrb[19].mxu0  ;;  %v2637_v44 = vpop.f32.mrb[21].mxu1 }
 0x111   : > { %v836_v45 = vpop.f32.mrb[22].mxu1 }
 0x112   : > { %2742 = vmatmul.mubr.msk.bf16.gmra.mrb[124].mxu0 %vm498_vm1, %v1177_v37  ;;  %v2638_v49 = vpop.f32.mrb[23].mxu1 }
 0x113   : > { %2745 = vmatprep.mubr.msk.bf16.mxu0 %vm2917_vm0, %v2916_v1 }
 0x114   : > { %2816 = vmatmul.mubr.msk.bf16.gmra.mrb[128].mxu1 %vm498_vm1, %v1494_v46 }
 0x115   : > { %v624_v52 = vpop.f32.mrb[20].mxu0  ;;  %2819 = vmatprep.mubr.msk.bf16.mxu1 %vm2917_vm0, %v2916_v1 }
 0x116   : > { %v3285_v54 = vadd.f32 %v833_v38, %v624_v52  ;;  %v2567_v55 = vpop.f32.mrb[21].mxu0 }
 0x117   : > { %v627_v56 = vpop.f32.mrb[22].mxu0  ;;  %v841_v58 = vpop.f32.mrb[24].mxu1 }
 0x118   : > { %v3288_v62 = vadd.f32 %v836_v45, %v627_v56  ;;  %v2568_v63 = vpop.f32.mrb[23].mxu0  ;;  %v2641_v0 = vpop.f32.mrb[25].mxu1 }
 0x119   : > { %v844_v2 = vpop.f32.mrb[26].mxu1 }
 0x11a   : > { %2746 = vmatmul.mubr.msk.bf16.gmra.mrb[128].mxu0 %vm498_vm1, %v1185_v57  ;;  %v2642_v5 = vpop.f32.mrb[27].mxu1 }
 0x11b   : > { %2749 = vmatprep.mubr.msk.bf16.mxu0 %vm2917_vm0, %v2916_v1 }
 0x11c   : > { %2820 = vmatmul.mubr.msk.bf16.gmra.mrb[132].mxu1 %vm498_vm1, %v1496_v4 }
 0x11d   : > { %v632_v8 = vpop.f32.mrb[24].mxu0 }
 0x11e   : > { %v3295_v9 = vadd.f32 %v841_v58, %v632_v8  ;;  %v2571_v10 = vpop.f32.mrb[25].mxu0 }
 0x11f   : > { %v635_v11 = vpop.f32.mrb[26].mxu0  ;;  %v849_v13 = vpop.f32.mrb[28].mxu1 }
 0x120   : > { %v3298_v15 = vadd.f32 %v844_v2, %v635_v11  ;;  %v2572_v16 = vpop.f32.mrb[27].mxu0  ;;  %v2645_v17 = vpop.f32.mrb[29].mxu1 }
 0x121   : > { %v852_v18 = vpop.f32.mrb[30].mxu1 }
 0x122   : > { %2750 = vmatmul.mubr.msk.bf16.gmra.mrb[132].mxu0 %vm498_vm1, %v1193_v12  ;;  %v2646_v1 = vpop.f32.mrb[31].mxu1 }
 0x125   : > { %v640_v19 = vpop.f32.mrb[28].mxu0 }
 0x126   : > { %v3301_v20 = vadd.f32 %v849_v13, %v640_v19  ;;  %v2575_v22 = vpop.f32.mrb[29].mxu0 }
 0x127   : > { %v643_v24 = vpop.f32.mrb[30].mxu0  ;;  %v857_v25 = vpop.f32.mrb[32].mxu1 }
 0x128   : > { %v3303_v26 = vadd.f32 %v852_v18, %v643_v24  ;;  %v2576_v27 = vpop.f32.mrb[31].mxu0  ;;  %v2649_v28 = vpop.f32.mrb[33].mxu1 }
 0x129   : > { %v860_v29 = vpop.f32.mrb[34].mxu1 }
 0x12a   : > { %v2650_v31 = vpop.f32.mrb[35].mxu1 }
 0x12d   : > { %v648_v32 = vpop.f32.mrb[32].mxu0 }
 0x12e   : > { %v3305_v33 = vadd.f32 %v857_v25, %v648_v32  ;;  %v2579_v35 = vpop.f32.mrb[33].mxu0 }
 0x12f   : > { %v651_v36 = vpop.f32.mrb[34].mxu0  ;;  %v865_v37 = vpop.f32.mrb[36].mxu1 }
 0x130   : > { %v3307_v38 = vadd.f32 %v860_v29, %v651_v36  ;;  %v2580_v39 = vpop.f32.mrb[35].mxu0  ;;  %v2653_v40 = vpop.f32.mrb[37].mxu1 }
 0x131   : > { %v868_v43 = vpop.f32.mrb[38].mxu1 }
 0x132   : > { %v2654_v44 = vpop.f32.mrb[39].mxu1 }
 0x135   : > { %v656_v45 = vpop.f32.mrb[36].mxu0 }
 0x136   : > { %v3309_v46 = vadd.f32 %v865_v37, %v656_v45  ;;  %v2583_v47 = vpop.f32.mrb[37].mxu0 }
 0x137   : > { %v659_v49 = vpop.f32.mrb[38].mxu0  ;;  %v873_v50 = vpop.f32.mrb[40].mxu1 }
 0x138   : > { %v3311_v51 = vadd.f32 %v868_v43, %v659_v49  ;;  %v2584_v52 = vpop.f32.mrb[39].mxu0  ;;  %v2657_v53 = vpop.f32.mrb[41].mxu1 }
 0x139   : > { %v876_v55 = vpop.f32.mrb[42].mxu1 }
 0x13a   : > { %v2658_v56 = vpop.f32.mrb[43].mxu1 }
 0x13d   : > { %v664_v57 = vpop.f32.mrb[40].mxu0 }
 0x13e   : > { %v3313_v58 = vadd.f32 %v873_v50, %v664_v57  ;;  %v2587_v60 = vpop.f32.mrb[41].mxu0 }
 0x13f   : > { %v667_v61 = vpop.f32.mrb[42].mxu0  ;;  %v881_v63 = vpop.f32.mrb[44].mxu1 }
 0x140   : > { %v3315_v0 = vadd.f32 %v876_v55, %v667_v61  ;;  %v2588_v2 = vpop.f32.mrb[43].mxu0  ;;  %v2661_v4 = vpop.f32.mrb[45].mxu1 }
 0x141   : > { %v884_v5 = vpop.f32.mrb[46].mxu1 }
 0x142   : > { %v2662_v6 = vpop.f32.mrb[47].mxu1 }
 0x145   : > { %v672_v7 = vpop.f32.mrb[44].mxu0 }
 0x146   : > { %v3317_v8 = vadd.f32 %v881_v63, %v672_v7  ;;  %v2591_v10 = vpop.f32.mrb[45].mxu0 }
 0x147   : > { %v675_v11 = vpop.f32.mrb[46].mxu0  ;;  %v889_v12 = vpop.f32.mrb[48].mxu1 }
 0x148   : > { %v3319_v13 = vadd.f32 %v884_v5, %v675_v11  ;;  %v2592_v16 = vpop.f32.mrb[47].mxu0  ;;  %v2665_v17 = vpop.f32.mrb[49].mxu1 }
 0x149   : > { %v892_v18 = vpop.f32.mrb[50].mxu1 }
 0x14a   : > { %v2666_v1 = vpop.f32.mrb[51].mxu1 }
 0x14d   : > { %v680_v19 = vpop.f32.mrb[48].mxu0 }
 0x14e   : > { %v3321_v22 = vadd.f32 %v889_v12, %v680_v19  ;;  %v2595_v24 = vpop.f32.mrb[49].mxu0 }
 0x14f   : > { %v683_v25 = vpop.f32.mrb[50].mxu0  ;;  %v897_v27 = vpop.f32.mrb[52].mxu1 }
 0x150   : > { %v3323_v28 = vadd.f32 %v892_v18, %v683_v25  ;;  %v2596_v29 = vpop.f32.mrb[51].mxu0  ;;  %v2669_v31 = vpop.f32.mrb[53].mxu1 }
 0x151   : > { %v900_v32 = vpop.f32.mrb[54].mxu1 }
 0x152   : > { %v2670_v35 = vpop.f32.mrb[55].mxu1 }
 0x155   : > { %v688_v36 = vpop.f32.mrb[52].mxu0 }
 0x156   : > { %v3325_v37 = vadd.f32 %v897_v27, %v688_v36  ;;  %v2599_v39 = vpop.f32.mrb[53].mxu0 }
 0x157   : > { %v691_v40 = vpop.f32.mrb[54].mxu0  ;;  %v905_v43 = vpop.f32.mrb[56].mxu1 }
 0x158   : > { %v3327_v44 = vadd.f32 %v900_v32, %v691_v40  ;;  %v2600_v45 = vpop.f32.mrb[55].mxu0  ;;  %v2673_v47 = vpop.f32.mrb[57].mxu1 }
 0x159   : > { %v908_v49 = vpop.f32.mrb[58].mxu1  ;;  %v3345_v47 = vld [vmem:[%s3448_s2] ss:$0 sm:$0xff] }
 0x15a   : > { %v2674_v50 = vpop.f32.mrb[59].mxu1 }
 0x15d   : > { %v696_v52 = vpop.f32.mrb[56].mxu0 }
 0x15e   : > { %v3329_v53 = vadd.f32 %v905_v43, %v696_v52  ;;  %v2603_v55 = vpop.f32.mrb[57].mxu0 }
 0x15f   : > { %v699_v56 = vpop.f32.mrb[58].mxu0  ;;  %v913_v57 = vpop.f32.mrb[60].mxu1 }
 0x160   : > { %v3331_v60 = vadd.f32 %v908_v49, %v699_v56  ;;  %v2604_v61 = vpop.f32.mrb[59].mxu0  ;;  %v2677_v63 = vpop.f32.mrb[61].mxu1 }
 0x161   : > { %v916_v2 = vpop.f32.mrb[62].mxu1 }
 0x162   : > { %v2678_v4 = vpop.f32.mrb[63].mxu1 }
 0x165   : > { %v704_v5 = vpop.f32.mrb[60].mxu0 }
 0x166   : > { %v3333_v6 = vadd.f32 %v913_v57, %v704_v5  ;;  %v2607_v7 = vpop.f32.mrb[61].mxu0 }
 0x167   : > { %v707_v10 = vpop.f32.mrb[62].mxu0  ;;  %v921_v11 = vpop.f32.mrb[64].mxu1 }
 0x168   : > { %v3335_v12 = vadd.f32 %v916_v2, %v707_v10  ;;  %v2608_v16 = vpop.f32.mrb[63].mxu0  ;;  %v2681_v17 = vpop.f32.mrb[65].mxu1 }
 0x169   : > { %v924_v18 = vpop.f32.mrb[66].mxu1 }
 0x16a   : > { %v2682_v1 = vpop.f32.mrb[67].mxu1 }
 0x16d   : > { %v712_v19 = vpop.f32.mrb[64].mxu0 }
 0x16e   : > { %v3337_v24 = vadd.f32 %v921_v11, %v712_v19  ;;  %v2611_v25 = vpop.f32.mrb[65].mxu0 }
 0x16f   : > { %v715_v27 = vpop.f32.mrb[66].mxu0  ;;  %v1588_v29 = vpop.f32.mrb[68].mxu1 }
 0x170   : > { %v3339_v31 = vadd.f32 %v924_v18, %v715_v27  ;;  %v2612_v32 = vpop.f32.mrb[67].mxu0  ;;  %v2757_v35 = vpop.f32.mrb[69].mxu1 }
 0x171   : > { %v1591_v36 = vpop.f32.mrb[70].mxu1 }
 0x172   : > { %v2758_v39 = vpop.f32.mrb[71].mxu1 }
 0x175   : > { %v1285_v40 = vpop.f32.mrb[68].mxu0 }
 0x176   : > { %v1420_v43 = vadd.f32 %v1285_v40, %v3220_v23  ;;  %v2687_v45 = vpop.f32.mrb[69].mxu0 }
 0x177   : > { %v1288_v49 = vpop.f32.mrb[70].mxu0  ;;  %v1596_v50 = vpop.f32.mrb[72].mxu1 }
 0x178   : > { %v1723_v52 = vadd.f32 %v1588_v29, %v1420_v43  ;;  %v1421_v55 = vadd.f32 %v1288_v49, %v3223_v30  ;;  %v2688_v56 = vpop.f32.mrb[71].mxu0  ;;  %v2761_v57 = vpop.f32.mrb[73].mxu1 }
 0x179   : > { %v1599_v61 = vpop.f32.mrb[74].mxu1 }
 0x17a   : > { %v1764_v63 = vadd.f32 %v3345_v47, %v1723_v52  ;;  %v1724_v2 = vadd.f32 %v1591_v36, %v1421_v55  ;;  %v2762_v4 = vpop.f32.mrb[75].mxu1 }
 0x17c   : > { %v1832_v5 = vmul.f32 0.2, %v1764_v63  ;;  %v1765_v23 = vadd.f32 %v3345_v47, %v1724_v2  ;;  %vm1798_vm4 = vcmp.ge.f32.partialorder %v1764_v63, 0.0 }
 0x17d   : > { %v1293_v7 = vpop.f32.mrb[72].mxu0 }
 0x17e   : > { %vm1799_vm5 = vcmp.ge.f32.partialorder %v1765_v23, 0.0  ;;  %v1833_v10 = vmul.f32 0.2, %v1765_v23  ;;  %v1422_v11 = vadd.f32 %v1293_v7, %v3233_v41  ;;  %v2691_v16 = vpop.f32.mrb[73].mxu0  ;;  %v1866_v18 = vsel %vm1798_vm4, %v1764_v63, %v1832_v5 }
 0x17f   : > { %v1296_v17 = vpop.f32.mrb[74].mxu0  ;;  %v1604_v30 = vpop.f32.mrb[76].mxu1 }
 0x180   : > { %v1867_v1 = vsel %vm1799_vm5, %v1765_v23, %v1833_v10  ;;  %v1725_v19 = vadd.f32 %v1596_v50, %v1422_v11  ;;  %v1423_v25 = vadd.f32 %v1296_v17, %v3236_v48  ;;  %v2692_v27 = vpop.f32.mrb[75].mxu0  ;;  %v2765_v29 = vpop.f32.mrb[77].mxu1 }
 0x181   : > { %v2373_v32 = vpack.c.bf16 %v1867_v1, %v1866_v18  ;;  %v1607_v35 = vpop.f32.mrb[78].mxu1 }
 0x182   : > { %v1766_v41 = vadd.f32 %v3345_v47, %v1725_v19  ;;  %v1726_v36 = vadd.f32 %v1599_v61, %v1423_v25  ;;  %v2766_v39 = vpop.f32.mrb[79].mxu1 }
 0x183   : > { %2374 = vst [vmem:[%s3355_s6] sm:$0xff] %v2373_v32  }
 0x184   : > { %v1834_v40 = vmul.f32 0.2, %v1766_v41  ;;  %v1767_v43 = vadd.f32 %v3345_v47, %v1726_v36  ;;  %vm1800_vm6 = vcmp.ge.f32.partialorder %v1766_v41, 0.0 }
 0x185   : > { %v1301_v45 = vpop.f32.mrb[76].mxu0 }
 0x186   : > { %vm1801_vm7 = vcmp.ge.f32.partialorder %v1767_v43, 0.0  ;;  %v1835_v49 = vmul.f32 0.2, %v1767_v43  ;;  %v1424_v50 = vadd.f32 %v1301_v45, %v3246_v59  ;;  %v2695_v48 = vpop.f32.mrb[77].mxu0  ;;  %v1868_v56 = vsel %vm1800_vm6, %v1766_v41, %v1834_v40 }
 0x187   : > { %v1304_v52 = vpop.f32.mrb[78].mxu0  ;;  %v1612_v55 = vpop.f32.mrb[80].mxu1 }
 0x188   : > { %v1869_v57 = vsel %vm1801_vm7, %v1767_v43, %v1835_v49  ;;  %v1727_v63 = vadd.f32 %v1604_v30, %v1424_v50  ;;  %v1425_v61 = vadd.f32 %v1304_v52, %v3249_v3  ;;  %v2696_v2 = vpop.f32.mrb[79].mxu0  ;;  %v2769_v4 = vpop.f32.mrb[81].mxu1 }
 0x189   : > { %v2378_v5 = vpack.c.bf16 %v1869_v57, %v1868_v56  ;;  %v1615_v23 = vpop.f32.mrb[82].mxu1 }
 0x18a   : > { %v1768_v7 = vadd.f32 %v3345_v47, %v1727_v63  ;;  %v1728_v10 = vadd.f32 %v1607_v35, %v1425_v61  ;;  %v2770_v11 = vpop.f32.mrb[83].mxu1 }
 0x18b   : > { %2455 = vst [vmem:[%s3355_s6 + $0x8] sm:$0xff] %v2378_v5  }
 0x18c   : > { %v1836_v16 = vmul.f32 0.2, %v1768_v7  ;;  %v1769_v59 = vadd.f32 %v3345_v47, %v1728_v10  ;;  %vm1802_vm8 = vcmp.ge.f32.partialorder %v1768_v7, 0.0 }
 0x18d   : > { %v1309_v17 = vpop.f32.mrb[80].mxu0 }
 0x18e   : > { %vm1803_vm9 = vcmp.ge.f32.partialorder %v1769_v59, 0.0  ;;  %v1837_v18 = vmul.f32 0.2, %v1769_v59  ;;  %v1426_v30 = vadd.f32 %v1309_v17, %v3259_v14  ;;  %v2699_v3 = vpop.f32.mrb[81].mxu0  ;;  %v1870_v25 = vsel %vm1802_vm8, %v1768_v7, %v1836_v16 }
 0x18f   : > { %v1312_v1 = vpop.f32.mrb[82].mxu0  ;;  %v1620_v19 = vpop.f32.mrb[84].mxu1 }
 0x190   : > { %v1871_v27 = vsel %vm1803_vm9, %v1769_v59, %v1837_v18  ;;  %v1729_v29 = vadd.f32 %v1612_v55, %v1426_v30  ;;  %v1427_v32 = vadd.f32 %v1312_v1, %v3262_v21  ;;  %v2700_v35 = vpop.f32.mrb[83].mxu0  ;;  %v2773_v41 = vpop.f32.mrb[85].mxu1 }
 0x191   : > { %v2383_v36 = vpack.c.bf16 %v1871_v27, %v1870_v25  ;;  %v1623_v39 = vpop.f32.mrb[86].mxu1 }
 0x192   : > { %v1770_v40 = vadd.f32 %v3345_v47, %v1729_v29  ;;  %v1730_v43 = vadd.f32 %v1615_v23, %v1427_v32  ;;  %v2774_v45 = vpop.f32.mrb[87].mxu1 }
 0x193   : > { %2456 = vst [vmem:[%s3355_s6 + $0x10] sm:$0xff] %v2383_v36  }
 0x194   : > { %v1838_v49 = vmul.f32 0.2, %v1770_v40  ;;  %v1771_v14 = vadd.f32 %v3345_v47, %v1730_v43  ;;  %vm1804_vm10 = vcmp.ge.f32.partialorder %v1770_v40, 0.0 }
 0x195   : > { %v1317_v50 = vpop.f32.mrb[84].mxu0 }
 0x196   : > { %vm1805_vm11 = vcmp.ge.f32.partialorder %v1771_v14, 0.0  ;;  %v1839_v48 = vmul.f32 0.2, %v1771_v14  ;;  %v1428_v52 = vadd.f32 %v1317_v50, %v3272_v34  ;;  %v2703_v21 = vpop.f32.mrb[85].mxu0  ;;  %v1872_v57 = vsel %vm1804_vm10, %v1770_v40, %v1838_v49 }
 0x197   : > { %v1320_v55 = vpop.f32.mrb[86].mxu0  ;;  %v1628_v56 = vpop.f32.mrb[88].mxu1 }
 0x198   : > { %v1873_v63 = vsel %vm1805_vm11, %v1771_v14, %v1839_v48  ;;  %v1731_v61 = vadd.f32 %v1620_v19, %v1428_v52  ;;  %v1429_v2 = vadd.f32 %v1320_v55, %v3275_v42  ;;  %v2704_v4 = vpop.f32.mrb[87].mxu0  ;;  %v2777_v5 = vpop.f32.mrb[89].mxu1 }
 0x199   : > { %v2388_v23 = vpack.c.bf16 %v1873_v63, %v1872_v57  ;;  %v1631_v7 = vpop.f32.mrb[90].mxu1 }
 0x19a   : > { %v1772_v10 = vadd.f32 %v3345_v47, %v1731_v61  ;;  %v1732_v11 = vadd.f32 %v1623_v39, %v1429_v2  ;;  %v2778_v16 = vpop.f32.mrb[91].mxu1 }
 0x19b   : > { %2457 = vst [vmem:[%s3355_s6 + $0x18] sm:$0xff] %v2388_v23  }
 0x19c   : > { %v1840_v59 = vmul.f32 0.2, %v1772_v10  ;;  %v1773_v34 = vadd.f32 %v3345_v47, %v1732_v11  ;;  %vm1806_vm12 = vcmp.ge.f32.partialorder %v1772_v10, 0.0 }
 0x19d   : > { %v1325_v17 = vpop.f32.mrb[88].mxu0 }
 0x19e   : > { %vm1807_vm13 = vcmp.ge.f32.partialorder %v1773_v34, 0.0  ;;  %v1841_v18 = vmul.f32 0.2, %v1773_v34  ;;  %v1430_v30 = vadd.f32 %v1325_v17, %v3285_v54  ;;  %v2707_v42 = vpop.f32.mrb[89].mxu0  ;;  %v1874_v19 = vsel %vm1806_vm12, %v1772_v10, %v1840_v59 }
 0x19f   : > { %v1328_v3 = vpop.f32.mrb[90].mxu0  ;;  %v1636_v1 = vpop.f32.mrb[92].mxu1 }
 0x1a0   : > { %v1875_v25 = vsel %vm1807_vm13, %v1773_v34, %v1841_v18  ;;  %v1733_v27 = vadd.f32 %v1628_v56, %v1430_v30  ;;  %v1431_v29 = vadd.f32 %v1328_v3, %v3288_v62  ;;  %v2708_v32 = vpop.f32.mrb[91].mxu0  ;;  %v2781_v35 = vpop.f32.mrb[93].mxu1 }
 0x1a1   : > { %v2393_v41 = vpack.c.bf16 %v1875_v25, %v1874_v19  ;;  %v1639_v36 = vpop.f32.mrb[94].mxu1 }
 0x1a2   : > { %v1774_v39 = vadd.f32 %v3345_v47, %v1733_v27  ;;  %v1734_v40 = vadd.f32 %v1631_v7, %v1431_v29  ;;  %v2782_v43 = vpop.f32.mrb[95].mxu1 }
 0x1a3   : > { %2458 = vst [vmem:[%s3355_s6 + $0x20] sm:$0xff] %v2393_v41  }
 0x1a4   : > { %v1842_v45 = vmul.f32 0.2, %v1774_v39  ;;  %v1775_v54 = vadd.f32 %v3345_v47, %v1734_v40  ;;  %vm1808_vm14 = vcmp.ge.f32.partialorder %v1774_v39, 0.0 }
 0x1a5   : > { %v1333_v49 = vpop.f32.mrb[92].mxu0 }
 0x1a6   : > { %vm1809_vm15 = vcmp.ge.f32.partialorder %v1775_v54, 0.0  ;;  %v1843_v14 = vmul.f32 0.2, %v1775_v54  ;;  %v1432_v50 = vadd.f32 %v1333_v49, %v3295_v9  ;;  %v2711_v62 = vpop.f32.mrb[93].mxu0  ;;  %v1876_v21 = vsel %vm1808_vm14, %v1774_v39, %v1842_v45 }
 0x1a7   : > { %v1336_v48 = vpop.f32.mrb[94].mxu0  ;;  %v1644_v52 = vpop.f32.mrb[96].mxu1 }
 0x1a8   : > { %v1877_v55 = vsel %vm1809_vm15, %v1775_v54, %v1843_v14  ;;  %v1735_v56 = vadd.f32 %v1636_v1, %v1432_v50  ;;  %v1433_v57 = vadd.f32 %v1336_v48, %v3298_v15  ;;  %v2712_v63 = vpop.f32.mrb[95].mxu0  ;;  %v2785_v61 = vpop.f32.mrb[97].mxu1 }
 0x1a9   : > { %v2398_v2 = vpack.c.bf16 %v1877_v55, %v1876_v21  ;;  %v1647_v4 = vpop.f32.mrb[98].mxu1 }
 0x1aa   : > { %v1776_v5 = vadd.f32 %v3345_v47, %v1735_v56  ;;  %v1736_v23 = vadd.f32 %v1639_v36, %v1433_v57  ;;  %v2786_v7 = vpop.f32.mrb[99].mxu1 }
 0x1ab   : > { %2459 = vst [vmem:[%s3355_s6 + $0x28] sm:$0xff] %v2398_v2  }
 0x1ac   : > { %v1844_v10 = vmul.f32 0.2, %v1776_v5  ;;  %v1777_v9 = vadd.f32 %v3345_v47, %v1736_v23  ;;  %vm1810_vm0 = vcmp.ge.f32.partialorder %v1776_v5, 0.0 }
 0x1ad   : > { %v1341_v11 = vpop.f32.mrb[96].mxu0 }
 0x1ae   : > { %vm1811_vm1 = vcmp.ge.f32.partialorder %v1777_v9, 0.0  ;;  %v1845_v16 = vmul.f32 0.2, %v1777_v9  ;;  %v1434_v59 = vadd.f32 %v1341_v11, %v3301_v20  ;;  %v2715_v15 = vpop.f32.mrb[97].mxu0  ;;  %v1878_v18 = vsel %vm1810_vm0, %v1776_v5, %v1844_v10 }
 0x1af   : > { %v1344_v34 = vpop.f32.mrb[98].mxu0  ;;  %v1652_v17 = vpop.f32.mrb[100].mxu1 }
 0x1b0   : > { %v1879_v30 = vsel %vm1811_vm1, %v1777_v9, %v1845_v16  ;;  %v1737_v42 = vadd.f32 %v1644_v52, %v1434_v59  ;;  %v1435_v3 = vadd.f32 %v1344_v34, %v3303_v26  ;;  %v2716_v1 = vpop.f32.mrb[99].mxu0  ;;  %v2789_v19 = vpop.f32.mrb[101].mxu1 }
 0x1b1   : > { %v2403_v25 = vpack.c.bf16 %v1879_v30, %v1878_v18  ;;  %v1655_v27 = vpop.f32.mrb[102].mxu1 }
 0x1b2   : > { %v1778_v29 = vadd.f32 %v3345_v47, %v1737_v42  ;;  %v1738_v32 = vadd.f32 %v1647_v4, %v1435_v3  ;;  %v2790_v35 = vpop.f32.mrb[103].mxu1 }
 0x1b3   : > { %2460 = vst [vmem:[%s3355_s6 + $0x30] sm:$0xff] %v2403_v25  }
 0x1b4   : > { %v1846_v41 = vmul.f32 0.2, %v1778_v29  ;;  %v1779_v20 = vadd.f32 %v3345_v47, %v1738_v32  ;;  %vm1812_vm2 = vcmp.ge.f32.partialorder %v1778_v29, 0.0 }
 0x1b5   : > { %v1349_v36 = vpop.f32.mrb[100].mxu0 }
 0x1b6   : > { %vm1813_vm3 = vcmp.ge.f32.partialorder %v1779_v20, 0.0  ;;  %v1847_v39 = vmul.f32 0.2, %v1779_v20  ;;  %v1436_v40 = vadd.f32 %v1349_v36, %v3305_v33  ;;  %v2719_v26 = vpop.f32.mrb[101].mxu0  ;;  %v1880_v54 = vsel %vm1812_vm2, %v1778_v29, %v1846_v41 }
 0x1b7   : > { %v1352_v43 = vpop.f32.mrb[102].mxu0  ;;  %v1660_v45 = vpop.f32.mrb[104].mxu1 }
 0x1b8   : > { %v1881_v49 = vsel %vm1813_vm3, %v1779_v20, %v1847_v39  ;;  %v1739_v14 = vadd.f32 %v1652_v17, %v1436_v40  ;;  %v1437_v50 = vadd.f32 %v1352_v43, %v3307_v38  ;;  %v2720_v62 = vpop.f32.mrb[103].mxu0  ;;  %v2793_v48 = vpop.f32.mrb[105].mxu1 }
 0x1b9   : > { %v2408_v52 = vpack.c.bf16 %v1881_v49, %v1880_v54  ;;  %v1663_v21 = vpop.f32.mrb[106].mxu1 }
 0x1ba   : > { %v1780_v55 = vadd.f32 %v3345_v47, %v1739_v14  ;;  %v1740_v56 = vadd.f32 %v1655_v27, %v1437_v50  ;;  %v2794_v57 = vpop.f32.mrb[107].mxu1 }
 0x1bb   : > { %2461 = vst [vmem:[%s3355_s6 + $0x38] sm:$0xff] %v2408_v52  }
 0x1bc   : > { %v1848_v63 = vmul.f32 0.2, %v1780_v55  ;;  %v1781_v33 = vadd.f32 %v3345_v47, %v1740_v56  ;;  %vm1814_vm4 = vcmp.ge.f32.partialorder %v1780_v55, 0.0 }
 0x1bd   : > { %v1357_v61 = vpop.f32.mrb[104].mxu0 }
 0x1be   : > { %vm1815_vm5 = vcmp.ge.f32.partialorder %v1781_v33, 0.0  ;;  %v1849_v2 = vmul.f32 0.2, %v1781_v33  ;;  %v1438_v4 = vadd.f32 %v1357_v61, %v3309_v46  ;;  %v2723_v38 = vpop.f32.mrb[105].mxu0  ;;  %v1882_v7 = vsel %vm1814_vm4, %v1780_v55, %v1848_v63 }
 0x1bf   : > { %v1360_v5 = vpop.f32.mrb[106].mxu0  ;;  %v1668_v23 = vpop.f32.mrb[108].mxu1 }
 0x1c0   : > { %v1883_v10 = vsel %vm1815_vm5, %v1781_v33, %v1849_v2  ;;  %v1741_v9 = vadd.f32 %v1660_v45, %v1438_v4  ;;  %v1439_v11 = vadd.f32 %v1360_v5, %v3311_v51  ;;  %v2724_v16 = vpop.f32.mrb[107].mxu0  ;;  %v2797_v59 = vpop.f32.mrb[109].mxu1 }
 0x1c1   : > { %v2413_v15 = vpack.c.bf16 %v1883_v10, %v1882_v7  ;;  %v1671_v34 = vpop.f32.mrb[110].mxu1 }
 0x1c2   : > { %v1782_v17 = vadd.f32 %v3345_v47, %v1741_v9  ;;  %v1742_v18 = vadd.f32 %v1663_v21, %v1439_v11  ;;  %v2798_v30 = vpop.f32.mrb[111].mxu1 }
 0x1c3   : > { %2462 = vst [vmem:[%s3355_s6 + $0x40] sm:$0xff] %v2413_v15  }
 0x1c4   : > { %v1850_v42 = vmul.f32 0.2, %v1782_v17  ;;  %v1783_v46 = vadd.f32 %v3345_v47, %v1742_v18  ;;  %vm1816_vm6 = vcmp.ge.f32.partialorder %v1782_v17, 0.0 }
 0x1c5   : > { %v1365_v3 = vpop.f32.mrb[108].mxu0 }
 0x1c6   : > { %vm1817_vm7 = vcmp.ge.f32.partialorder %v1783_v46, 0.0  ;;  %v1851_v1 = vmul.f32 0.2, %v1783_v46  ;;  %v1440_v19 = vadd.f32 %v1365_v3, %v3313_v58  ;;  %v2727_v51 = vpop.f32.mrb[109].mxu0  ;;  %v1884_v29 = vsel %vm1816_vm6, %v1782_v17, %v1850_v42 }
 0x1c7   : > { %v1368_v25 = vpop.f32.mrb[110].mxu0  ;;  %v1676_v27 = vpop.f32.mrb[112].mxu1 }
 0x1c8   : > { %v1885_v32 = vsel %vm1817_vm7, %v1783_v46, %v1851_v1  ;;  %v1743_v35 = vadd.f32 %v1668_v23, %v1440_v19  ;;  %v1441_v41 = vadd.f32 %v1368_v25, %v3315_v0  ;;  %v2728_v20 = vpop.f32.mrb[111].mxu0  ;;  %v2801_v36 = vpop.f32.mrb[113].mxu1 }
 0x1c9   : > { %v2418_v39 = vpack.c.bf16 %v1885_v32, %v1884_v29  ;;  %v1679_v40 = vpop.f32.mrb[114].mxu1 }
 0x1ca   : > { %v1784_v26 = vadd.f32 %v3345_v47, %v1743_v35  ;;  %v1744_v43 = vadd.f32 %v1671_v34, %v1441_v41  ;;  %v2802_v45 = vpop.f32.mrb[115].mxu1 }
 0x1cb   : > { %2463 = vst [vmem:[%s3355_s6 + $0x48] sm:$0xff] %v2418_v39  }
 0x1cc   : > { %v1852_v54 = vmul.f32 0.2, %v1784_v26  ;;  %v1785_v58 = vadd.f32 %v3345_v47, %v1744_v43  ;;  %vm1818_vm8 = vcmp.ge.f32.partialorder %v1784_v26, 0.0 }
 0x1cd   : > { %v1373_v49 = vpop.f32.mrb[112].mxu0 }
 0x1ce   : > { %vm1819_vm9 = vcmp.ge.f32.partialorder %v1785_v58, 0.0  ;;  %v1853_v14 = vmul.f32 0.2, %v1785_v58  ;;  %v1442_v50 = vadd.f32 %v1373_v49, %v3317_v8  ;;  %v2731_v0 = vpop.f32.mrb[113].mxu0  ;;  %v1886_v52 = vsel %vm1818_vm8, %v1784_v26, %v1852_v54 }
 0x1cf   : > { %v1376_v62 = vpop.f32.mrb[114].mxu0  ;;  %v1684_v48 = vpop.f32.mrb[116].mxu1 }
 0x1d0   : > { %v1887_v21 = vsel %vm1819_vm9, %v1785_v58, %v1853_v14  ;;  %v1745_v55 = vadd.f32 %v1676_v27, %v1442_v50  ;;  %v1443_v56 = vadd.f32 %v1376_v62, %v3319_v13  ;;  %v2732_v57 = vpop.f32.mrb[115].mxu0  ;;  %v2805_v63 = vpop.f32.mrb[117].mxu1 }
 0x1d1   : > { %v2423_v33 = vpack.c.bf16 %v1887_v21, %v1886_v52  ;;  %v1687_v61 = vpop.f32.mrb[118].mxu1 }
 0x1d2   : > { %v1786_v2 = vadd.f32 %v3345_v47, %v1745_v55  ;;  %v1746_v4 = vadd.f32 %v1679_v40, %v1443_v56  ;;  %v2806_v38 = vpop.f32.mrb[119].mxu1 }
 0x1d3   : > { %2464 = vst [vmem:[%s3355_s6 + $0x50] sm:$0xff] %v2423_v33  }
 0x1d4   : > { %v1854_v5 = vmul.f32 0.2, %v1786_v2  ;;  %v1787_v8 = vadd.f32 %v3345_v47, %v1746_v4  ;;  %vm1820_vm10 = vcmp.ge.f32.partialorder %v1786_v2, 0.0 }
 0x1d5   : > { %v1381_v23 = vpop.f32.mrb[116].mxu0 }
 0x1d6   : > { %vm1821_vm11 = vcmp.ge.f32.partialorder %v1787_v8, 0.0  ;;  %v1855_v7 = vmul.f32 0.2, %v1787_v8  ;;  %v1444_v10 = vadd.f32 %v1381_v23, %v3321_v22  ;;  %v2735_v13 = vpop.f32.mrb[117].mxu0  ;;  %v1888_v16 = vsel %vm1820_vm10, %v1786_v2, %v1854_v5 }
 0x1d7   : > { %v1384_v9 = vpop.f32.mrb[118].mxu0  ;;  %v1692_v11 = vpop.f32.mrb[120].mxu1 }
 0x1d8   : > { %v1889_v59 = vsel %vm1821_vm11, %v1787_v8, %v1855_v7  ;;  %v1747_v15 = vadd.f32 %v1684_v48, %v1444_v10  ;;  %v1445_v34 = vadd.f32 %v1384_v9, %v3323_v28  ;;  %v2736_v17 = vpop.f32.mrb[119].mxu0  ;;  %v2809_v18 = vpop.f32.mrb[121].mxu1 }
 0x1d9   : > { %v2428_v30 = vpack.c.bf16 %v1889_v59, %v1888_v16  ;;  %v1695_v42 = vpop.f32.mrb[122].mxu1 }
 0x1da   : > { %v1788_v46 = vadd.f32 %v3345_v47, %v1747_v15  ;;  %v1748_v3 = vadd.f32 %v1687_v61, %v1445_v34  ;;  %v2810_v1 = vpop.f32.mrb[123].mxu1 }
 0x1db   : > { %2465 = vst [vmem:[%s3355_s6 + $0x58] sm:$0xff] %v2428_v30  }
 0x1dc   : > { %v1856_v19 = vmul.f32 0.2, %v1788_v46  ;;  %v1789_v22 = vadd.f32 %v3345_v47, %v1748_v3  ;;  %vm1822_vm12 = vcmp.ge.f32.partialorder %v1788_v46, 0.0 }
 0x1dd   : > { %v1389_v51 = vpop.f32.mrb[120].mxu0 }
 0x1de   : > { %vm1823_vm13 = vcmp.ge.f32.partialorder %v1789_v22, 0.0  ;;  %v1857_v25 = vmul.f32 0.2, %v1789_v22  ;;  %v1446_v27 = vadd.f32 %v1389_v51, %v3325_v37  ;;  %v2739_v28 = vpop.f32.mrb[121].mxu0  ;;  %v1890_v35 = vsel %vm1822_vm12, %v1788_v46, %v1856_v19 }
 0x1df   : > { %v1392_v29 = vpop.f32.mrb[122].mxu0  ;;  %v1700_v32 = vpop.f32.mrb[124].mxu1 }
 0x1e0   : > { %v1891_v41 = vsel %vm1823_vm13, %v1789_v22, %v1857_v25  ;;  %v1749_v20 = vadd.f32 %v1692_v11, %v1446_v27  ;;  %v1447_v36 = vadd.f32 %v1392_v29, %v3327_v44  ;;  %v2740_v39 = vpop.f32.mrb[123].mxu0  ;;  %v2813_v40 = vpop.f32.mrb[125].mxu1 }
 0x1e1   : > { %v2433_v26 = vpack.c.bf16 %v1891_v41, %v1890_v35  ;;  %v1703_v43 = vpop.f32.mrb[126].mxu1 }
 0x1e2   : > { %v1790_v45 = vadd.f32 %v3345_v47, %v1749_v20  ;;  %v1750_v54 = vadd.f32 %v1695_v42, %v1447_v36  ;;  %v2814_v58 = vpop.f32.mrb[127].mxu1 }
 0x1e3   : > { %2466 = vst [vmem:[%s3355_s6 + $0x60] sm:$0xff] %v2433_v26  }
 0x1e4   : > { %v1858_v49 = vmul.f32 0.2, %v1790_v45  ;;  %v1791_v37 = vadd.f32 %v3345_v47, %v1750_v54  ;;  %vm1824_vm14 = vcmp.ge.f32.partialorder %v1790_v45, 0.0 }
 0x1e5   : > { %v1397_v14 = vpop.f32.mrb[124].mxu0 }
 0x1e6   : > { %vm1825_vm15 = vcmp.ge.f32.partialorder %v1791_v37, 0.0  ;;  %v1859_v50 = vmul.f32 0.2, %v1791_v37  ;;  %v1448_v0 = vadd.f32 %v1397_v14, %v3329_v53  ;;  %v2743_v44 = vpop.f32.mrb[125].mxu0  ;;  %v1892_v52 = vsel %vm1824_vm14, %v1790_v45, %v1858_v49 }
 0x1e7   : > { %v1400_v62 = vpop.f32.mrb[126].mxu0  ;;  %v1708_v48 = vpop.f32.mrb[128].mxu1 }
 0x1e8   : > { %v1893_v21 = vsel %vm1825_vm15, %v1791_v37, %v1859_v50  ;;  %v1751_v55 = vadd.f32 %v1700_v32, %v1448_v0  ;;  %v1449_v56 = vadd.f32 %v1400_v62, %v3331_v60  ;;  %v2744_v57 = vpop.f32.mrb[127].mxu0  ;;  %v2817_v63 = vpop.f32.mrb[129].mxu1 }
 0x1e9   : > { %v2438_v33 = vpack.c.bf16 %v1893_v21, %v1892_v52  ;;  %v1711_v61 = vpop.f32.mrb[130].mxu1 }
 0x1ea   : > { %v1792_v2 = vadd.f32 %v3345_v47, %v1751_v55  ;;  %v1752_v4 = vadd.f32 %v1703_v43, %v1449_v56  ;;  %v2818_v38 = vpop.f32.mrb[131].mxu1 }
 0x1eb   : > { %2467 = vst [vmem:[%s3355_s6 + $0x68] sm:$0xff] %v2438_v33  }
 0x1ec   : > { %v1860_v5 = vmul.f32 0.2, %v1792_v2  ;;  %v1793_v53 = vadd.f32 %v3345_v47, %v1752_v4  ;;  %vm1826_vm0 = vcmp.ge.f32.partialorder %v1792_v2, 0.0 }
 0x1ed   : > { %v1405_v8 = vpop.f32.mrb[128].mxu0 }
 0x1ee   : > { %vm1827_vm1 = vcmp.ge.f32.partialorder %v1793_v53, 0.0  ;;  %v1861_v23 = vmul.f32 0.2, %v1793_v53  ;;  %v1450_v7 = vadd.f32 %v1405_v8, %v3333_v6  ;;  %v2747_v60 = vpop.f32.mrb[129].mxu0  ;;  %v1894_v9 = vsel %vm1826_vm0, %v1792_v2, %v1860_v5 }
 0x1ef   : > { %v1408_v10 = vpop.f32.mrb[130].mxu0  ;;  %v1716_v13 = vpop.f32.mrb[132].mxu1 }
 0x1f0   : > { %v1895_v11 = vsel %vm1827_vm1, %v1793_v53, %v1861_v23  ;;  %v1753_v16 = vadd.f32 %v1708_v48, %v1450_v7  ;;  %v1451_v59 = vadd.f32 %v1408_v10, %v3335_v12  ;;  %v2748_v15 = vpop.f32.mrb[131].mxu0  ;;  %v2821_v34 = vpop.f32.mrb[133].mxu1 }
 0x1f1   : > { %v2443_v17 = vpack.c.bf16 %v1895_v11, %v1894_v9  ;;  %v1719_v18 = vpop.f32.mrb[134].mxu1 }
 0x1f2   : > { %v1794_v30 = vadd.f32 %v3345_v47, %v1753_v16  ;;  %v1754_v42 = vadd.f32 %v1711_v61, %v1451_v59  ;;  %v2822_v46 = vpop.f32.mrb[135].mxu1 }
 0x1f3   : > { %2468 = vst [vmem:[%s3355_s6 + $0x70] sm:$0xff] %v2443_v17  }
 0x1f4   : > { %v1862_v3 = vmul.f32 0.2, %v1794_v30  ;;  %v1795_v6 = vadd.f32 %v3345_v47, %v1754_v42  ;;  %vm1828_vm2 = vcmp.ge.f32.partialorder %v1794_v30, 0.0 }
 0x1f5   : > { %v1413_v1 = vpop.f32.mrb[132].mxu0 }
 0x1f6   : > { %vm1829_vm3 = vcmp.ge.f32.partialorder %v1795_v6, 0.0  ;;  %v1863_v19 = vmul.f32 0.2, %v1795_v6  ;;  %v1452_v22 = vadd.f32 %v1413_v1, %v3337_v24  ;;  %v2751_v12 = vpop.f32.mrb[133].mxu0  ;;  %v1896_v25 = vsel %vm1828_vm2, %v1794_v30, %v1862_v3 }
 0x1f7   : > { %v1416_v51 = vpop.f32.mrb[134].mxu0 }
 0x1f8   : > { %v1897_v27 = vsel %vm1829_vm3, %v1795_v6, %v1863_v19  ;;  %v1755_v28 = vadd.f32 %v1716_v13, %v1452_v22  ;;  %v1453_v29 = vadd.f32 %v1416_v51, %v3339_v31  ;;  %v2752_v32 = vpop.f32.mrb[135].mxu0 }
 0x1f9   : > { %v2448_v35 = vpack.c.bf16 %v1897_v27, %v1896_v25 }
 0x1fa   : > { %v1796_v41 = vadd.f32 %v3345_v47, %v1755_v28  ;;  %v1756_v20 = vadd.f32 %v1719_v18, %v1453_v29 }
 0x1fb   : > { %2469 = vst [vmem:[%s3355_s6 + $0x78] sm:$0xff] %v2448_v35  }
 0x1fc   : > { %v1864_v36 = vmul.f32 0.2, %v1796_v41  ;;  %v1797_v39 = vadd.f32 %v3345_v47, %v1756_v20  ;;  %vm1830_vm4 = vcmp.ge.f32.partialorder %v1796_v41, 0.0 }
 0x1fe   : > { %vm1831_vm5 = vcmp.ge.f32.partialorder %v1797_v39, 0.0  ;;  %v1865_v24 = vmul.f32 0.2, %v1797_v39  ;;  %v1898_v40 = vsel %vm1830_vm4, %v1796_v41, %v1864_v36 }
 0x200   : > { %v1899_v26 = vsel %vm1831_vm5, %v1797_v39, %v1865_v24 }
 0x201   : > { %v2453_v43 = vpack.c.bf16 %v1899_v26, %v1898_v40 }
 0x203   : > { %2470 = vst [vmem:[%s3355_s6 + $0x80] sm:$0xff] %v2453_v43  }
 0x204 PF: > { %s13_s14 = sadd.s32 1, %s2914_s14   ;;  %s3450_s12 = smov %s2910_s13 }
 0x205   : > { %p10_p5 = scmp.ge.s32.totalorder %s13_s14, 4   ;;  %s3451_s13 = smov %s3453_s15 }
 0x207   :  { %12 = sbr.rel (!%p10_p5) target bundleno = 2 (0x2), region = 71 }

// kernel: p2disc_forward.6
= control target key start
LH: loop header
LB: loop body
LE: loop exit
PB: predicated region body
PF: predicated region fallthrough
CT: control target
= control target key end

     0   :  { %s1334_s12 = smov 0   ;;  %s1336_s13 = smov 0   ;;  %s1529_s0 = inlined_call_operand.vmem [shape: bf16[2,90,32], index: 0, kind: input, shape index: {}]   ;;  %s1530_s1 = inlined_call_operand.vmem [shape: bf16[4,32,128], index: 1, kind: input, shape index: {}]   ;;  %s1531_s2 = inlined_call_operand.vmem [shape: f32[1,128], index: 2, kind: input, shape index: {}]   ;;  %s1532_s3 = inlined_call_operand.vmem [shape: bf16[2,72,128], index: 3, kind: output, shape index: {}]  }
   0x1   :  { %s1338_s14 = smov 0  }
   0x2 LB: > { %s22_s15 = sadd.s32 1, %s1306_s13  ;;  %p1017_p0 = scmp.ge.s32.totalorder %s1310_s14, 1  ;;  %s1310_s14 = sphi %s1338_s14, %s13_s14   ;;  %s1306_s13 = sphi %s1336_s13, %s1534_s13   ;;  %s1302_s12 = sphi %s1334_s12, %s1533_s12  }
   0x3   : > { %p23_p1 = scmp.ge.s32.totalorder %s22_s15, 2  ;;  %p168_p2 = scmp.lt.s32.totalorder %s1310_s14, 3 }
   0x5   : > { %s1536_s15 = smov (%p23_p1, %s22_s15), 0  ;;  %p169_p3 = pnand %p1017_p0, %p168_p2 }
   0x6   : > { %v1268_v0 = vld [vmem:[%s1530_s1 + $0x10] sm:$0xff] (!%p169_p3)   ;;  %v1312_v1 = vmov (!%p169_p3), 0.0   ;;  %v1269_v2 = vld [vmem:[%s1530_s1] sm:$0xff] (!%p169_p3)   ;;  %v1270_v3 = vld [vmem:[%s1530_s1 + $0x18] sm:$0xff] (!%p169_p3)   ;;  %vm1313_vm0 = vmmov (!%p169_p3), 0   ;;  %p202_p4 = scmp.lt.s32.totalorder (!%p169_p3), %s1302_s12, 1 }
   0x7   : > { %172 = sbr.rel (%p169_p3) target bundleno = 322 (0x142), region = 32  ;;  %1144 = vmatprep.subr.bf16.mxu0 (!%p169_p3), %v1312_v1  ;;  %1168 = vmatprep.subr.bf16.mxu1 (!%p169_p3), %v1312_v1  ;;  %v1271_v4 = vld [vmem:[%s1530_s1 + $0x8] sm:$0xff] (!%p169_p3)   ;;  %vm319_vm1 = vcmask (!%p169_p3), 261120   ;;  %v1275_v5 = vld [vmem:[%s1530_s1 + $0x30] sm:$0xff] (!%p169_p3)   ;;  %v1279_v12 = vld [vmem:[%s1530_s1 + $0x38] sm:$0xff] (!%p169_p3)   ;;  %vm699_vm3 = vcmask (!%p169_p3), 1046528  }
   0x8   : > { %1145 = vmatpush3.bf16.msra.mxu0 (!%p169_p3), %v1268_v0  ;;  %1172 = vmatprep.mubr.msk.bf16.mxu1 (!%p169_p3), %vm1313_vm0, %v1312_v1  ;;  %vm267_vm2 = vsmask.f32 (!%p169_p3), 7424  ;;  %v1274_v16 = vld [vmem:[%s1530_s1 + $0x20] sm:$0xff] (!%p169_p3)   ;;  %v1278_v23 = vld [vmem:[%s1530_s1 + $0x28] sm:$0xff] (!%p169_p3)  }
   0x9   : > { %1169 = vmatpush3.bf16.msra.mxu1 (!%p169_p3), %v1269_v2  ;;  %1146 = vmatprep.subr.bf16.mxu0 (!%p169_p3), %v1312_v1 }
   0xa   : > { %1170 = vmatprep.subr.bf16.mxu1 (!%p169_p3), %v1312_v1  ;;  %1148 = vmatprep.mubr.msk.bf16.mxu0 (!%p169_p3), %vm1313_vm0, %v1312_v1 }
   0xc   : > { %1147 = vmatpush3.bf16.msra.mxu0 (!%p169_p3), %v1270_v3 }
   0xd   : > { %1171 = vmatpush3.bf16.msra.mxu1 (!%p169_p3), %v1271_v4  ;;  %1192 = vmatprep.subr.bf16.mxu0 (!%p169_p3), %v1312_v1 }
   0xe   : > { %s1538_s12 = smov (!%p202_p4, %s1302_s12), 1  ;;  %1216 = vmatprep.subr.bf16.mxu1 %v1312_v1 }
   0xf   : > { %s1240_s24 = smul.u32 48, %s1538_s12 }
  0x10   : > { %s1241_s11 = smul.u32 36, %s1538_s12 }
  0x11   : > { %s1379_s27 = scalar_lea.vmem %s1529_s0, %s1240_s24 }
  0x12   : > { %v1272_v6 = vld [vmem:[%s1379_s27] sm:$0xff]   ;;  %v1273_v7 = vld [vmem:[%s1379_s27 + $0x8] sm:$0xff]   ;;  %v1276_v11 = vld [vmem:[%s1379_s27 + $0x10] sm:$0xff]   ;;  %s1500_s18 = scalar_lea.vmem %s1532_s3, %s1241_s11 }
  0x13   : > { %1173 = vmatmul.mubr.msk.bf16.vlgmr.msra.gmra.mrb[0].mxu1 %vm319_vm1, %v1272_v6  ;;  %v269_v8 = vshrl.u32 %v1272_v6, 16  ;;  %v271_v9 = vshll.u32 %v1272_v6, 16  ;;  %v276_v10 = vshll.u32 %v1273_v7, 16  ;;  %v280_v17 = vshrl.u32 %v1273_v7, 16  ;;  %v1277_v22 = vld [vmem:[%s1379_s27 + $0x18] sm:$0xff]   ;;  %v1283_v43 = vld [vmem:[%s1379_s27 + $0xc] sm:$0xff]  }
  0x14   : > { %1217 = vmatpush3.bf16.msra.mxu1 %v1275_v5  ;;  %1176 = vmatprep.mubr.msk.bf16.mxu1 %vm1313_vm0, %v1312_v1  ;;  %v284_v18 = vshll.u32 %v1276_v11, 16  ;;  %v288_v25 = vshrl.u32 %v1276_v11, 16  ;;  %v292_v26 = vshll.u32 %v1277_v22, 16  ;;  %v231_v27 = vld [vmem:[%s1379_s27 + $0x20] sm:$0xf]  ;;  %v296_v33 = vshrl.u32 %v1277_v22, 16 }
  0x15   : > { %v273_v13 = vrot.slane %v271_v9, 1  ;;  %1218 = vmatprep.subr.bf16.mxu1 %v1312_v1  ;;  %v278_v14 = vrot.slane %v276_v10, 1  ;;  %v236_v28 = vld [vmem:[%s1379_s27 + $0x24] sm:$0x1]  ;;  %v504_v38 = vld [vmem:[%s1379_s27 + $0x8] sm:$0xf]  ;;  %v1036_v42 = vcombine.low %v231_v27, %v231_v27 }
  0x16   : > { %v286_v21 = vrot.slane %v284_v18, 1  ;;  %v294_v30 = vrot.slane %v292_v26, 1  ;;  %v1028_v31 = vcombine.low %v231_v27, %v236_v28  ;;  %v503_v37 = vld [vmem:[%s1379_s27 + $0x4] sm:$0xf]  ;;  %v701_v48 = vrot.slane %v1283_v43, 1  ;;  %v1285_v54 = vld [vmem:[%s1379_s27 + $0x14] sm:$0xff]  }
  0x17   : > { %v274_v15 = vor.u32 %v273_v13, %v269_v8  ;;  %v282_v20 = vor.u32 %v280_v17, %v278_v14  ;;  %v690_v39 = vld [vmem:[%s1379_s27 + $0x4] sm:$0xe]  ;;  %v1048_v41 = vcombine.low %v503_v37, %v504_v38  ;;  %v551_v52 = vshll.u32 %v1283_v43, 16  ;;  %v1286_v62 = vld [vmem:[%s1379_s27 + $0x1c] sm:$0xff]  }
  0x18   : > { %1219 = vmatpush3.bf16.msra.mxu1 %v1279_v12  ;;  %v290_v29 = vor.u32 %v288_v25, %v286_v21  ;;  %v300_v34 = vshll.u32 %v1028_v31, 16  ;;  %v298_v35 = vor.u32 %v296_v33, %v294_v30  ;;  %v1064_v44 = vcombine.low %v690_v39, %v504_v38 }
  0x19   : > { %v279_v19 = vsel %vm267_vm2, %v274_v15, %v278_v14  ;;  %v287_v24 = vsel %vm267_vm2, %v282_v20, %v286_v21  ;;  %v304_v45 = vshrl.u32 %v1028_v31, 16  ;;  %v546_v46 = vshll.u32 %v1048_v41, 16 }
  0x1a   : > { %1149 = vmatmul.mubr.msk.bf16.vlgmr.msra.gmra.mrb[0].mxu0 %vm319_vm1, %v279_v19  ;;  %v295_v32 = vsel %vm267_vm2, %v290_v29, %v294_v30  ;;  %v302_v36 = vrot.slane %v300_v34, 1  ;;  %v700_v47 = vrot.slane %v1064_v44, 1  ;;  %v544_v50 = vshrl.u32 %v1048_v41, 16 }
  0x1b   : > { %1193 = vmatpush3.bf16.msra.mxu0 %v1274_v16  ;;  %1152 = vmatprep.mubr.msk.bf16.mxu0 %vm1313_vm0, %v1312_v1  ;;  %v548_v51 = vrot.slane %v546_v46, 1  ;;  %v553_v56 = vrot.slane %v551_v52, 1  ;;  %v703_v57 = vrot.slane %v1285_v54, 1  ;;  %v555_v59 = vshrl.u32 %v1283_v43, 16 }
  0x1c   : > { %1177 = vmatmul.mubr.msk.bf16.gmra.mrb[4].mxu1 %vm319_vm1, %v1273_v7  ;;  %1194 = vmatprep.subr.bf16.mxu0 %v1312_v1  ;;  %v303_v40 = vsel %vm267_vm2, %v298_v35, %v302_v36  ;;  %v306_v49 = vor.u32 %v304_v45, %v302_v36  ;;  %v702_v53 = vsel %vm699_vm3, %v700_v47, %v701_v48  ;;  %v559_v60 = vshll.u32 %v1285_v54, 16  ;;  %v1287_v7 = vld [vmem:[%s1379_s27 + $0x24] sm:$0x1f]  }
  0x1d   : > { %1180 = vmatprep.mubr.msk.bf16.mxu1 %vm1313_vm0, %v1312_v1  ;;  %v549_v55 = vor.u32 %v548_v51, %v544_v50  ;;  %v704_v61 = vsel %vm699_vm3, %v701_v48, %v703_v57  ;;  %v557_v63 = vor.u32 %v555_v59, %v553_v56  ;;  %v705_v2 = vrot.slane %v1286_v62, 1 }
  0x1e   : > { %v561_v0 = vrot.slane %v559_v60, 1  ;;  %v563_v4 = vshrl.u32 %v1285_v54, 16  ;;  %v567_v5 = vshll.u32 %v1286_v62, 16  ;;  %v707_v10 = vrot.slane %v1287_v7, 1 }
  0x1f   : > { %1195 = vmatpush3.bf16.msra.mxu0 %v1278_v23  ;;  %v554_v58 = vsel %vm267_vm2, %v549_v55, %v553_v56  ;;  %v706_v6 = vsel %vm699_vm3, %v703_v57, %v705_v2  ;;  %v571_v12 = vshrl.u32 %v1286_v62, 16  ;;  %v575_v13 = vshll.u32 %v1287_v7, 16 }
  0x20   : > { %v562_v3 = vsel %vm267_vm2, %v557_v63, %v561_v0  ;;  %v565_v8 = vor.u32 %v563_v4, %v561_v0  ;;  %v569_v9 = vrot.slane %v567_v5, 1  ;;  %v708_v14 = vsel %vm699_vm3, %v705_v2, %v707_v10 }
  0x21   : > { %v577_v16 = vrot.slane %v575_v13, 1  ;;  %v579_v18 = vshrl.u32 %v1287_v7, 16 }
  0x22   : > { %1153 = vmatmul.mubr.msk.bf16.gmra.mrb[4].mxu0 %vm319_vm1, %v287_v24  ;;  %v573_v15 = vor.u32 %v571_v12, %v569_v9  ;;  %v1492_v12 = vld [vmem:[%s1531_s2] ss:$0 sm:$0xff] }
  0x23   : > { %1156 = vmatprep.mubr.msk.bf16.mxu0 %vm1313_vm0, %v1312_v1  ;;  %v581_v19 = vor.u32 %v579_v18, %v577_v16 }
  0x24   : > { %1181 = vmatmul.mubr.msk.bf16.gmra.mrb[8].mxu1 %vm319_vm1, %v1276_v11  ;;  %v570_v11 = vsel %vm267_vm2, %v565_v8, %v569_v9  ;;  %v578_v17 = vsel %vm267_vm2, %v573_v15, %v577_v16 }
  0x25   : > { %1184 = vmatprep.mubr.msk.bf16.mxu1 %vm1313_vm0, %v1312_v1 }
  0x2a   : > { %1157 = vmatmul.mubr.msk.bf16.gmra.mrb[8].mxu0 %vm319_vm1, %v295_v32 }
  0x2b   : > { %1160 = vmatprep.mubr.msk.bf16.mxu0 %vm1313_vm0, %v1312_v1 }
  0x2c   : > { %1185 = vmatmul.mubr.msk.bf16.gmra.mrb[12].mxu1 %vm319_vm1, %v1277_v22 }
  0x2d   : > { %1188 = vmatprep.mubr.msk.bf16.mxu1 %vm1313_vm0, %v1312_v1 }
  0x32   : > { %1161 = vmatmul.mubr.msk.bf16.gmra.mrb[12].mxu0 %vm319_vm1, %v303_v40 }
  0x33   : > { %1164 = vmatprep.mubr.msk.bf16.mxu0 %vm1313_vm0, %v1312_v1 }
  0x34   : > { %1189 = vmatmul.mubr.msk.bf16.gmra.mrb[16].mxu1 %vm319_vm1, %v1036_v42 }
  0x35   : > { %1220 = vmatprep.mubr.msk.bf16.mxu1 %vm1313_vm0, %v1312_v1 }
  0x3a   : > { %1165 = vmatmul.mubr.msk.bf16.gmra.mrb[16].mxu0 %vm319_vm1, %v306_v49 }
  0x3b   : > { %1196 = vmatprep.mubr.msk.bf16.mxu0 %vm1313_vm0, %v1312_v1 }
  0x3c   : > { %1221 = vmatmul.mubr.msk.bf16.vlgmr.msra.gmra.mrb[20].mxu1 %vm319_vm1, %v702_v53 }
  0x3d   : > { %1224 = vmatprep.mubr.msk.bf16.mxu1 %vm1313_vm0, %v1312_v1 }
  0x42   : > { %1197 = vmatmul.mubr.msk.bf16.vlgmr.msra.gmra.mrb[20].mxu0 %vm319_vm1, %v554_v58 }
  0x43   : > { %1200 = vmatprep.mubr.msk.bf16.mxu0 %vm1313_vm0, %v1312_v1 }
  0x44   : > { %1225 = vmatmul.mubr.msk.bf16.gmra.mrb[24].mxu1 %vm319_vm1, %v704_v61 }
  0x45   : > { %1228 = vmatprep.mubr.msk.bf16.mxu1 %vm1313_vm0, %v1312_v1 }
  0x4a   : > { %1201 = vmatmul.mubr.msk.bf16.gmra.mrb[24].mxu0 %vm319_vm1, %v562_v3 }
  0x4b   : > { %1204 = vmatprep.mubr.msk.bf16.mxu0 %vm1313_vm0, %v1312_v1 }
  0x4c   : > { %1229 = vmatmul.mubr.msk.bf16.gmra.mrb[28].mxu1 %vm319_vm1, %v706_v6 }
  0x4d   : > { %1232 = vmatprep.mubr.msk.bf16.mxu1 %vm1313_vm0, %v1312_v1 }
  0x52   : > { %1205 = vmatmul.mubr.msk.bf16.gmra.mrb[28].mxu0 %vm319_vm1, %v570_v11 }
  0x53   : > { %1208 = vmatprep.mubr.msk.bf16.mxu0 %vm1313_vm0, %v1312_v1 }
  0x54   : > { %1233 = vmatmul.mubr.msk.bf16.gmra.mrb[32].mxu1 %vm319_vm1, %v708_v14 }
  0x55   : > { %1236 = vmatprep.mubr.msk.bf16.mxu1 %vm1313_vm0, %v1312_v1 }
  0x5a   : > { %1209 = vmatmul.mubr.msk.bf16.gmra.mrb[32].mxu0 %vm319_vm1, %v578_v17 }
  0x5b   : > { %1212 = vmatprep.mubr.msk.bf16.mxu0 %vm1313_vm0, %v1312_v1 }
  0x5c   : > { %1237 = vmatmul.mubr.msk.bf16.gmra.mrb[36].mxu1 %vm319_vm1, %v707_v10 }
  0x62   : > { %1213 = vmatmul.mubr.msk.bf16.gmra.mrb[36].mxu0 %vm319_vm1, %v581_v19 }
  0xe6   : > { %v465_v20 = vpop.f32.mrb[0].mxu1 }
  0xe7   : > { %v1174_v21 = vpop.f32.mrb[1].mxu1 }
  0xe8   : > { %v468_v22 = vpop.f32.mrb[2].mxu1 }
  0xe9   : > { %v1175_v23 = vpop.f32.mrb[3].mxu1 }
  0xed   : > { %v369_v24 = vpop.f32.mrb[0].mxu0 }
  0xee   : > { %v466_v25 = vadd.f32 %v465_v20, %v369_v24  ;;  %v1150_v26 = vpop.f32.mrb[1].mxu0 }
  0xef   : > { %v372_v27 = vpop.f32.mrb[2].mxu0  ;;  %v473_v28 = vpop.f32.mrb[4].mxu1 }
  0xf0   : > { %v469_v29 = vadd.f32 %v468_v22, %v372_v27  ;;  %v1151_v30 = vpop.f32.mrb[3].mxu0  ;;  %v1178_v31 = vpop.f32.mrb[5].mxu1 }
  0xf1   : > { %v476_v32 = vpop.f32.mrb[6].mxu1 }
  0xf2   : > { %v1179_v33 = vpop.f32.mrb[7].mxu1 }
  0xf5   : > { %v377_v1 = vpop.f32.mrb[4].mxu0 }
  0xf6   : > { %v474_v34 = vadd.f32 %v473_v28, %v377_v1  ;;  %v1154_v35 = vpop.f32.mrb[5].mxu0 }
  0xf7   : > { %v380_v36 = vpop.f32.mrb[6].mxu0  ;;  %v481_v37 = vpop.f32.mrb[8].mxu1 }
  0xf8   : > { %v1477_v38 = vadd.f32 %v476_v32, %v380_v36  ;;  %v1155_v39 = vpop.f32.mrb[7].mxu0  ;;  %v1182_v40 = vpop.f32.mrb[9].mxu1 }
  0xf9   : > { %v484_v41 = vpop.f32.mrb[10].mxu1 }
  0xfa   : > { %v1183_v42 = vpop.f32.mrb[11].mxu1 }
  0xfd   : > { %v385_v43 = vpop.f32.mrb[8].mxu0 }
  0xfe   : > { %v1479_v44 = vadd.f32 %v481_v37, %v385_v43  ;;  %v1158_v45 = vpop.f32.mrb[9].mxu0 }
  0xff   : > { %v388_v46 = vpop.f32.mrb[10].mxu0  ;;  %v489_v47 = vpop.f32.mrb[12].mxu1 }
 0x100   : > { %v1481_v48 = vadd.f32 %v484_v41, %v388_v46  ;;  %v1159_v49 = vpop.f32.mrb[11].mxu0  ;;  %v1186_v50 = vpop.f32.mrb[13].mxu1 }
 0x101   : > { %v492_v51 = vpop.f32.mrb[14].mxu1 }
 0x102   : > { %v1187_v52 = vpop.f32.mrb[15].mxu1 }
 0x105   : > { %v393_v53 = vpop.f32.mrb[12].mxu0 }
 0x106   : > { %v1483_v54 = vadd.f32 %v489_v47, %v393_v53  ;;  %v1162_v55 = vpop.f32.mrb[13].mxu0 }
 0x107   : > { %v396_v56 = vpop.f32.mrb[14].mxu0  ;;  %v497_v57 = vpop.f32.mrb[16].mxu1 }
 0x108   : > { %v1485_v58 = vadd.f32 %v492_v51, %v396_v56  ;;  %v1163_v59 = vpop.f32.mrb[15].mxu0  ;;  %v1190_v60 = vpop.f32.mrb[17].mxu1 }
 0x109   : > { %v500_v61 = vpop.f32.mrb[18].mxu1 }
 0x10a   : > { %v1191_v62 = vpop.f32.mrb[19].mxu1 }
 0x10d   : > { %v401_v63 = vpop.f32.mrb[16].mxu0 }
 0x10e   : > { %v1487_v0 = vadd.f32 %v497_v57, %v401_v63  ;;  %v1166_v2 = vpop.f32.mrb[17].mxu0 }
 0x10f   : > { %v404_v3 = vpop.f32.mrb[18].mxu0  ;;  %v770_v4 = vpop.f32.mrb[20].mxu1 }
 0x110   : > { %v1167_v5 = vpop.f32.mrb[19].mxu0  ;;  %v1222_v6 = vpop.f32.mrb[21].mxu1 }
 0x111   : > { %v773_v7 = vpop.f32.mrb[22].mxu1 }
 0x112   : > { %v1223_v8 = vpop.f32.mrb[23].mxu1 }
 0x115   : > { %v643_v9 = vpop.f32.mrb[20].mxu0 }
 0x116   : > { %v681_v10 = vadd.f32 %v643_v9, %v466_v25  ;;  %v1198_v11 = vpop.f32.mrb[21].mxu0 }
 0x117   : > { %v646_v13 = vpop.f32.mrb[22].mxu0  ;;  %v778_v14 = vpop.f32.mrb[24].mxu1 }
 0x118   : > { %v808_v15 = vadd.f32 %v770_v4, %v681_v10  ;;  %v682_v16 = vadd.f32 %v646_v13, %v469_v29  ;;  %v1199_v17 = vpop.f32.mrb[23].mxu0  ;;  %v1226_v18 = vpop.f32.mrb[25].mxu1 }
 0x119   : > { %v781_v19 = vpop.f32.mrb[26].mxu1 }
 0x11a   : > { %v824_v20 = vadd.f32 %v1492_v12, %v808_v15  ;;  %v809_v21 = vadd.f32 %v773_v7, %v682_v16  ;;  %v1227_v22 = vpop.f32.mrb[27].mxu1 }
 0x11c   : > { %v842_v23 = vmul.f32 0.2, %v824_v20  ;;  %v825_v24 = vadd.f32 %v1492_v12, %v809_v21  ;;  %vm833_vm4 = vcmp.ge.f32.partialorder %v824_v20, 0.0 }
 0x11d   : > { %v651_v25 = vpop.f32.mrb[24].mxu0 }
 0x11e   : > { %vm834_vm5 = vcmp.ge.f32.partialorder %v825_v24, 0.0  ;;  %v843_v26 = vmul.f32 0.2, %v825_v24  ;;  %v683_v27 = vadd.f32 %v651_v25, %v474_v34  ;;  %v1202_v28 = vpop.f32.mrb[25].mxu0  ;;  %v851_v29 = vsel %vm833_vm4, %v824_v20, %v842_v23 }
 0x11f   : > { %v654_v30 = vpop.f32.mrb[26].mxu0  ;;  %v786_v31 = vpop.f32.mrb[28].mxu1 }
 0x120   : > { %v852_v32 = vsel %vm834_vm5, %v825_v24, %v843_v26  ;;  %v810_v33 = vadd.f32 %v778_v14, %v683_v27  ;;  %v684_v1 = vadd.f32 %v654_v30, %v1477_v38  ;;  %v1203_v35 = vpop.f32.mrb[27].mxu0  ;;  %v1230_v36 = vpop.f32.mrb[29].mxu1 }
 0x121   : > { %v1096_v37 = vpack.c.bf16 %v852_v32, %v851_v29  ;;  %v789_v39 = vpop.f32.mrb[30].mxu1 }
 0x122   : > { %v826_v34 = vadd.f32 %v1492_v12, %v810_v33  ;;  %v811_v40 = vadd.f32 %v781_v19, %v684_v1  ;;  %v1231_v41 = vpop.f32.mrb[31].mxu1 }
 0x123   : > { %1097 = vst [vmem:[%s1500_s18] sm:$0xff] %v1096_v37  }
 0x124   : > { %v844_v42 = vmul.f32 0.2, %v826_v34  ;;  %v827_v43 = vadd.f32 %v1492_v12, %v811_v40  ;;  %vm835_vm6 = vcmp.ge.f32.partialorder %v826_v34, 0.0 }
 0x125   : > { %v659_v45 = vpop.f32.mrb[28].mxu0 }
 0x126   : > { %vm836_vm7 = vcmp.ge.f32.partialorder %v827_v43, 0.0  ;;  %v845_v46 = vmul.f32 0.2, %v827_v43  ;;  %v685_v47 = vadd.f32 %v659_v45, %v1479_v44  ;;  %v1206_v38 = vpop.f32.mrb[29].mxu0  ;;  %v853_v51 = vsel %vm835_vm6, %v826_v34, %v844_v42 }
 0x127   : > { %v662_v49 = vpop.f32.mrb[30].mxu0  ;;  %v794_v50 = vpop.f32.mrb[32].mxu1 }
 0x128   : > { %v854_v52 = vsel %vm836_vm7, %v827_v43, %v845_v46  ;;  %v812_v53 = vadd.f32 %v786_v31, %v685_v47  ;;  %v686_v55 = vadd.f32 %v662_v49, %v1481_v48  ;;  %v1207_v56 = vpop.f32.mrb[31].mxu0  ;;  %v1234_v57 = vpop.f32.mrb[33].mxu1 }
 0x129   : > { %v1101_v59 = vpack.c.bf16 %v854_v52, %v853_v51  ;;  %v797_v60 = vpop.f32.mrb[34].mxu1 }
 0x12a   : > { %v828_v61 = vadd.f32 %v1492_v12, %v812_v53  ;;  %v813_v62 = vadd.f32 %v789_v39, %v686_v55  ;;  %v1235_v63 = vpop.f32.mrb[35].mxu1 }
 0x12b   : > { %1113 = vst [vmem:[%s1500_s18 + $0x8] sm:$0xff] %v1101_v59  }
 0x12c   : > { %v846_v2 = vmul.f32 0.2, %v828_v61  ;;  %v829_v44 = vadd.f32 %v1492_v12, %v813_v62  ;;  %vm837_vm8 = vcmp.ge.f32.partialorder %v828_v61, 0.0 }
 0x12d   : > { %v667_v3 = vpop.f32.mrb[32].mxu0 }
 0x12e   : > { %vm838_vm9 = vcmp.ge.f32.partialorder %v829_v44, 0.0  ;;  %v847_v4 = vmul.f32 0.2, %v829_v44  ;;  %v687_v5 = vadd.f32 %v667_v3, %v1483_v54  ;;  %v1210_v48 = vpop.f32.mrb[33].mxu0  ;;  %v855_v8 = vsel %vm837_vm8, %v828_v61, %v846_v2 }
 0x12f   : > { %v670_v6 = vpop.f32.mrb[34].mxu0  ;;  %v802_v7 = vpop.f32.mrb[36].mxu1 }
 0x130   : > { %v856_v9 = vsel %vm838_vm9, %v829_v44, %v847_v4  ;;  %v814_v10 = vadd.f32 %v794_v50, %v687_v5  ;;  %v688_v11 = vadd.f32 %v670_v6, %v1485_v58  ;;  %v1211_v13 = vpop.f32.mrb[35].mxu0  ;;  %v1238_v14 = vpop.f32.mrb[37].mxu1 }
 0x131   : > { %v1106_v15 = vpack.c.bf16 %v856_v9, %v855_v8  ;;  %v805_v16 = vpop.f32.mrb[38].mxu1 }
 0x132   : > { %v830_v17 = vadd.f32 %v1492_v12, %v814_v10  ;;  %v815_v18 = vadd.f32 %v797_v60, %v688_v11  ;;  %v1239_v19 = vpop.f32.mrb[39].mxu1 }
 0x133   : > { %1114 = vst [vmem:[%s1500_s18 + $0x10] sm:$0xff] %v1106_v15  }
 0x134   : > { %v848_v20 = vmul.f32 0.2, %v830_v17  ;;  %v831_v54 = vadd.f32 %v1492_v12, %v815_v18  ;;  %vm839_vm10 = vcmp.ge.f32.partialorder %v830_v17, 0.0 }
 0x135   : > { %v675_v21 = vpop.f32.mrb[36].mxu0 }
 0x136   : > { %vm840_vm11 = vcmp.ge.f32.partialorder %v831_v54, 0.0  ;;  %v849_v22 = vmul.f32 0.2, %v831_v54  ;;  %v689_v58 = vadd.f32 %v675_v21, %v1487_v0  ;;  %v1214_v23 = vpop.f32.mrb[37].mxu0  ;;  %v857_v25 = vsel %vm839_vm10, %v830_v17, %v848_v20 }
 0x137   : > { %v678_v24 = vpop.f32.mrb[38].mxu0 }
 0x138   : > { %v858_v26 = vsel %vm840_vm11, %v831_v54, %v849_v22  ;;  %v816_v27 = vadd.f32 %v802_v7, %v689_v58  ;;  %v1215_v28 = vpop.f32.mrb[39].mxu0 }
 0x139   : > { %v1111_v30 = vpack.c.bf16 %v858_v26, %v857_v25 }
 0x13a   : > { %v832_v31 = vadd.f32 %v1492_v12, %v816_v27 }
 0x13b   : > { %1115 = vst [vmem:[%s1500_s18 + $0x18] sm:$0xff] %v1111_v30  }
 0x13c   : > { %vm841_vm12 = vcmp.ge.f32.partialorder %v832_v31, 0.0  ;;  %v850_v29 = vmul.f32 0.2, %v832_v31 }
 0x13e   : > { %v859_v32 = vsel %vm841_vm12, %v832_v31, %v850_v29 }
 0x13f   : > { %v1092_v33 = vpack.c.bf16 %v859_v32, %v859_v32 }
 0x141   : > { %905 = vst [vmem:[%s1500_s18 + $0x20] sm:$0xf] %v1092_v33 }
 0x142 PF: > { %s13_s14 = sadd.s32 1, %s1310_s14   ;;  %s1533_s12 = smov %s1306_s13 }
 0x143   : > { %p10_p5 = scmp.ge.s32.totalorder %s13_s14, 4   ;;  %s1534_s13 = smov %s1536_s15 }
 0x145   :  { %12 = sbr.rel (!%p10_p5) target bundleno = 2 (0x2), region = 71 }

// kernel: p2disc_forward.7
= control target key start
LH: loop header
LB: loop body
LE: loop exit
PB: predicated region body
PF: predicated region fallthrough
CT: control target
= control target key end

     0   :  { %s1029_s12 = smov 0   ;;  %s1031_s13 = smov 0   ;;  %s1136_s0 = inlined_call_operand.vmem [shape: bf16[2,30,64], index: 0, kind: input, shape index: {}]   ;;  %s1137_s1 = inlined_call_operand.vmem [shape: bf16[4,64,128], index: 1, kind: input, shape index: {}]   ;;  %s1138_s2 = inlined_call_operand.vmem [shape: f32[1,128], index: 2, kind: input, shape index: {}]   ;;  %s1139_s3 = inlined_call_operand.vmem [shape: bf16[2,20,128], index: 3, kind: output, shape index: {}]  }
   0x1   :  { %s1033_s14 = smov 0  }
   0x2 LB: > { %s22_s15 = sadd.s32 1, %s1003_s13  ;;  %p793_p0 = scmp.ge.s32.totalorder %s1007_s14, 1  ;;  %s1007_s14 = sphi %s1033_s14, %s13_s14   ;;  %s1003_s13 = sphi %s1031_s13, %s1141_s13   ;;  %s999_s12 = sphi %s1029_s12, %s1140_s12  }
   0x3   : > { %p23_p1 = scmp.ge.s32.totalorder %s22_s15, 2  ;;  %p168_p2 = scmp.lt.s32.totalorder %s1007_s14, 3 }
   0x5   : > { %s1143_s15 = smov (%p23_p1, %s22_s15), 0  ;;  %p169_p3 = pnand %p793_p0, %p168_p2 }
   0x6   : > { %v963_v0 = vld [vmem:[%s1137_s1 + $0x20] sm:$0xff] (!%p169_p3)   ;;  %p202_p4 = scmp.lt.s32.totalorder (!%p169_p3), %s999_s12, 1  ;;  %v965_v2 = vld [vmem:[%s1137_s1 + $0x28] sm:$0xff] (!%p169_p3)   ;;  %v967_v4 = vld [vmem:[%s1137_s1 + $0x30] sm:$0xff] (!%p169_p3)   ;;  %vm292_vm0 = vcmask (!%p169_p3), 523264   ;;  %vm562_vm2 = vcmask (!%p169_p3), 1044480  }
   0x7   : > { %172 = sbr.rel (%p169_p3) target bundleno = 269 (0x10d), region = 32  ;;  %v964_v1 = vld [vmem:[%s1137_s1] sm:$0xff] (!%p169_p3)   ;;  %890 = vmatprep.subr.bf16.mxu0 (!%p169_p3), %v963_v0  ;;  %v966_v3 = vld [vmem:[%s1137_s1 + $0x8] sm:$0xff] (!%p169_p3)   ;;  %v968_v5 = vld [vmem:[%s1137_s1 + $0x10] sm:$0xff] (!%p169_p3)   ;;  %vm252_vm1 = vsmask.f32 (!%p169_p3), 7424 }
   0x8   : > { %902 = vmatprep.subr.bf16.mxu1 (!%p169_p3), %v964_v1  ;;  %891 = vmatpush3.bf16.msra.mxu0 (!%p169_p3), %v963_v0  ;;  %v969_v6 = vld [vmem:[%s1137_s1 + $0x38] sm:$0xff] (!%p169_p3)   ;;  %v974_v10 = vld [vmem:[%s1137_s1 + $0x40] sm:$0xff] (!%p169_p3)   ;;  %v976_v21 = vld [vmem:[%s1137_s1 + $0x48] sm:$0xff] (!%p169_p3)   ;;  %vm450_vm3 = vsmask.f32 (!%p169_p3), 5376 }
   0x9   : > { %903 = vmatpush3.bf16.msra.mxu1 (!%p169_p3), %v964_v1  ;;  %892 = vmatprep.subr.bf16.mxu0 (!%p169_p3), %v965_v2  ;;  %v970_v7 = vld [vmem:[%s1137_s1 + $0x18] sm:$0xff] (!%p169_p3)   ;;  %v975_v18 = vld [vmem:[%s1137_s1 + $0x60] sm:$0xff] (!%p169_p3)   ;;  %v977_v23 = vld [vmem:[%s1137_s1 + $0x68] sm:$0xff] (!%p169_p3)  }
   0xa   : > { %904 = vmatprep.subr.bf16.mxu1 (!%p169_p3), %v966_v3  ;;  %v978_v28 = vld [vmem:[%s1137_s1 + $0x50] sm:$0xff] (!%p169_p3)   ;;  %v980_v41 = vld [vmem:[%s1137_s1 + $0x58] sm:$0xff] (!%p169_p3)   ;;  %v851_v0 = vld [vmem:[%s1138_s2] ss:$0 sm:$0xff] (!%p169_p3) }
   0xb   : > { %v979_v29 = vld [vmem:[%s1137_s1 + $0x70] sm:$0xff] (!%p169_p3)   ;;  %v981_v42 = vld [vmem:[%s1137_s1 + $0x78] sm:$0xff] (!%p169_p3)  }
   0xc   : > { %893 = vmatpush3.bf16.msra.mxu0 (!%p169_p3), %v965_v2 }
   0xd   : > { %905 = vmatpush3.bf16.msra.mxu1 (!%p169_p3), %v966_v3  ;;  %894 = vmatprep.subr.bf16.mxu0 (!%p169_p3), %v967_v4 }
   0xe   : > { %s1145_s12 = smov (!%p202_p4, %s999_s12), 1  ;;  %906 = vmatprep.subr.bf16.mxu1 %v968_v5 }
   0xf   : > { %s857_s26 = sshll.u32 %s1145_s12, 4 }
  0x10   : > { %s1071_s4 = scalar_lea.vmem %s1136_s0, %s857_s26  ;;  %895 = vmatpush3.bf16.msra.mxu0 %v967_v4 }
  0x11   : > { %v971_v8 = vld [vmem:[%s1071_s4] sm:$0xff]   ;;  %v972_v9 = vld [vmem:[%s1071_s4 + $0x8] ss:$0 sps:$4 sm:$0x77]   ;;  %907 = vmatpush3.bf16.msra.mxu1 %v968_v5  ;;  %896 = vmatprep.subr.bf16.mxu0 %v969_v6 }
  0x12   : > { %v254_v11 = vshrl.u32 %v971_v8, 16  ;;  %v256_v12 = vshll.u32 %v971_v8, 16  ;;  %v261_v13 = vshll.u32 %v972_v9, 16  ;;  %v265_v14 = vshrl.u32 %v972_v9, 16  ;;  %910 = vmatprep.mubr.msk.bf16.mxu1 %vm292_vm0, %v971_v8  ;;  %908 = vmatprep.subr.bf16.mxu1 %v970_v7  ;;  %v427_v24 = vld [vmem:[%s1071_s4] sm:$0xc] }
  0x13   : > { %v973_v17 = vld [vmem:[%s1071_s4 + $0x8] ss:$0 sps:$4 sm:$0x33]   ;;  %v428_v25 = vld [vmem:[%s1071_s4 + $0x4] sm:$0xf] }
  0x14   : > { %v258_v15 = vrot.slane %v256_v12, 1  ;;  %v263_v16 = vrot.slane %v261_v13, 1  ;;  %897 = vmatpush3.bf16.msra.mxu0 %v969_v6  ;;  %v828_v26 = vcombine.low %v427_v24, %v428_v25  ;;  %v983_v27 = vld [vmem:[%s1071_s4 + $0x8] sm:$0x1f]   ;;  %v549_v30 = vld [vmem:[%s1071_s4] sm:$0x8] }
  0x15   : > { %909 = vmatpush3.bf16.msra.mxu1 %v970_v7  ;;  %914 = vmatprep.subr.bf16.mxu0 %v974_v10  ;;  %v460_v33 = vshrl.u32 %v983_v27, 16  ;;  %v463_v34 = vshll.u32 %v983_v27, 16  ;;  %v844_v35 = vcombine.low %v549_v30, %v428_v25  ;;  %v564_v36 = vrot.slane %v983_v27, 3  ;;  %s938_s4 = smul.u32 12, %s1145_s12 }
  0x16   : > { %v259_v19 = vor.u32 %v258_v15, %v254_v11  ;;  %v267_v20 = vor.u32 %v265_v14, %v263_v16  ;;  %926 = vmatprep.subr.bf16.mxu1 %v975_v18  ;;  %v452_v31 = vshrl.u32 %v828_v26, 16  ;;  %v455_v32 = vshll.u32 %v828_v26, 16 }
  0x17   : > { %v462_v39 = vrot.slane %v460_v33, 2  ;;  %v465_v40 = vrot.slane %v463_v34, 3  ;;  %v563_v43 = vrot.slane %v844_v35, 3  ;;  %s221_s7 = scalar_lea.vmem %s1139_s3, %s938_s4 }
  0x18   : > { %v264_v22 = vsel %vm252_vm1, %v259_v19, %v263_v16  ;;  %911 = vmatmul.mubr.msk.bf16.vlgmr.msra.gmra.mrb[0].mxu1 %vm292_vm0, %v973_v17  ;;  %v454_v37 = vrot.slane %v452_v31, 2  ;;  %v457_v38 = vrot.slane %v455_v32, 3 }
  0x19   : > { %898 = vmatprep.mubr.msk.bf16.mxu0 %vm292_vm0, %v264_v22  ;;  %927 = vmatpush3.bf16.msra.mxu1 %v975_v18  ;;  %v466_v45 = vor.u32 %v465_v40, %v462_v39  ;;  %v565_v46 = vsel %vm562_vm2, %v563_v43, %v564_v36 }
  0x1a   : > { %899 = vmatmul.mubr.msk.bf16.vlgmr.msra.gmra.mrb[0].mxu0 %vm292_vm0, %v267_v20  ;;  %928 = vmatprep.subr.bf16.mxu1 %v977_v23  ;;  %v458_v44 = vor.u32 %v457_v38, %v454_v37 }
  0x1b   : > { %915 = vmatpush3.bf16.msra.mxu0 %v974_v10  ;;  %934 = vmatprep.mubr.msk.bf16.mxu1 %vm292_vm0, %v565_v46 }
  0x1c   : > { %916 = vmatprep.subr.bf16.mxu0 %v976_v21  ;;  %v467_v47 = vsel %vm450_vm3, %v458_v44, %v466_v45 }
  0x1d   : > { %929 = vmatpush3.bf16.msra.mxu1 %v977_v23  ;;  %922 = vmatprep.mubr.msk.bf16.mxu0 %vm292_vm0, %v467_v47 }
  0x1e   : > { %930 = vmatprep.subr.bf16.mxu1 %v979_v29 }
  0x1f   : > { %917 = vmatpush3.bf16.msra.mxu0 %v976_v21 }
  0x20   : > { %918 = vmatprep.subr.bf16.mxu0 %v978_v28 }
  0x21   : > { %931 = vmatpush3.bf16.msra.mxu1 %v979_v29 }
  0x22   : > { %932 = vmatprep.subr.bf16.mxu1 %v981_v42 }
  0x23   : > { %919 = vmatpush3.bf16.msra.mxu0 %v978_v28 }
  0x24   : > { %920 = vmatprep.subr.bf16.mxu0 %v980_v41 }
  0x25   : > { %933 = vmatpush3.bf16.msra.mxu1 %v981_v42 }
  0x27   : > { %921 = vmatpush3.bf16.msra.mxu0 %v980_v41 }
  0x28   : > { %935 = vmatmul.mubr.msk.bf16.vlgmr.msra.gmra.mrb[4].mxu1 %vm292_vm0, %v564_v36 }
  0x2a   : > { %923 = vmatmul.mubr.msk.bf16.vlgmr.msra.gmra.mrb[4].mxu0 %vm292_vm0, %v466_v45 }
  0xeb   : > { %v912_v49 = vpop.f32.mrb[0].mxu1 }
  0xec   : > { %v413_v52 = vpop.f32.mrb[1].mxu1 }
  0xed   : > { %v900_v48 = vpop.f32.mrb[0].mxu0  ;;  %v913_v55 = vpop.f32.mrb[2].mxu1 }
  0xee   : > { %v422_v50 = vadd.f32 %v912_v49, %v900_v48  ;;  %v333_v51 = vpop.f32.mrb[1].mxu0  ;;  %v416_v57 = vpop.f32.mrb[3].mxu1 }
  0xef   : > { %v414_v53 = vadd.f32 %v413_v52, %v333_v51  ;;  %v901_v54 = vpop.f32.mrb[2].mxu0 }
  0xf0   : > { %v336_v56 = vpop.f32.mrb[3].mxu0 }
  0xf1   : > { %v417_v58 = vadd.f32 %v416_v57, %v336_v56 }
  0xfb   : > { %v936_v60 = vpop.f32.mrb[4].mxu1 }
  0xfc   : > { %v630_v63 = vpop.f32.mrb[5].mxu1 }
  0xfd   : > { %v924_v59 = vpop.f32.mrb[4].mxu0  ;;  %v937_v3 = vpop.f32.mrb[6].mxu1 }
  0xfe   : > { %v548_v61 = vadd.f32 %v924_v59, %v422_v50  ;;  %v532_v62 = vpop.f32.mrb[5].mxu0  ;;  %v633_v6 = vpop.f32.mrb[7].mxu1 }
  0xff   : > { %v546_v1 = vadd.f32 %v532_v62, %v414_v53  ;;  %v925_v2 = vpop.f32.mrb[6].mxu0 }
 0x100   : > { %v646_v4 = vadd.f32 %v936_v60, %v548_v61  ;;  %v535_v5 = vpop.f32.mrb[7].mxu0 }
 0x101   : > { %v644_v7 = vadd.f32 %v630_v63, %v546_v1  ;;  %v547_v8 = vadd.f32 %v535_v5, %v417_v58 }
 0x102   : > { %v656_v9 = vadd.f32 %v851_v0, %v646_v4 }
 0x103   : > { %v654_v10 = vadd.f32 %v851_v0, %v644_v7  ;;  %v645_v11 = vadd.f32 %v633_v6, %v547_v8 }
 0x104   : > { %vm659_vm4 = vcmp.ge.f32.partialorder %v656_v9, 0.0  ;;  %v662_v12 = vmul.f32 0.2, %v656_v9 }
 0x105   : > { %v660_v13 = vmul.f32 0.2, %v654_v10  ;;  %v655_v14 = vadd.f32 %v851_v0, %v645_v11  ;;  %vm657_vm5 = vcmp.ge.f32.partialorder %v654_v10, 0.0 }
 0x106   : > { %v665_v15 = vsel %vm659_vm4, %v656_v9, %v662_v12 }
 0x107   : > { %v860_v16 = vpack.c.bf16 %v665_v15, %v665_v15  ;;  %vm658_vm6 = vcmp.ge.f32.partialorder %v655_v14, 0.0  ;;  %v661_v17 = vmul.f32 0.2, %v655_v14  ;;  %v663_v18 = vsel %vm657_vm5, %v654_v10, %v660_v13 }
 0x109   : > { %681 = vst [vmem:[%s221_s7 + $0x8] sm:$0x3] %v860_v16  ;;  %v664_v19 = vsel %vm658_vm6, %v655_v14, %v661_v17 }
 0x10a   : > { %v864_v20 = vpack.c.bf16 %v664_v19, %v663_v18 }
 0x10c   : > { %865 = vst [vmem:[%s221_s7] sm:$0xff] %v864_v20  }
 0x10d PF: > { %s13_s14 = sadd.s32 1, %s1007_s14   ;;  %s1140_s12 = smov %s1003_s13 }
 0x10e   : > { %p10_p5 = scmp.ge.s32.totalorder %s13_s14, 4   ;;  %s1141_s13 = smov %s1143_s15 }
 0x110   :  { %12 = sbr.rel (!%p10_p5) target bundleno = 2 (0x2), region = 71 }

// kernel: p2disc_forward.8
= control target key start
LH: loop header
LB: loop body
LE: loop exit
PB: predicated region body
PF: predicated region fallthrough
CT: control target
= control target key end

     0   :  { %s1109_s12 = smov 0   ;;  %s1111_s13 = smov 0   ;;  %s1296_s0 = inlined_call_operand.vmem [shape: bf16[2,12,128], index: 0, kind: input, shape index: {}]   ;;  %s1297_s1 = inlined_call_operand.vmem [shape: bf16[4,128,128], index: 1, kind: input, shape index: {}]   ;;  %s1298_s2 = inlined_call_operand.vmem [shape: f32[1,128], index: 2, kind: input, shape index: {}]   ;;  %s1299_s3 = inlined_call_operand.vmem [shape: bf16[2,6,128], index: 3, kind: output, shape index: {}]  }
   0x1   :  { %s1113_s14 = smov 0  }
   0x2 LB: > { %s22_s15 = sadd.s32 1, %s1081_s13  ;;  %p795_p0 = scmp.ge.s32.totalorder %s1085_s14, 1  ;;  %s1085_s14 = sphi %s1113_s14, %s13_s14   ;;  %s1081_s13 = sphi %s1111_s13, %s1301_s13   ;;  %s1077_s12 = sphi %s1109_s12, %s1300_s12  }
   0x3   : > { %p23_p1 = scmp.ge.s32.totalorder %s22_s15, 2  ;;  %p168_p2 = scmp.lt.s32.totalorder %s1085_s14, 3 }
   0x5   : > { %s1303_s15 = smov (%p23_p1, %s22_s15), 0  ;;  %p169_p3 = pnand %p795_p0, %p168_p2 }
   0x6   : > { %v1028_v0 = vld [vmem:[%s1297_s1 + $0x40] sm:$0xff] (!%p169_p3)   ;;  %v1087_v1 = vmov (!%p169_p3), 0.0   ;;  %v1030_v3 = vld [vmem:[%s1297_s1 + $0x48] sm:$0xff] (!%p169_p3)   ;;  %vm1088_vm0 = vmmov (!%p169_p3), 0   ;;  %p201_p4 = scmp.lt.s32.totalorder (!%p169_p3), %s1077_s12, 1  ;;  %v1032_v5 = vld [vmem:[%s1297_s1 + $0x50] sm:$0xff] (!%p169_p3)  }
   0x7   : > { %172 = sbr.rel (%p169_p3) target bundleno = 295 (0x127), region = 32  ;;  %922 = vmatprep.subr.bf16.mxu0 (!%p169_p3), %v1087_v1  ;;  %942 = vmatprep.subr.bf16.mxu1 (!%p169_p3), %v1087_v1  ;;  %v1029_v2 = vld [vmem:[%s1297_s1] sm:$0xff] (!%p169_p3)   ;;  %v1031_v4 = vld [vmem:[%s1297_s1 + $0x8] sm:$0xff] (!%p169_p3)   ;;  %v1033_v6 = vld [vmem:[%s1297_s1 + $0x10] sm:$0xff] (!%p169_p3)  }
   0x8   : > { %923 = vmatpush3.bf16.msra.mxu0 (!%p169_p3), %v1028_v0  ;;  %938 = vmatprep.mubr.msk.bf16.mxu0 (!%p169_p3), %vm1088_vm0, %v1087_v1  ;;  %v1034_v7 = vld [vmem:[%s1297_s1 + $0x58] sm:$0xff] (!%p169_p3)   ;;  %v1036_v9 = vld [vmem:[%s1297_s1 + $0x60] sm:$0xff] (!%p169_p3)   ;;  %v1038_v12 = vld [vmem:[%s1297_s1 + $0x68] sm:$0xff] (!%p169_p3)  }
   0x9   : > { %943 = vmatpush3.bf16.msra.mxu1 (!%p169_p3), %v1029_v2  ;;  %924 = vmatprep.subr.bf16.mxu0 (!%p169_p3), %v1087_v1  ;;  %v1035_v8 = vld [vmem:[%s1297_s1 + $0x18] sm:$0xff] (!%p169_p3)   ;;  %v1037_v10 = vld [vmem:[%s1297_s1 + $0x20] sm:$0xff] (!%p169_p3)   ;;  %v1039_v13 = vld [vmem:[%s1297_s1 + $0x28] sm:$0xff] (!%p169_p3)  }
   0xa   : > { %944 = vmatprep.subr.bf16.mxu1 (!%p169_p3), %v1087_v1  ;;  %958 = vmatprep.mubr.msk.bf16.mxu1 (!%p169_p3), %vm1088_vm0, %v1087_v1  ;;  %v1040_v15 = vld [vmem:[%s1297_s1 + $0x70] sm:$0xff] (!%p169_p3)   ;;  %v1042_v19 = vld [vmem:[%s1297_s1 + $0x78] sm:$0xff] (!%p169_p3)   ;;  %v1045_v23 = vld [vmem:[%s1297_s1 + $0x80] sm:$0xff] (!%p169_p3)  }
   0xb   : > { %v1041_v16 = vld [vmem:[%s1297_s1 + $0x30] sm:$0xff] (!%p169_p3)   ;;  %v1043_v20 = vld [vmem:[%s1297_s1 + $0x38] sm:$0xff] (!%p169_p3)   ;;  %v1046_v24 = vld [vmem:[%s1297_s1 + $0xc0] sm:$0xff] (!%p169_p3)  }
   0xc   : > { %925 = vmatpush3.bf16.msra.mxu0 (!%p169_p3), %v1030_v3  ;;  %v1047_v25 = vld [vmem:[%s1297_s1 + $0x88] sm:$0xff] (!%p169_p3)   ;;  %v1049_v27 = vld [vmem:[%s1297_s1 + $0x90] sm:$0xff] (!%p169_p3)   ;;  %v1051_v29 = vld [vmem:[%s1297_s1 + $0x98] sm:$0xff] (!%p169_p3)  }
   0xd   : > { %945 = vmatpush3.bf16.msra.mxu1 (!%p169_p3), %v1031_v4  ;;  %926 = vmatprep.subr.bf16.mxu0 (!%p169_p3), %v1087_v1  ;;  %v1048_v26 = vld [vmem:[%s1297_s1 + $0xc8] sm:$0xff] (!%p169_p3)   ;;  %v1050_v28 = vld [vmem:[%s1297_s1 + $0xd0] sm:$0xff] (!%p169_p3)   ;;  %v1052_v30 = vld [vmem:[%s1297_s1 + $0xd8] sm:$0xff] (!%p169_p3)  }
   0xe   : > { %s1305_s12 = smov (!%p201_p4, %s1077_s12), 1  ;;  %946 = vmatprep.subr.bf16.mxu1 %v1087_v1  ;;  %v1053_v31 = vld [vmem:[%s1297_s1 + $0xa0] sm:$0xff]   ;;  %v1055_v36 = vld [vmem:[%s1297_s1 + $0xa8] sm:$0xff]   ;;  %v1057_v40 = vld [vmem:[%s1297_s1 + $0xb0] sm:$0xff]  }
   0xf   : > { %s885_s5 = sshll.u32 %s1305_s12, 3  ;;  %v1054_v34 = vld [vmem:[%s1297_s1 + $0xe0] sm:$0xff]   ;;  %v1056_v37 = vld [vmem:[%s1297_s1 + $0xe8] sm:$0xff]   ;;  %v1058_v41 = vld [vmem:[%s1297_s1 + $0xf0] sm:$0xff]   ;;  %s798_s18 = sshll.u32 %s1305_s12, 2 }
  0x10   : > { %927 = vmatpush3.bf16.msra.mxu0 %v1032_v5  ;;  %s1176_s10 = scalar_lea.vmem %s1296_s0, %s885_s5  ;;  %v1059_v45 = vld [vmem:[%s1297_s1 + $0xb8] sm:$0xff]   ;;  %v882_v63 = vld [vmem:[%s1298_s2] ss:$0 sm:$0xff]  ;;  %s219_s21 = scalar_lea.vmem %s1299_s3, %s798_s18 }
  0x11   : > { %947 = vmatpush3.bf16.msra.mxu1 %v1033_v6  ;;  %928 = vmatprep.subr.bf16.mxu0 %v1087_v1  ;;  %v1044_v11 = vld [vmem:[%s1176_s10] ss:$0 sps:$4 sm:$0xff]   ;;  %v443_v32 = vld [vmem:[%s1176_s10] sm:$0xe]  ;;  %v444_v33 = vld [vmem:[%s1176_s10 + $0x4] sm:$0x1] }
  0x12   : > { %948 = vmatprep.subr.bf16.mxu1 %v1087_v1  ;;  %v262_v14 = vshll.u32 %v1044_v11, 16  ;;  %v260_v17 = vshrl.u32 %v1044_v11, 16  ;;  %v221_v22 = vld [vmem:[%s1176_s10] sm:$0x7]  ;;  %v848_v35 = vcombine.low %v443_v32, %v444_v33  ;;  %v1060_v47 = vld [vmem:[%s1297_s1 + $0xf8] sm:$0xff]  }
  0x13   : > { %v565_v42 = vld [vmem:[%s1176_s10] sm:$0xc] }
  0x14   : > { %929 = vmatpush3.bf16.msra.mxu0 %v1034_v7  ;;  %v264_v18 = vrot.slane %v262_v14, 1  ;;  %v468_v38 = vshrl.u32 %v848_v35, 16  ;;  %v471_v39 = vshll.u32 %v848_v35, 16  ;;  %v873_v46 = vcombine.low %v565_v42, %v444_v33 }
  0x15   : > { %949 = vmatpush3.bf16.msra.mxu1 %v1035_v8  ;;  %930 = vmatprep.subr.bf16.mxu0 %v1087_v1 }
  0x16   : > { %950 = vmatprep.subr.bf16.mxu1 %v1087_v1  ;;  %v265_v21 = vor.u32 %v264_v18, %v260_v17  ;;  %v470_v43 = vrot.slane %v468_v38, 1  ;;  %v473_v44 = vrot.slane %v471_v39, 2  ;;  %v586_v49 = vrot.slane %v873_v46, 2 }
  0x18   : > { %931 = vmatpush3.bf16.msra.mxu0 %v1036_v9  ;;  %v474_v48 = vor.u32 %v473_v44, %v470_v43 }
  0x19   : > { %951 = vmatpush3.bf16.msra.mxu1 %v1037_v10  ;;  %932 = vmatprep.subr.bf16.mxu0 %v1087_v1 }
  0x1a   : > { %952 = vmatprep.subr.bf16.mxu1 %v1087_v1 }
  0x1c   : > { %933 = vmatpush3.bf16.msra.mxu0 %v1038_v12 }
  0x1d   : > { %953 = vmatpush3.bf16.msra.mxu1 %v1039_v13  ;;  %934 = vmatprep.subr.bf16.mxu0 %v1087_v1 }
  0x1e   : > { %954 = vmatprep.subr.bf16.mxu1 %v1087_v1 }
  0x20   : > { %935 = vmatpush3.bf16.msra.mxu0 %v1040_v15 }
  0x21   : > { %955 = vmatpush3.bf16.msra.mxu1 %v1041_v16  ;;  %936 = vmatprep.subr.bf16.mxu0 %v1087_v1 }
  0x22   : > { %956 = vmatprep.subr.bf16.mxu1 %v1087_v1 }
  0x24   : > { %937 = vmatpush3.bf16.msra.mxu0 %v1042_v19 }
  0x25   : > { %957 = vmatpush3.bf16.msra.mxu1 %v1043_v20  ;;  %962 = vmatprep.subr.bf16.mxu0 %v1087_v1 }
  0x26   : > { %982 = vmatprep.subr.bf16.mxu1 %v1087_v1 }
  0x27   : > { %939 = vmatmul.mubr.bf16.vlgmr.msra.gmra.mrb[0].mxu0 %v265_v21 }
  0x28   : > { %959 = vmatmul.mubr.bf16.vlgmr.msra.gmra.mrb[0].mxu1 %v221_v22  ;;  %963 = vmatpush3.bf16.msra.mxu0 %v1045_v23 }
  0x29   : > { %983 = vmatpush3.bf16.msra.mxu1 %v1046_v24  ;;  %964 = vmatprep.subr.bf16.mxu0 %v1087_v1 }
  0x2a   : > { %984 = vmatprep.subr.bf16.mxu1 %v1087_v1  ;;  %978 = vmatprep.mubr.msk.bf16.mxu0 %vm1088_vm0, %v1087_v1 }
  0x2b   : > { %998 = vmatprep.mubr.msk.bf16.mxu1 %vm1088_vm0, %v1087_v1 }
  0x2c   : > { %965 = vmatpush3.bf16.msra.mxu0 %v1047_v25 }
  0x2d   : > { %985 = vmatpush3.bf16.msra.mxu1 %v1048_v26  ;;  %966 = vmatprep.subr.bf16.mxu0 %v1087_v1 }
  0x2e   : > { %986 = vmatprep.subr.bf16.mxu1 %v1087_v1 }
  0x30   : > { %967 = vmatpush3.bf16.msra.mxu0 %v1049_v27 }
  0x31   : > { %987 = vmatpush3.bf16.msra.mxu1 %v1050_v28  ;;  %968 = vmatprep.subr.bf16.mxu0 %v1087_v1 }
  0x32   : > { %988 = vmatprep.subr.bf16.mxu1 %v1087_v1 }
  0x34   : > { %969 = vmatpush3.bf16.msra.mxu0 %v1051_v29 }
  0x35   : > { %989 = vmatpush3.bf16.msra.mxu1 %v1052_v30  ;;  %970 = vmatprep.subr.bf16.mxu0 %v1087_v1 }
  0x36   : > { %990 = vmatprep.subr.bf16.mxu1 %v1087_v1 }
  0x38   : > { %971 = vmatpush3.bf16.msra.mxu0 %v1053_v31 }
  0x39   : > { %991 = vmatpush3.bf16.msra.mxu1 %v1054_v34  ;;  %972 = vmatprep.subr.bf16.mxu0 %v1087_v1 }
  0x3a   : > { %992 = vmatprep.subr.bf16.mxu1 %v1087_v1 }
  0x3c   : > { %973 = vmatpush3.bf16.msra.mxu0 %v1055_v36 }
  0x3d   : > { %993 = vmatpush3.bf16.msra.mxu1 %v1056_v37  ;;  %974 = vmatprep.subr.bf16.mxu0 %v1087_v1 }
  0x3e   : > { %994 = vmatprep.subr.bf16.mxu1 %v1087_v1 }
  0x40   : > { %975 = vmatpush3.bf16.msra.mxu0 %v1057_v40 }
  0x41   : > { %995 = vmatpush3.bf16.msra.mxu1 %v1058_v41  ;;  %976 = vmatprep.subr.bf16.mxu0 %v1087_v1 }
  0x42   : > { %996 = vmatprep.subr.bf16.mxu1 %v1087_v1 }
  0x44   : > { %977 = vmatpush3.bf16.msra.mxu0 %v1059_v45 }
  0x45   : > { %997 = vmatpush3.bf16.msra.mxu1 %v1060_v47 }
  0x47   : > { %979 = vmatmul.mubr.bf16.vlgmr.msra.gmra.mrb[4].mxu0 %v474_v48 }
  0x48   : > { %999 = vmatmul.mubr.bf16.vlgmr.msra.gmra.mrb[4].mxu1 %v586_v49 }
  0xfa   : > { %v349_v50 = vpop.f32.mrb[0].mxu0 }
  0xfb   : > { %v437_v51 = vpop.f32.mrb[0].mxu1  ;;  %v940_v52 = vpop.f32.mrb[1].mxu0 }
  0xfc   : > { %v438_v53 = vadd.f32 %v437_v51, %v349_v50  ;;  %v960_v54 = vpop.f32.mrb[1].mxu1  ;;  %v352_v55 = vpop.f32.mrb[2].mxu0 }
  0xfd   : > { %v440_v56 = vpop.f32.mrb[2].mxu1  ;;  %v941_v57 = vpop.f32.mrb[3].mxu0 }
  0xfe   : > { %v961_v58 = vpop.f32.mrb[3].mxu1 }
 0x11a   : > { %v558_v59 = vpop.f32.mrb[4].mxu0 }
 0x11b   : > { %v564_v60 = vadd.f32 %v558_v59, %v438_v53  ;;  %v670_v61 = vpop.f32.mrb[4].mxu1  ;;  %v980_v62 = vpop.f32.mrb[5].mxu0 }
 0x11c   : > { %v1000_v0 = vpop.f32.mrb[5].mxu1  ;;  %v561_v1 = vpop.f32.mrb[6].mxu0 }
 0x11d   : > { %v676_v2 = vadd.f32 %v670_v61, %v564_v60  ;;  %v673_v3 = vpop.f32.mrb[6].mxu1  ;;  %v981_v4 = vpop.f32.mrb[7].mxu0 }
 0x11e   : > { %v1001_v5 = vpop.f32.mrb[7].mxu1 }
 0x11f   : > { %v684_v6 = vadd.f32 %v882_v63, %v676_v2 }
 0x121   : > { %vm685_vm1 = vcmp.ge.f32.partialorder %v684_v6, 0.0  ;;  %v686_v7 = vmul.f32 0.2, %v684_v6 }
 0x123   : > { %v687_v8 = vsel %vm685_vm1, %v684_v6, %v686_v7 }
 0x124   : > { %v688_v9 = vpack.c.bf16 %v687_v8, %v687_v8 }
 0x126   : > { %689 = vst [vmem:[%s219_s21] sm:$0x7] %v688_v9 }
 0x127 PF: > { %s13_s14 = sadd.s32 1, %s1085_s14   ;;  %s1300_s12 = smov %s1081_s13 }
 0x128   : > { %p10_p5 = scmp.ge.s32.totalorder %s13_s14, 4   ;;  %s1301_s13 = smov %s1303_s15 }
 0x12a   :  { %12 = sbr.rel (!%p10_p5) target bundleno = 2 (0x2), region = 71 }

// kernel: p2disc_forward.9
= control target key start
LH: loop header
LB: loop body
LE: loop exit
PB: predicated region body
PF: predicated region fallthrough
CT: control target
= control target key end

     0   :  { %s1472_s12 = smov 0   ;;  %s1474_s13 = smov 0   ;;  %s1714_s0 = inlined_call_operand.vmem [shape: bf16[2,6,256], index: 0, kind: input, shape index: {}]   ;;  %s1715_s1 = inlined_call_operand.vmem [shape: bf16[4,256,128], index: 1, kind: input, shape index: {}]   ;;  %s1716_s2 = inlined_call_operand.vmem [shape: f32[1,128], index: 2, kind: input, shape index: {}]   ;;  %s1717_s3 = inlined_call_operand.vmem [shape: bf16[2,2,128], index: 3, kind: output, shape index: {}]  }
   0x1   :  { %s1476_s14 = smov 0  }
   0x2 LB: > { %s22_s15 = sadd.s32 1, %s1446_s13  ;;  %p1069_p0 = scmp.ge.s32.totalorder %s1450_s14, 1  ;;  %s1450_s14 = sphi %s1476_s14, %s13_s14   ;;  %s1446_s13 = sphi %s1474_s13, %s1719_s13   ;;  %s1442_s12 = sphi %s1472_s12, %s1718_s12  }
   0x3   : > { %p23_p1 = scmp.ge.s32.totalorder %s22_s15, 2  ;;  %p168_p2 = scmp.lt.s32.totalorder %s1450_s14, 3 }
   0x5   : > { %s1721_s15 = smov (%p23_p1, %s22_s15), 0  ;;  %p169_p3 = pnand %p1069_p0, %p168_p2 }
   0x6   : > { %v1356_v0 = vld [vmem:[%s1715_s1 + $0xc0] sm:$0xff] (!%p169_p3)   ;;  %v1360_v4 = vld [vmem:[%s1715_s1 + $0xc8] sm:$0xff] (!%p169_p3)   ;;  %v1364_v8 = vld [vmem:[%s1715_s1 + $0xd0] sm:$0xff] (!%p169_p3)   ;;  %p200_p4 = scmp.lt.s32.totalorder (!%p169_p3), %s1442_s12, 1 }
   0x7   : > { %172 = sbr.rel (%p169_p3) target bundleno = 296 (0x128), region = 32  ;;  %v1357_v1 = vld [vmem:[%s1715_s1 + $0x40] sm:$0xff] (!%p169_p3)   ;;  %1244 = vmatprep.subr.bf16.mxu0 (!%p169_p3), %v1356_v0  ;;  %v1361_v5 = vld [vmem:[%s1715_s1 + $0x48] sm:$0xff] (!%p169_p3)   ;;  %v1365_v9 = vld [vmem:[%s1715_s1 + $0x50] sm:$0xff] (!%p169_p3)  }
   0x8   : > { %v1358_v2 = vld [vmem:[%s1715_s1 + $0x80] sm:$0xff] (!%p169_p3)   ;;  %1266 = vmatprep.subr.bf16.mxu1 (!%p169_p3), %v1357_v1  ;;  %v1362_v6 = vld [vmem:[%s1715_s1 + $0x88] sm:$0xff] (!%p169_p3)   ;;  %v1366_v10 = vld [vmem:[%s1715_s1 + $0x90] sm:$0xff] (!%p169_p3)  }
   0x9   : > { %v1359_v3 = vld [vmem:[%s1715_s1] sm:$0xff] (!%p169_p3)   ;;  %1245 = vmatpush3.bf16.msra.mxu0 (!%p169_p3), %v1358_v2  ;;  %v1363_v7 = vld [vmem:[%s1715_s1 + $0x8] sm:$0xff] (!%p169_p3)   ;;  %v1367_v11 = vld [vmem:[%s1715_s1 + $0x10] sm:$0xff] (!%p169_p3)  }
   0xa   : > { %1267 = vmatpush3.bf16.msra.mxu1 (!%p169_p3), %v1359_v3  ;;  %1246 = vmatprep.subr.bf16.mxu0 (!%p169_p3), %v1360_v4  ;;  %v1368_v12 = vld [vmem:[%s1715_s1 + $0xd8] sm:$0xff] (!%p169_p3)   ;;  %v1372_v16 = vld [vmem:[%s1715_s1 + $0xe0] sm:$0xff] (!%p169_p3)   ;;  %v1376_v20 = vld [vmem:[%s1715_s1 + $0xe8] sm:$0xff] (!%p169_p3)  }
   0xb   : > { %1268 = vmatprep.subr.bf16.mxu1 (!%p169_p3), %v1361_v5  ;;  %v1369_v13 = vld [vmem:[%s1715_s1 + $0x58] sm:$0xff] (!%p169_p3)   ;;  %v1373_v17 = vld [vmem:[%s1715_s1 + $0x60] sm:$0xff] (!%p169_p3)   ;;  %v1377_v21 = vld [vmem:[%s1715_s1 + $0x68] sm:$0xff] (!%p169_p3)  }
   0xc   : > { %v1370_v14 = vld [vmem:[%s1715_s1 + $0x98] sm:$0xff] (!%p169_p3)   ;;  %v1374_v18 = vld [vmem:[%s1715_s1 + $0xa0] sm:$0xff] (!%p169_p3)   ;;  %v1378_v22 = vld [vmem:[%s1715_s1 + $0xa8] sm:$0xff] (!%p169_p3)  }
   0xd   : > { %1247 = vmatpush3.bf16.msra.mxu0 (!%p169_p3), %v1362_v6  ;;  %v1371_v15 = vld [vmem:[%s1715_s1 + $0x18] sm:$0xff] (!%p169_p3)   ;;  %v1375_v19 = vld [vmem:[%s1715_s1 + $0x20] sm:$0xff] (!%p169_p3)   ;;  %v1379_v23 = vld [vmem:[%s1715_s1 + $0x28] sm:$0xff] (!%p169_p3)  }
   0xe   : > { %1269 = vmatpush3.bf16.msra.mxu1 %v1363_v7  ;;  %1248 = vmatprep.subr.bf16.mxu0 %v1364_v8  ;;  %s1723_s12 = smov (!%p200_p4, %s1442_s12), 1  ;;  %v1380_v24 = vld [vmem:[%s1715_s1 + $0xf0] sm:$0xff]   ;;  %v1384_v28 = vld [vmem:[%s1715_s1 + $0xf8] sm:$0xff]   ;;  %v1392_v38 = vld [vmem:[%s1715_s1 + $0x140] sm:$0xff]  }
   0xf   : > { %1270 = vmatprep.subr.bf16.mxu1 %v1365_v9  ;;  %v1381_v25 = vld [vmem:[%s1715_s1 + $0x70] sm:$0xff]   ;;  %s1243_s24 = sshll.u32 %s1723_s12, 3  ;;  %v1385_v29 = vld [vmem:[%s1715_s1 + $0x78] sm:$0xff]   ;;  %v1393_v39 = vld [vmem:[%s1715_s1 + $0x1c0] sm:$0xff]   ;;  %s217_s16 = scalar_lea.vmem %s1717_s3, %s1723_s12 }
  0x10   : > { %v1382_v26 = vld [vmem:[%s1715_s1 + $0xb0] sm:$0xff]   ;;  %s1590_s6 = scalar_lea.vmem %s1714_s0, %s1243_s24  ;;  %v1386_v30 = vld [vmem:[%s1715_s1 + $0xb8] sm:$0xff]   ;;  %v1394_v46 = vld [vmem:[%s1715_s1 + $0x100] sm:$0xff]  }
  0x11   : > { %1249 = vmatpush3.bf16.msra.mxu0 %v1366_v10  ;;  %v1383_v27 = vld [vmem:[%s1715_s1 + $0x30] sm:$0xff]   ;;  %v1387_v31 = vld [vmem:[%s1715_s1 + $0x38] sm:$0xff]   ;;  %v252_v32 = vld [vmem:[%s1590_s6] sm:$0x33] }
  0x12   : > { %1271 = vmatpush3.bf16.msra.mxu1 %v1367_v11  ;;  %1250 = vmatprep.subr.bf16.mxu0 %v1368_v12  ;;  %v219_v33 = vld [vmem:[%s1590_s6] sm:$0x11]  ;;  %v1104_v34 = vcombine.low %v252_v32, %v252_v32  ;;  %v1105_v35 = vcombine.high %v252_v32, %v252_v32  ;;  %v1397_v50 = vld [vmem:[%s1715_s1 + $0x1c8] sm:$0xff]   ;;  %v1401_v54 = vld [vmem:[%s1715_s1 + $0x1d0] sm:$0xff]  }
  0x13   : > { %1272 = vmatprep.subr.bf16.mxu1 %v1369_v13  ;;  %v1122_v36 = vcombine.low %v219_v33, %v219_v33  ;;  %v1123_v37 = vcombine.high %v219_v33, %v219_v33  ;;  %v1395_v47 = vld [vmem:[%s1715_s1 + $0x180] sm:$0xff]   ;;  %v1396_v51 = vld [vmem:[%s1715_s1 + $0x148] sm:$0xff]   ;;  %v1400_v55 = vld [vmem:[%s1715_s1 + $0x150] sm:$0xff]  }
  0x14   : > { %v299_v40 = vshrl.u32 %v1105_v35, 16  ;;  %v301_v41 = vshll.u32 %v1105_v35, 16  ;;  %v292_v42 = vshrl.u32 %v1104_v34, 16  ;;  %v294_v43 = vshll.u32 %v1104_v34, 16  ;;  %v1399_v52 = vld [vmem:[%s1715_s1 + $0x188] sm:$0xff]   ;;  %v1403_v56 = vld [vmem:[%s1715_s1 + $0x190] sm:$0xff]  }
  0x15   : > { %1251 = vmatpush3.bf16.msra.mxu0 %v1370_v14  ;;  %578 = vmatprep.mubr.bf16.mxu1 %v1123_v37  ;;  %v1398_v53 = vld [vmem:[%s1715_s1 + $0x108] sm:$0xff]   ;;  %v1402_v57 = vld [vmem:[%s1715_s1 + $0x110] sm:$0xff]   ;;  %v1405_v58 = vld [vmem:[%s1715_s1 + $0x1d8] sm:$0xff]  }
  0x16   : > { %1273 = vmatpush3.bf16.msra.mxu1 %v1371_v15  ;;  %1252 = vmatprep.subr.bf16.mxu0 %v1372_v16  ;;  %v303_v44 = vrot.slane %v301_v41, 1  ;;  %v296_v45 = vrot.slane %v294_v43, 1  ;;  %v1404_v59 = vld [vmem:[%s1715_s1 + $0x158] sm:$0xff]   ;;  %v1409_v62 = vld [vmem:[%s1715_s1 + $0x1e0] sm:$0xff]   ;;  %v1413_v2 = vld [vmem:[%s1715_s1 + $0x1e8] sm:$0xff]  }
  0x17   : > { %1274 = vmatprep.subr.bf16.mxu1 %v1373_v17  ;;  %v1407_v60 = vld [vmem:[%s1715_s1 + $0x198] sm:$0xff]   ;;  %v1408_v63 = vld [vmem:[%s1715_s1 + $0x160] sm:$0xff]   ;;  %v1412_v3 = vld [vmem:[%s1715_s1 + $0x168] sm:$0xff]  }
  0x18   : > { %v304_v48 = vor.u32 %v303_v44, %v299_v40  ;;  %v297_v49 = vor.u32 %v296_v45, %v292_v42  ;;  %v1406_v61 = vld [vmem:[%s1715_s1 + $0x118] sm:$0xff]   ;;  %v1411_v0 = vld [vmem:[%s1715_s1 + $0x1a0] sm:$0xff]   ;;  %v1415_v4 = vld [vmem:[%s1715_s1 + $0x1a8] sm:$0xff]  }
  0x19   : > { %1253 = vmatpush3.bf16.msra.mxu0 %v1374_v18  ;;  %v1410_v1 = vld [vmem:[%s1715_s1 + $0x120] sm:$0xff]   ;;  %v1414_v5 = vld [vmem:[%s1715_s1 + $0x128] sm:$0xff]   ;;  %v1417_v6 = vld [vmem:[%s1715_s1 + $0x1f0] sm:$0xff]  }
  0x1a   : > { %1275 = vmatpush3.bf16.msra.mxu1 %v1375_v19  ;;  %1254 = vmatprep.subr.bf16.mxu0 %v1376_v20  ;;  %v1416_v7 = vld [vmem:[%s1715_s1 + $0x170] sm:$0xff]   ;;  %v1421_v10 = vld [vmem:[%s1715_s1 + $0x1f8] sm:$0xff]   ;;  %v586_v13 = vld [vmem:[%s1590_s6] sm:$0x22] }
  0x1b   : > { %1276 = vmatprep.subr.bf16.mxu1 %v1377_v21  ;;  %435 = vmatprep.mubr.bf16.mxu0 %v304_v48  ;;  %v1419_v8 = vld [vmem:[%s1715_s1 + $0x1b0] sm:$0xff]   ;;  %v1420_v11 = vld [vmem:[%s1715_s1 + $0x178] sm:$0xff]   ;;  %v766_v14 = vld [vmem:[%s1590_s6] sm:$0x66]  ;;  %v1172_v15 = vcombine.low %v586_v13, %v586_v13  ;;  %v1173_v16 = vcombine.high %v586_v13, %v586_v13 }
  0x1c   : > { %v1418_v9 = vld [vmem:[%s1715_s1 + $0x130] sm:$0xff]   ;;  %v1423_v12 = vld [vmem:[%s1715_s1 + $0x1b8] sm:$0xff]   ;;  %v1222_v17 = vcombine.low %v766_v14, %v766_v14  ;;  %v1223_v18 = vcombine.high %v766_v14, %v766_v14 }
  0x1d   : > { %1255 = vmatpush3.bf16.msra.mxu0 %v1378_v22  ;;  %v1422_v19 = vld [vmem:[%s1715_s1 + $0x138] sm:$0xff]   ;;  %v626_v20 = vrot.slane %v1173_v16, 1 }
  0x1e   : > { %1277 = vmatpush3.bf16.msra.mxu1 %v1379_v23  ;;  %1256 = vmatprep.subr.bf16.mxu0 %v1380_v24  ;;  %v814_v21 = vshrl.u32 %v1223_v18, 16  ;;  %v817_v22 = vshll.u32 %v1223_v18, 16  ;;  %v806_v23 = vshrl.u32 %v1222_v17, 16  ;;  %v809_v24 = vshll.u32 %v1222_v17, 16 }
  0x1f   : > { %1278 = vmatprep.subr.bf16.mxu1 %v1381_v25  ;;  %v625_v25 = vrot.slane %v1172_v15, 1 }
  0x21   : > { %1257 = vmatpush3.bf16.msra.mxu0 %v1382_v26  ;;  %v816_v26 = vrot.slane %v814_v21, 1 }
  0x22   : > { %1279 = vmatpush3.bf16.msra.mxu1 %v1383_v27  ;;  %1258 = vmatprep.subr.bf16.mxu0 %v1384_v28  ;;  %v819_v27 = vrot.slane %v817_v22, 2  ;;  %v808_v28 = vrot.slane %v806_v23, 1 }
  0x23   : > { %1280 = vmatprep.subr.bf16.mxu1 %v1385_v29  ;;  %v811_v29 = vrot.slane %v809_v24, 2 }
  0x25   : > { %1259 = vmatpush3.bf16.msra.mxu0 %v1386_v30  ;;  %v820_v30 = vor.u32 %v819_v27, %v816_v26 }
  0x26   : > { %1281 = vmatpush3.bf16.msra.mxu1 %v1387_v31  ;;  %1288 = vmatprep.subr.bf16.mxu0 %v1392_v38  ;;  %v812_v31 = vor.u32 %v811_v29, %v808_v28 }
  0x27   : > { %1310 = vmatprep.subr.bf16.mxu1 %v1393_v39 }
  0x28   : > { %436 = vmatmul.mubr.bf16.vlgmr.msra.gmra.mrb[0].mxu0 %v297_v49 }
  0x29   : > { %579 = vmatmul.mubr.bf16.vlgmr.msra.gmra.mrb[0].mxu1 %v1122_v36  ;;  %1289 = vmatpush3.bf16.msra.mxu0 %v1394_v46 }
  0x2a   : > { %1311 = vmatpush3.bf16.msra.mxu1 %v1395_v47  ;;  %1290 = vmatprep.subr.bf16.mxu0 %v1396_v51 }
  0x2b   : > { %1312 = vmatprep.subr.bf16.mxu1 %v1397_v50  ;;  %757 = vmatprep.mubr.bf16.mxu0 %v626_v20 }
  0x2c   : > { %951 = vmatprep.mubr.bf16.mxu1 %v820_v30 }
  0x2d   : > { %1291 = vmatpush3.bf16.msra.mxu0 %v1398_v53 }
  0x2e   : > { %1313 = vmatpush3.bf16.msra.mxu1 %v1399_v52  ;;  %1292 = vmatprep.subr.bf16.mxu0 %v1400_v55 }
  0x2f   : > { %1314 = vmatprep.subr.bf16.mxu1 %v1401_v54  ;;  %v1240_v54 = vld [vmem:[%s1716_s2] ss:$0 sm:$0xff] }
  0x31   : > { %1293 = vmatpush3.bf16.msra.mxu0 %v1402_v57 }
  0x32   : > { %1315 = vmatpush3.bf16.msra.mxu1 %v1403_v56  ;;  %1294 = vmatprep.subr.bf16.mxu0 %v1404_v59 }
  0x33   : > { %1316 = vmatprep.subr.bf16.mxu1 %v1405_v58 }
  0x35   : > { %1295 = vmatpush3.bf16.msra.mxu0 %v1406_v61 }
  0x36   : > { %1317 = vmatpush3.bf16.msra.mxu1 %v1407_v60  ;;  %1296 = vmatprep.subr.bf16.mxu0 %v1408_v63 }
  0x37   : > { %1318 = vmatprep.subr.bf16.mxu1 %v1409_v62 }
  0x39   : > { %1297 = vmatpush3.bf16.msra.mxu0 %v1410_v1 }
  0x3a   : > { %1319 = vmatpush3.bf16.msra.mxu1 %v1411_v0  ;;  %1298 = vmatprep.subr.bf16.mxu0 %v1412_v3 }
  0x3b   : > { %1320 = vmatprep.subr.bf16.mxu1 %v1413_v2 }
  0x3d   : > { %1299 = vmatpush3.bf16.msra.mxu0 %v1414_v5 }
  0x3e   : > { %1321 = vmatpush3.bf16.msra.mxu1 %v1415_v4  ;;  %1300 = vmatprep.subr.bf16.mxu0 %v1416_v7 }
  0x3f   : > { %1322 = vmatprep.subr.bf16.mxu1 %v1417_v6 }
  0x41   : > { %1301 = vmatpush3.bf16.msra.mxu0 %v1418_v9 }
  0x42   : > { %1323 = vmatpush3.bf16.msra.mxu1 %v1419_v8  ;;  %1302 = vmatprep.subr.bf16.mxu0 %v1420_v11 }
  0x43   : > { %1324 = vmatprep.subr.bf16.mxu1 %v1421_v10 }
  0x45   : > { %1303 = vmatpush3.bf16.msra.mxu0 %v1422_v19 }
  0x46   : > { %1325 = vmatpush3.bf16.msra.mxu1 %v1423_v12 }
  0x48   : > { %758 = vmatmul.mubr.bf16.vlgmr.msra.gmra.mrb[4].mxu0 %v625_v25 }
  0x49   : > { %952 = vmatmul.mubr.bf16.vlgmr.msra.gmra.mrb[4].mxu1 %v812_v31 }
  0xfb   : > { %v1260_v37 = vpop.f32.mrb[0].mxu0 }
  0xfc   : > { %v1282_v32 = vpop.f32.mrb[0].mxu1  ;;  %v1261_v38 = vpop.f32.mrb[1].mxu0 }
  0xfd   : > { %v1283_v33 = vpop.f32.mrb[1].mxu1  ;;  %v1262_v39 = vadd.f32 %v1261_v38, %v1260_v37  ;;  %v1263_v40 = vpop.f32.mrb[2].mxu0 }
  0xfe   : > { %v1284_v34 = vadd.f32 %v1283_v33, %v1282_v32  ;;  %v1285_v35 = vpop.f32.mrb[2].mxu1  ;;  %v1264_v41 = vpop.f32.mrb[3].mxu0 }
  0xff   : > { %v1286_v36 = vpop.f32.mrb[3].mxu1 }
 0x100   : > { %v581_v42 = vadd.f32 %v1284_v34, %v1262_v39 }
 0x11b   : > { %v1304_v43 = vpop.f32.mrb[4].mxu0 }
 0x11c   : > { %v1326_v44 = vpop.f32.mrb[4].mxu1  ;;  %v1305_v45 = vpop.f32.mrb[5].mxu0 }
 0x11d   : > { %v1306_v46 = vadd.f32 %v1305_v45, %v1304_v43  ;;  %v1327_v47 = vpop.f32.mrb[5].mxu1  ;;  %v1307_v48 = vpop.f32.mrb[6].mxu0 }
 0x11e   : > { %v1328_v49 = vadd.f32 %v1327_v47, %v1326_v44  ;;  %v1329_v50 = vpop.f32.mrb[6].mxu1  ;;  %v1308_v51 = vpop.f32.mrb[7].mxu0 }
 0x11f   : > { %v765_v52 = vadd.f32 %v1306_v46, %v581_v42  ;;  %v1330_v53 = vpop.f32.mrb[7].mxu1 }
 0x121   : > { %v959_v55 = vadd.f32 %v1328_v49, %v765_v52 }
 0x123   : > { %v967_v56 = vadd.f32 %v1240_v54, %v959_v55 }
 0x125   : > { %v968_v57 = vpack.c.bf16 %v967_v56, %v967_v56 }
 0x127   : > { %969 = vst [vmem:[%s217_s16] sm:$0x1] %v968_v57 }
 0x128 PF: > { %s13_s14 = sadd.s32 1, %s1450_s14   ;;  %s1718_s12 = smov %s1446_s13 }
 0x129   : > { %p10_p5 = scmp.ge.s32.totalorder %s13_s14, 4   ;;  %s1719_s13 = smov %s1721_s15 }
 0x12b   :  { %12 = sbr.rel (!%p10_p5) target bundleno = 2 (0x2), region = 71 }

</bundles_post_ra>
